<compile_context>
chip_gen: v5e
topology: v5e:2x2
jax: 0.10.0
libtpu: 0.0.40
codegen_flags: <defaults>
</compile_context>

<pallas_src>
import functools
import math

import jax
import jax.numpy as jnp
from jax.experimental import pallas as pl
from jax.experimental.pallas import tpu as pltpu


def _largest_divisor_at_most(n, cap):
    cap = max(1, min(n, cap))
    for d in range(cap, 0, -1):
        if n % d == 0:
            return d
    return 1


def _pick_bk_block(bk, L, d_model, n_head, d_k, d_v, attn_bytes,
                   budget_bytes=24 * 1024 * 1024, max_block=16):
    """Largest divisor of bk whose per-step working set fits the VMEM budget."""
    per_bk = (
        3 * L * d_model * 4 * 2                # double-buffered q/k/v input blocks
        + L * d_model * 4 * 2                  # double-buffered output block
        + n_head * L * L * attn_bytes * 2      # double-buffered attn output block
        + L * n_head * (2 * d_k + d_v) * 4     # qh / kh / vh values
        + 3 * n_head * L * L * 4               # scores / exp / attn live values
        + L * n_head * d_v * 4                 # ctx
    )
    cap = max(1, budget_bytes // max(per_bk, 1))
    return _largest_divisor_at_most(bk, min(cap, max_block))


# --------------------------------------------------------------------------
# Fused kernel: one (b,k)-block per grid step does projection + attention + fc.
# --------------------------------------------------------------------------
def _fused_mha_kernel(xq_ref, xk_ref, xv_ref, wq_ref, wk_ref, wv_ref,
                      fcw_ref, fcb_ref, o_ref, a_ref, *,
                      n_head, d_k, d_v, inv_temp):
    gbk, L, d_model = xq_ref.shape

    def project(x_ref, w_ref):
        # bf16 MXU operands, f32 accumulation.
        x = x_ref[...].astype(jnp.bfloat16).reshape(gbk * L, d_model)
        y = jnp.dot(x, w_ref[...], preferred_element_type=jnp.float32)
        return y.reshape(gbk, L, w_ref.shape[-1])

    # Pre-scale q by 1/temperature (cheaper than scaling the (L,L) scores).
    qh = project(xq_ref, wq_ref) * inv_temp      # (gbk, L, H*dk)  f32
    kh = project(xk_ref, wk_ref)                 # (gbk, L, H*dk)  f32
    vh = project(xv_ref, wv_ref)                 # (gbk, L, H*dv)  f32

    attn_parts = []
    ctx_parts = []
    for h in range(n_head):                      # static, small head count
        q_h = qh[:, :, h * d_k:(h + 1) * d_k].astype(jnp.bfloat16)
        k_h = kh[:, :, h * d_k:(h + 1) * d_k].astype(jnp.bfloat16)
        v_h = vh[:, :, h * d_v:(h + 1) * d_v].astype(jnp.bfloat16)

        s = jnp.einsum('bld,btd->blt', q_h, k_h,
                       preferred_element_type=jnp.float32)       # (gbk, L, L)
        m = jnp.max(s, axis=-1, keepdims=True)
        p = jnp.exp(s - m)                                        # f32 (EUP)
        inv_den = pl.reciprocal(jnp.sum(p, axis=-1, keepdims=True), approx=True)

        # PV consumes un-normalized p; only the (L, d_v) result is scaled.
        ctx_parts.append(
            jnp.einsum('blt,btd->bld', p.astype(jnp.bfloat16), v_h,
                       preferred_element_type=jnp.float32) * inv_den)
        attn_parts.append(p * inv_den)

    # Lane-dense attention write-back: (gbk, L, n_head*L).
    a_ref[...] = jnp.concatenate(attn_parts, axis=-1).astype(a_ref.dtype)

    ctx = jnp.concatenate(ctx_parts, axis=-1)                     # (gbk, L, H*dv)
    ctx = ctx.astype(jnp.bfloat16).reshape(gbk * L, n_head * d_v)
    out = jnp.dot(ctx, fcw_ref[...], preferred_element_type=jnp.float32)
    out = out + fcb_ref[...]
    o_ref[...] = out.reshape(gbk, L, d_model).astype(o_ref.dtype)


# --------------------------------------------------------------------------
# Full module forward
# --------------------------------------------------------------------------
def multi_head_attention_tem_bias(q, k, v, params, *, n_head, d_k, d_v,
                                  mask=None, attn_dtype=jnp.float32):
    """q, k, v: (B, K, L, d_model). Returns (output, attn) like the module."""
    if mask is not None:
        # TODO(synk): mask path not implemented (module default is mask=None).
        raise NotImplementedError("mask path not implemented")
    B, Kv, L, d_model = q.shape
    bk = B * Kv
    inv_temp = 1.0 / float(d_k ** 0.5)

    xq = q.reshape(bk, L, d_model)
    xk = k.reshape(bk, L, d_model)
    xv = v.reshape(bk, L, d_model)

    # Weight panels: torch (out,in) -> (in,out); bf16 halves weight DMA bytes.
    wq_t = jnp.asarray(params['w_qs']).T.astype(jnp.bfloat16)     # (d_model, H*dk)
    wk_t = jnp.asarray(params['w_ks']).T.astype(jnp.bfloat16)     # (d_model, H*dk)
    wv_t = jnp.asarray(params['w_vs']).T.astype(jnp.bfloat16)     # (d_model, H*dv)
    fc_wt = jnp.asarray(params['fc_w']).T.astype(jnp.bfloat16)    # (H*dv, d_model)
    fc_b = jnp.asarray(params['fc_b'], jnp.float32).reshape(1, d_model)

    attn_bytes = jnp.dtype(attn_dtype).itemsize
    gbk = _pick_bk_block(bk, L, d_model, n_head, d_k, d_v, attn_bytes)
    grid = (bk // gbk,)

    kern = functools.partial(_fused_mha_kernel, n_head=n_head, d_k=d_k,
                             d_v=d_v, inv_temp=inv_temp)

    out, attn = pl.pallas_call(
        kern,
        out_shape=(jax.ShapeDtypeStruct((bk, L, d_model), jnp.float32),
                   jax.ShapeDtypeStruct((bk, L, n_head * L), attn_dtype)),
        grid_spec=pltpu.PrefetchScalarGridSpec(
            num_scalar_prefetch=0,
            grid=grid,
            in_specs=[
                pl.BlockSpec((gbk, L, d_model), lambda g: (g, 0, 0)),
                pl.BlockSpec((gbk, L, d_model), lambda g: (g, 0, 0)),
                pl.BlockSpec((gbk, L, d_model), lambda g: (g, 0, 0)),
                pl.BlockSpec((d_model, n_head * d_k), lambda g: (0, 0)),
                pl.BlockSpec((d_model, n_head * d_k), lambda g: (0, 0)),
                pl.BlockSpec((d_model, n_head * d_v), lambda g: (0, 0)),
                pl.BlockSpec((n_head * d_v, d_model), lambda g: (0, 0)),
                pl.BlockSpec((1, d_model), lambda g: (0, 0)),
            ],
            out_specs=(
                pl.BlockSpec((gbk, L, d_model), lambda g: (g, 0, 0)),
                pl.BlockSpec((gbk, L, n_head * L), lambda g: (g, 0, 0)),
            ),
        ),
        compiler_params=pltpu.CompilerParams(
            dimension_semantics=("parallel",),
            vmem_limit_bytes=64 * 1024 * 1024),
    )(xq, xk, xv, wq_t, wk_t, wv_t, fc_wt, fc_b)

    out = out.reshape(B, Kv, L, d_model)
    # (bk, L, H*L) lane-dense kernel layout -> (B, K, H, L, L) module layout.
    attn = attn.reshape(B, Kv, L, n_head, L).transpose(0, 1, 3, 2, 4)
    # TODO(synk): nn.Dropout layers are identity in eval mode; not applied.
    return out, attn.astype(jnp.float32)


# --------------------------------------------------------------------------
# Pure-JAX reference mirroring the PyTorch forward (eval mode, defaults).
# --------------------------------------------------------------------------
def mha_ref(q, k, v, params, *, n_head, d_k, d_v):
    B, Kv, L, Dm = q.shape
    temp = d_k ** 0.5
    hp = jax.lax.Precision.HIGHEST

    def proj(x, w, d):
        y = jnp.einsum('bkld,ed->bkle', x, w, precision=hp)
        y = y.reshape(B, Kv, L, n_head, d)
        return jnp.transpose(y, (0, 1, 3, 2, 4))            # b k n l d

    qh = proj(q, params['w_qs'], d_k)
    kh = proj(k, params['w_ks'], d_k)
    vh = proj(v, params['w_vs'], d_v)

    attn = jnp.einsum('bknld,bkntd->bknlt', qh, kh, precision=hp) / temp
    attn = jax.nn.softmax(attn, axis=-1)
    out = jnp.einsum('bknlt,bkntd->bknld', attn, vh, precision=hp)
    out = jnp.transpose(out, (0, 1, 3, 2, 4)).reshape(B, Kv, L, n_head * d_v)
    out = jnp.einsum('bklf,df->bkld', out, params['fc_w'],
                     precision=hp) + params['fc_b']
    return out, attn


if __name__ == "__main__":
    # Small shapes consistent with the module: batch=2, variables K=4,
    # sequence L=16, d_model=32, n_head=4, d_k=d_v=8.
    B, Kv, L, Dm = 2, 4, 16, 32
    n_head, d_k, d_v = 4, 8, 8

    key = jax.random.PRNGKey(0)
    kq, kk, kv, k1, k2, k3, k4, k5 = jax.random.split(key, 8)

    q = jax.random.normal(kq, (B, Kv, L, Dm), jnp.float32)
    k = jax.random.normal(kk, (B, Kv, L, Dm), jnp.float32)
    v = jax.random.normal(kv, (B, Kv, L, Dm), jnp.float32)

    lim_in = 1.0 / math.sqrt(Dm)
    lim_fc = 1.0 / math.sqrt(n_head * d_v)
    params = {
        'w_qs': jax.random.uniform(k1, (n_head * d_k, Dm), jnp.float32, -lim_in, lim_in),
        'w_ks': jax.random.uniform(k2, (n_head * d_k, Dm), jnp.float32, -lim_in, lim_in),
        'w_vs': jax.random.uniform(k3, (n_head * d_v, Dm), jnp.float32, -lim_in, lim_in),
        'fc_w': jax.random.uniform(k4, (Dm, n_head * d_v), jnp.float32, -lim_fc, lim_fc),
        'fc_b': jax.random.uniform(k5, (Dm,), jnp.float32, -lim_fc, lim_fc),
    }

    out, attn = multi_head_attention_tem_bias(
        q, k, v, params, n_head=n_head, d_k=d_k, d_v=d_v)
    out = jax.block_until_ready(out)
    attn = jax.block_until_ready(attn)

    ref_out, ref_attn = mha_ref(q, k, v, params, n_head=n_head, d_k=d_k, d_v=d_v)

    assert out.shape == (B, Kv, L, Dm), out.shape
    assert attn.shape == (B, Kv, n_head, L, L), attn.shape
    # Tolerance loosened vs. the pure-f32 version: bf16 MXU operands with f32
    # accumulation + approximate reciprocal (reference uses f32 HIGHEST).
    assert jnp.allclose(attn, ref_attn, atol=1e-2, rtol=1e-2), "attn mismatch"
    assert jnp.allclose(out, ref_out, atol=1e-2, rtol=1e-2), "output mismatch"

    print("KERNEL_OK")
</pallas_src>

<mosaic_0001>
module attributes {stable_mosaic.version = 11 : i64} {
  func.func @_fused_mha_kernel(%arg0: i32, %arg1: memref<8x16x32xf32, #tpu.memory_space<vmem>>, %arg2: memref<8x16x32xf32, #tpu.memory_space<vmem>>, %arg3: memref<8x16x32xf32, #tpu.memory_space<vmem>>, %arg4: memref<32x32xbf16, #tpu.memory_space<vmem>>, %arg5: memref<32x32xbf16, #tpu.memory_space<vmem>>, %arg6: memref<32x32xbf16, #tpu.memory_space<vmem>>, %arg7: memref<32x32xbf16, #tpu.memory_space<vmem>>, %arg8: memref<1x32xf32, #tpu.memory_space<vmem>>, %arg9: memref<8x16x32xf32, #tpu.memory_space<vmem>>, %arg10: memref<8x16x64xf32, #tpu.memory_space<vmem>>) attributes {dimension_semantics = [#tpu.dimension_semantics<parallel>], iteration_bounds = array<i64: 1>, scalar_prefetch = 0 : i64, scratch_operands = 0 : i64, tpu.core_type = #tpu.core_type<tc>, window_params = [{transform_indices = @transform_0, window_bounds = array<i64: 8, 16, 32>}, {transform_indices = @transform_1, window_bounds = array<i64: 8, 16, 32>}, {transform_indices = @transform_2, window_bounds = array<i64: 8, 16, 32>}, {pipeline_mode = #tpu.pipeline_mode<synchronous>, transform_indices = @transform_3, window_bounds = array<i64: 32, 32>}, {pipeline_mode = #tpu.pipeline_mode<synchronous>, transform_indices = @transform_4, window_bounds = array<i64: 32, 32>}, {pipeline_mode = #tpu.pipeline_mode<synchronous>, transform_indices = @transform_5, window_bounds = array<i64: 32, 32>}, {pipeline_mode = #tpu.pipeline_mode<synchronous>, transform_indices = @transform_6, window_bounds = array<i64: 32, 32>}, {pipeline_mode = #tpu.pipeline_mode<synchronous>, transform_indices = @transform_7, window_bounds = array<i64: 1, 32>}, {transform_indices = @transform_8, window_bounds = array<i64: 8, 16, 32>}, {transform_indices = @transform_9, window_bounds = array<i64: 8, 16, 64>}]} {
    %c0 = arith.constant 0 : index
    %c0_0 = arith.constant 0 : index
    %c0_1 = arith.constant 0 : index
    %0 = vector.load %arg1[%c0, %c0_0, %c0_1] : memref<8x16x32xf32, #tpu.memory_space<vmem>>, vector<8x16x32xf32>
    %1 = arith.truncf %0 : vector<8x16x32xf32> to vector<8x16x32xbf16>
    %2 = vector.shape_cast %1 : vector<8x16x32xbf16> to vector<128x32xbf16>
    %c0_2 = arith.constant 0 : index
    %c0_3 = arith.constant 0 : index
    %3 = vector.load %arg4[%c0_2, %c0_3] : memref<32x32xbf16, #tpu.memory_space<vmem>>, vector<32x32xbf16>
    %cst = arith.constant dense<0.000000e+00> : vector<128x32xf32>
    %4 = tpu.matmul %2, %3, %cst {dimension_numbers = #tpu.dot_dimension_numbers<[1], [0], [0], [1], [0, 0, 1, 1], [], []>} : vector<128x32xbf16>, vector<32x32xbf16>, vector<128x32xf32> -> vector<128x32xf32>
    %5 = vector.shape_cast %4 : vector<128x32xf32> to vector<8x16x32xf32>
    %cst_4 = arith.constant 0.353553385 : f32
    %6 = vector.broadcast %cst_4 : f32 to vector<8x16x32xf32>
    %7 = arith.mulf %5, %6 : vector<8x16x32xf32>
    %c0_5 = arith.constant 0 : index
    %c0_6 = arith.constant 0 : index
    %c0_7 = arith.constant 0 : index
    %8 = vector.load %arg2[%c0_5, %c0_6, %c0_7] : memref<8x16x32xf32, #tpu.memory_space<vmem>>, vector<8x16x32xf32>
    %9 = arith.truncf %8 : vector<8x16x32xf32> to vector<8x16x32xbf16>
    %10 = vector.shape_cast %9 : vector<8x16x32xbf16> to vector<128x32xbf16>
    %c0_8 = arith.constant 0 : index
    %c0_9 = arith.constant 0 : index
    %11 = vector.load %arg5[%c0_8, %c0_9] : memref<32x32xbf16, #tpu.memory_space<vmem>>, vector<32x32xbf16>
    %cst_10 = arith.constant dense<0.000000e+00> : vector<128x32xf32>
    %12 = tpu.matmul %10, %11, %cst_10 {dimension_numbers = #tpu.dot_dimension_numbers<[1], [0], [0], [1], [0, 0, 1, 1], [], []>} : vector<128x32xbf16>, vector<32x32xbf16>, vector<128x32xf32> -> vector<128x32xf32>
    %13 = vector.shape_cast %12 : vector<128x32xf32> to vector<8x16x32xf32>
    %c0_11 = arith.constant 0 : index
    %c0_12 = arith.constant 0 : index
    %c0_13 = arith.constant 0 : index
    %14 = vector.load %arg3[%c0_11, %c0_12, %c0_13] : memref<8x16x32xf32, #tpu.memory_space<vmem>>, vector<8x16x32xf32>
    %15 = arith.truncf %14 : vector<8x16x32xf32> to vector<8x16x32xbf16>
    %16 = vector.shape_cast %15 : vector<8x16x32xbf16> to vector<128x32xbf16>
    %c0_14 = arith.constant 0 : index
    %c0_15 = arith.constant 0 : index
    %17 = vector.load %arg6[%c0_14, %c0_15] : memref<32x32xbf16, #tpu.memory_space<vmem>>, vector<32x32xbf16>
    %cst_16 = arith.constant dense<0.000000e+00> : vector<128x32xf32>
    %18 = tpu.matmul %16, %17, %cst_16 {dimension_numbers = #tpu.dot_dimension_numbers<[1], [0], [0], [1], [0, 0, 1, 1], [], []>} : vector<128x32xbf16>, vector<32x32xbf16>, vector<128x32xf32> -> vector<128x32xf32>
    %19 = vector.shape_cast %18 : vector<128x32xf32> to vector<8x16x32xf32>
    %20 = vector.extract_strided_slice %7 {offsets = [0, 0, 0], sizes = [8, 16, 8], strides = [1, 1, 1]} : vector<8x16x32xf32> to vector<8x16x8xf32>
    %21 = arith.truncf %20 : vector<8x16x8xf32> to vector<8x16x8xbf16>
    %22 = vector.extract_strided_slice %13 {offsets = [0, 0, 0], sizes = [8, 16, 8], strides = [1, 1, 1]} : vector<8x16x32xf32> to vector<8x16x8xf32>
    %23 = arith.truncf %22 : vector<8x16x8xf32> to vector<8x16x8xbf16>
    %24 = vector.extract_strided_slice %19 {offsets = [0, 0, 0], sizes = [8, 16, 8], strides = [1, 1, 1]} : vector<8x16x32xf32> to vector<8x16x8xf32>
    %25 = arith.truncf %24 : vector<8x16x8xf32> to vector<8x16x8xbf16>
    "tpu.trace_start"() <{level = 10 : i32, message = "bld,btd->blt"}> : () -> ()
    %cst_17 = arith.constant dense<0.000000e+00> : vector<8x16x16xf32>
    %26 = tpu.matmul %21, %23, %cst_17 {dimension_numbers = #tpu.dot_dimension_numbers<[2], [2], [1], [1], [0, 0, 0, 1, 1, 1], [0], [0]>} : vector<8x16x8xbf16>, vector<8x16x8xbf16>, vector<8x16x16xf32> -> vector<8x16x16xf32>
    "tpu.trace_stop"() : () -> ()
    %cst_18 = arith.constant dense<0xFF800000> : vector<8x16xf32>
    %27 = vector.multi_reduction <maximumf>, %26, %cst_18 [2] : vector<8x16x16xf32> to vector<8x16xf32>
    %28 = vector.shape_cast %27 : vector<8x16xf32> to vector<8x16x1xf32>
    %29 = vector.broadcast %28 : vector<8x16x1xf32> to vector<8x16x16xf32>
    %30 = arith.subf %26, %29 : vector<8x16x16xf32>
    %31 = math.exp %30 : vector<8x16x16xf32>
    %cst_19 = arith.constant dense<0.000000e+00> : vector<8x16xf32>
    %32 = vector.multi_reduction <add>, %31, %cst_19 [2] : vector<8x16x16xf32> to vector<8x16xf32>
    %33 = vector.shape_cast %32 : vector<8x16xf32> to vector<8x16x1xf32>
    %34 = tpu.reciprocal %33 {approx = true} : vector<8x16x1xf32> -> vector<8x16x1xf32>
    %35 = arith.truncf %31 : vector<8x16x16xf32> to vector<8x16x16xbf16>
    "tpu.trace_start"() <{level = 10 : i32, message = "blt,btd->bld"}> : () -> ()
    %cst_20 = arith.constant dense<0.000000e+00> : vector<8x16x8xf32>
    %36 = tpu.matmul %35, %25, %cst_20 {dimension_numbers = #tpu.dot_dimension_numbers<[2], [1], [1], [2], [0, 0, 0, 1, 1, 2], [0], [0]>} : vector<8x16x16xbf16>, vector<8x16x8xbf16>, vector<8x16x8xf32> -> vector<8x16x8xf32>
    "tpu.trace_stop"() : () -> ()
    %37 = vector.broadcast %34 : vector<8x16x1xf32> to vector<8x16x8xf32>
    %38 = arith.mulf %36, %37 : vector<8x16x8xf32>
    %39 = vector.broadcast %34 : vector<8x16x1xf32> to vector<8x16x16xf32>
    %40 = arith.mulf %31, %39 : vector<8x16x16xf32>
    %41 = vector.extract_strided_slice %7 {offsets = [0, 0, 8], sizes = [8, 16, 8], strides = [1, 1, 1]} : vector<8x16x32xf32> to vector<8x16x8xf32>
    %42 = arith.truncf %41 : vector<8x16x8xf32> to vector<8x16x8xbf16>
    %43 = vector.extract_strided_slice %13 {offsets = [0, 0, 8], sizes = [8, 16, 8], strides = [1, 1, 1]} : vector<8x16x32xf32> to vector<8x16x8xf32>
    %44 = arith.truncf %43 : vector<8x16x8xf32> to vector<8x16x8xbf16>
    %45 = vector.extract_strided_slice %19 {offsets = [0, 0, 8], sizes = [8, 16, 8], strides = [1, 1, 1]} : vector<8x16x32xf32> to vector<8x16x8xf32>
    %46 = arith.truncf %45 : vector<8x16x8xf32> to vector<8x16x8xbf16>
    "tpu.trace_start"() <{level = 10 : i32, message = "bld,btd->blt"}> : () -> ()
    %cst_21 = arith.constant dense<0.000000e+00> : vector<8x16x16xf32>
    %47 = tpu.matmul %42, %44, %cst_21 {dimension_numbers = #tpu.dot_dimension_numbers<[2], [2], [1], [1], [0, 0, 0, 1, 1, 1], [0], [0]>} : vector<8x16x8xbf16>, vector<8x16x8xbf16>, vector<8x16x16xf32> -> vector<8x16x16xf32>
    "tpu.trace_stop"() : () -> ()
    %cst_22 = arith.constant dense<0xFF800000> : vector<8x16xf32>
    %48 = vector.multi_reduction <maximumf>, %47, %cst_22 [2] : vector<8x16x16xf32> to vector<8x16xf32>
    %49 = vector.shape_cast %48 : vector<8x16xf32> to vector<8x16x1xf32>
    %50 = vector.broadcast %49 : vector<8x16x1xf32> to vector<8x16x16xf32>
    %51 = arith.subf %47, %50 : vector<8x16x16xf32>
    %52 = math.exp %51 : vector<8x16x16xf32>
    %cst_23 = arith.constant dense<0.000000e+00> : vector<8x16xf32>
    %53 = vector.multi_reduction <add>, %52, %cst_23 [2] : vector<8x16x16xf32> to vector<8x16xf32>
    %54 = vector.shape_cast %53 : vector<8x16xf32> to vector<8x16x1xf32>
    %55 = tpu.reciprocal %54 {approx = true} : vector<8x16x1xf32> -> vector<8x16x1xf32>
    %56 = arith.truncf %52 : vector<8x16x16xf32> to vector<8x16x16xbf16>
    "tpu.trace_start"() <{level = 10 : i32, message = "blt,btd->bld"}> : () -> ()
    %cst_24 = arith.constant dense<0.000000e+00> : vector<8x16x8xf32>
    %57 = tpu.matmul %56, %46, %cst_24 {dimension_numbers = #tpu.dot_dimension_numbers<[2], [1], [1], [2], [0, 0, 0, 1, 1, 2], [0], [0]>} : vector<8x16x16xbf16>, vector<8x16x8xbf16>, vector<8x16x8xf32> -> vector<8x16x8xf32>
    "tpu.trace_stop"() : () -> ()
    %58 = vector.broadcast %55 : vector<8x16x1xf32> to vector<8x16x8xf32>
    %59 = arith.mulf %57, %58 : vector<8x16x8xf32>
    %60 = vector.broadcast %55 : vector<8x16x1xf32> to vector<8x16x16xf32>
    %61 = arith.mulf %52, %60 : vector<8x16x16xf32>
    %62 = vector.extract_strided_slice %7 {offsets = [0, 0, 16], sizes = [8, 16, 8], strides = [1, 1, 1]} : vector<8x16x32xf32> to vector<8x16x8xf32>
    %63 = arith.truncf %62 : vector<8x16x8xf32> to vector<8x16x8xbf16>
    %64 = vector.extract_strided_slice %13 {offsets = [0, 0, 16], sizes = [8, 16, 8], strides = [1, 1, 1]} : vector<8x16x32xf32> to vector<8x16x8xf32>
    %65 = arith.truncf %64 : vector<8x16x8xf32> to vector<8x16x8xbf16>
    %66 = vector.extract_strided_slice %19 {offsets = [0, 0, 16], sizes = [8, 16, 8], strides = [1, 1, 1]} : vector<8x16x32xf32> to vector<8x16x8xf32>
    %67 = arith.truncf %66 : vector<8x16x8xf32> to vector<8x16x8xbf16>
    "tpu.trace_start"() <{level = 10 : i32, message = "bld,btd->blt"}> : () -> ()
    %cst_25 = arith.constant dense<0.000000e+00> : vector<8x16x16xf32>
    %68 = tpu.matmul %63, %65, %cst_25 {dimension_numbers = #tpu.dot_dimension_numbers<[2], [2], [1], [1], [0, 0, 0, 1, 1, 1], [0], [0]>} : vector<8x16x8xbf16>, vector<8x16x8xbf16>, vector<8x16x16xf32> -> vector<8x16x16xf32>
    "tpu.trace_stop"() : () -> ()
    %cst_26 = arith.constant dense<0xFF800000> : vector<8x16xf32>
    %69 = vector.multi_reduction <maximumf>, %68, %cst_26 [2] : vector<8x16x16xf32> to vector<8x16xf32>
    %70 = vector.shape_cast %69 : vector<8x16xf32> to vector<8x16x1xf32>
    %71 = vector.broadcast %70 : vector<8x16x1xf32> to vector<8x16x16xf32>
    %72 = arith.subf %68, %71 : vector<8x16x16xf32>
    %73 = math.exp %72 : vector<8x16x16xf32>
    %cst_27 = arith.constant dense<0.000000e+00> : vector<8x16xf32>
    %74 = vector.multi_reduction <add>, %73, %cst_27 [2] : vector<8x16x16xf32> to vector<8x16xf32>
    %75 = vector.shape_cast %74 : vector<8x16xf32> to vector<8x16x1xf32>
    %76 = tpu.reciprocal %75 {approx = true} : vector<8x16x1xf32> -> vector<8x16x1xf32>
    %77 = arith.truncf %73 : vector<8x16x16xf32> to vector<8x16x16xbf16>
    "tpu.trace_start"() <{level = 10 : i32, message = "blt,btd->bld"}> : () -> ()
    %cst_28 = arith.constant dense<0.000000e+00> : vector<8x16x8xf32>
    %78 = tpu.matmul %77, %67, %cst_28 {dimension_numbers = #tpu.dot_dimension_numbers<[2], [1], [1], [2], [0, 0, 0, 1, 1, 2], [0], [0]>} : vector<8x16x16xbf16>, vector<8x16x8xbf16>, vector<8x16x8xf32> -> vector<8x16x8xf32>
    "tpu.trace_stop"() : () -> ()
    %79 = vector.broadcast %76 : vector<8x16x1xf32> to vector<8x16x8xf32>
    %80 = arith.mulf %78, %79 : vector<8x16x8xf32>
    %81 = vector.broadcast %76 : vector<8x16x1xf32> to vector<8x16x16xf32>
    %82 = arith.mulf %73, %81 : vector<8x16x16xf32>
    %83 = vector.extract_strided_slice %7 {offsets = [0, 0, 24], sizes = [8, 16, 8], strides = [1, 1, 1]} : vector<8x16x32xf32> to vector<8x16x8xf32>
    %84 = arith.truncf %83 : vector<8x16x8xf32> to vector<8x16x8xbf16>
    %85 = vector.extract_strided_slice %13 {offsets = [0, 0, 24], sizes = [8, 16, 8], strides = [1, 1, 1]} : vector<8x16x32xf32> to vector<8x16x8xf32>
    %86 = arith.truncf %85 : vector<8x16x8xf32> to vector<8x16x8xbf16>
    %87 = vector.extract_strided_slice %19 {offsets = [0, 0, 24], sizes = [8, 16, 8], strides = [1, 1, 1]} : vector<8x16x32xf32> to vector<8x16x8xf32>
    %88 = arith.truncf %87 : vector<8x16x8xf32> to vector<8x16x8xbf16>
    "tpu.trace_start"() <{level = 10 : i32, message = "bld,btd->blt"}> : () -> ()
    %cst_29 = arith.constant dense<0.000000e+00> : vector<8x16x16xf32>
    %89 = tpu.matmul %84, %86, %cst_29 {dimension_numbers = #tpu.dot_dimension_numbers<[2], [2], [1], [1], [0, 0, 0, 1, 1, 1], [0], [0]>} : vector<8x16x8xbf16>, vector<8x16x8xbf16>, vector<8x16x16xf32> -> vector<8x16x16xf32>
    "tpu.trace_stop"() : () -> ()
    %cst_30 = arith.constant dense<0xFF800000> : vector<8x16xf32>
    %90 = vector.multi_reduction <maximumf>, %89, %cst_30 [2] : vector<8x16x16xf32> to vector<8x16xf32>
    %91 = vector.shape_cast %90 : vector<8x16xf32> to vector<8x16x1xf32>
    %92 = vector.broadcast %91 : vector<8x16x1xf32> to vector<8x16x16xf32>
    %93 = arith.subf %89, %92 : vector<8x16x16xf32>
    %94 = math.exp %93 : vector<8x16x16xf32>
    %cst_31 = arith.constant dense<0.000000e+00> : vector<8x16xf32>
    %95 = vector.multi_reduction <add>, %94, %cst_31 [2] : vector<8x16x16xf32> to vector<8x16xf32>
    %96 = vector.shape_cast %95 : vector<8x16xf32> to vector<8x16x1xf32>
    %97 = tpu.reciprocal %96 {approx = true} : vector<8x16x1xf32> -> vector<8x16x1xf32>
    %98 = arith.truncf %94 : vector<8x16x16xf32> to vector<8x16x16xbf16>
    "tpu.trace_start"() <{level = 10 : i32, message = "blt,btd->bld"}> : () -> ()
    %cst_32 = arith.constant dense<0.000000e+00> : vector<8x16x8xf32>
    %99 = tpu.matmul %98, %88, %cst_32 {dimension_numbers = #tpu.dot_dimension_numbers<[2], [1], [1], [2], [0, 0, 0, 1, 1, 2], [0], [0]>} : vector<8x16x16xbf16>, vector<8x16x8xbf16>, vector<8x16x8xf32> -> vector<8x16x8xf32>
    "tpu.trace_stop"() : () -> ()
    %100 = vector.broadcast %97 : vector<8x16x1xf32> to vector<8x16x8xf32>
    %101 = arith.mulf %99, %100 : vector<8x16x8xf32>
    %102 = vector.broadcast %97 : vector<8x16x1xf32> to vector<8x16x16xf32>
    %103 = arith.mulf %94, %102 : vector<8x16x16xf32>
    %104 = tpu.concatenate %40, %61, %82, %103 in 2 : vector<8x16x16xf32>, vector<8x16x16xf32>, vector<8x16x16xf32>, vector<8x16x16xf32> -> vector<8x16x64xf32>
    %c0_33 = arith.constant 0 : index
    %c0_34 = arith.constant 0 : index
    %c0_35 = arith.constant 0 : index
    %105 = vector.load %arg10[%c0_33, %c0_34, %c0_35] : memref<8x16x64xf32, #tpu.memory_space<vmem>>, vector<8x16x64xf32>
    tpu.vector_store %arg10[%c0_33, %c0_34, %c0_35], %104 {strides = array<i32>} : memref<8x16x64xf32, #tpu.memory_space<vmem>>, vector<8x16x64xf32>,
    %106 = tpu.concatenate %38, %59, %80, %101 in 2 : vector<8x16x8xf32>, vector<8x16x8xf32>, vector<8x16x8xf32>, vector<8x16x8xf32> -> vector<8x16x32xf32>
    %107 = arith.truncf %106 : vector<8x16x32xf32> to vector<8x16x32xbf16>
    %108 = vector.shape_cast %107 : vector<8x16x32xbf16> to vector<128x32xbf16>
    %c0_36 = arith.constant 0 : index
    %c0_37 = arith.constant 0 : index
    %109 = vector.load %arg7[%c0_36, %c0_37] : memref<32x32xbf16, #tpu.memory_space<vmem>>, vector<32x32xbf16>
    %cst_38 = arith.constant dense<0.000000e+00> : vector<128x32xf32>
    %110 = tpu.matmul %108, %109, %cst_38 {dimension_numbers = #tpu.dot_dimension_numbers<[1], [0], [0], [1], [0, 0, 1, 1], [], []>} : vector<128x32xbf16>, vector<32x32xbf16>, vector<128x32xf32> -> vector<128x32xf32>
    %c0_39 = arith.constant 0 : index
    %c0_40 = arith.constant 0 : index
    %111 = vector.load %arg8[%c0_39, %c0_40] : memref<1x32xf32, #tpu.memory_space<vmem>>, vector<1x32xf32>
    %112 = vector.broadcast %111 : vector<1x32xf32> to vector<128x32xf32>
    %113 = arith.addf %110, %112 : vector<128x32xf32>
    %114 = vector.shape_cast %113 : vector<128x32xf32> to vector<8x16x32xf32>
    %c0_41 = arith.constant 0 : index
    %c0_42 = arith.constant 0 : index
    %c0_43 = arith.constant 0 : index
    %115 = vector.load %arg9[%c0_41, %c0_42, %c0_43] : memref<8x16x32xf32, #tpu.memory_space<vmem>>, vector<8x16x32xf32>
    tpu.vector_store %arg9[%c0_41, %c0_42, %c0_43], %114 {strides = array<i32>} : memref<8x16x32xf32, #tpu.memory_space<vmem>>, vector<8x16x32xf32>,
    return
  }
  func.func @transform_0(%arg0: i32) -> (i32, i32, i32) {
    %c0_i32 = arith.constant 0 : i32
    %c0_i32_0 = arith.constant 0 : i32
    %c0_i32_1 = arith.constant 0 : i32
    return %arg0, %c0_i32, %c0_i32_0 : i32, i32, i32
  }
  func.func @transform_1(%arg0: i32) -> (i32, i32, i32) {
    %c0_i32 = arith.constant 0 : i32
    %c0_i32_0 = arith.constant 0 : i32
    %c0_i32_1 = arith.constant 0 : i32
    return %arg0, %c0_i32, %c0_i32_0 : i32, i32, i32
  }
  func.func @transform_2(%arg0: i32) -> (i32, i32, i32) {
    %c0_i32 = arith.constant 0 : i32
    %c0_i32_0 = arith.constant 0 : i32
    %c0_i32_1 = arith.constant 0 : i32
    return %arg0, %c0_i32, %c0_i32_0 : i32, i32, i32
  }
  func.func @transform_3(%arg0: i32) -> (i32, i32) {
    %c0_i32 = arith.constant 0 : i32
    %c0_i32_0 = arith.constant 0 : i32
    %c0_i32_1 = arith.constant 0 : i32
    return %c0_i32, %c0_i32_0 : i32, i32
  }
  func.func @transform_4(%arg0: i32) -> (i32, i32) {
    %c0_i32 = arith.constant 0 : i32
    %c0_i32_0 = arith.constant 0 : i32
    %c0_i32_1 = arith.constant 0 : i32
    return %c0_i32, %c0_i32_0 : i32, i32
  }
  func.func @transform_5(%arg0: i32) -> (i32, i32) {
    %c0_i32 = arith.constant 0 : i32
    %c0_i32_0 = arith.constant 0 : i32
    %c0_i32_1 = arith.constant 0 : i32
    return %c0_i32, %c0_i32_0 : i32, i32
  }
  func.func @transform_6(%arg0: i32) -> (i32, i32) {
    %c0_i32 = arith.constant 0 : i32
    %c0_i32_0 = arith.constant 0 : i32
    %c0_i32_1 = arith.constant 0 : i32
    return %c0_i32, %c0_i32_0 : i32, i32
  }
  func.func @transform_7(%arg0: i32) -> (i32, i32) {
    %c0_i32 = arith.constant 0 : i32
    %c0_i32_0 = arith.constant 0 : i32
    %c0_i32_1 = arith.constant 0 : i32
    return %c0_i32, %c0_i32_0 : i32, i32
  }
  func.func @transform_8(%arg0: i32) -> (i32, i32, i32) {
    %c0_i32 = arith.constant 0 : i32
    %c0_i32_0 = arith.constant 0 : i32
    %c0_i32_1 = arith.constant 0 : i32
    return %arg0, %c0_i32, %c0_i32_0 : i32, i32, i32
  }
  func.func @transform_9(%arg0: i32) -> (i32, i32, i32) {
    %c0_i32 = arith.constant 0 : i32
    %c0_i32_0 = arith.constant 0 : i32
    %c0_i32_1 = arith.constant 0 : i32
    return %arg0, %c0_i32, %c0_i32_0 : i32, i32, i32
  }
}

</mosaic_0001>

<bundles_post_ra>
// kernel: tpu_custom_call.1
= control target key start
LH: loop header
LB: loop body
LE: loop exit
PB: predicated region body
PF: predicated region fallthrough
CT: control target
= control target key end

     0   :  { %15 = vsyncpa [#allocation3], 0  ;;  %s6822_s0 = inlined_call_operand.hbm [shape: f32[8,16,32], index: 0, kind: input, shape index: {}]   ;;  %s6823_s1 = inlined_call_operand.hbm [shape: f32[8,16,32], index: 1, kind: input, shape index: {}]   ;;  %s6824_s2 = inlined_call_operand.hbm [shape: f32[8,16,32], index: 2, kind: input, shape index: {}]   ;;  %s6825_s3 = inlined_call_operand.hbm [shape: bf16[32,32], index: 3, kind: input, shape index: {}]   ;;  %s6826_s4 = inlined_call_operand.hbm [shape: bf16[32,32], index: 4, kind: input, shape index: {}]   ;;  %s6827_s5 = inlined_call_operand.hbm [shape: bf16[32,32], index: 5, kind: input, shape index: {}]   ;;  %s6828_s6 = inlined_call_operand.hbm [shape: bf16[32,32], index: 6, kind: input, shape index: {}]   ;;  %s6829_s7 = inlined_call_operand.vmem [shape: f32[1,32], index: 7, kind: input, shape index: {}]   ;;  %s6830_s8 = inlined_call_operand.hbm [shape: f32[8,16,32], index: 8, kind: output, shape index: {0}]   ;;  %s6831_s9 = inlined_call_operand.hbm [shape: f32[8,16,64], index: 9, kind: output, shape index: {1}]  }
   0x1   :  { %16 = vsyncpa [#allocation6], 0 }
   0x2   :  { %17 = vsyncpa [#allocation9], 0 }
   0x3   :  { %18 = vsyncpa [#allocation12], 0 }
   0x4   :  { %19 = vsyncpa [#allocation4], 0 }
   0x5   :  { %20 = vsyncpa [#allocation16], 0  ;;  %s38_s11 = sshll.u32 %s6823_s1, 4  ;;  %s4636_s12 = smov [#allocation5]   ;;  %s39_s11 = int_to_ptr.hbm [resolvable:$true] %s38_s11 }
   0x6   :  { %s40_s13 = sshll.u32 %s4636_s12, 4  ;;  %s64_s16 = sshll.u32 %s6825_s3, 4  ;;  %s41_s13 = int_to_ptr.vmem [resolvable:$true] %s40_s13  ;;  %s65_s16 = int_to_ptr.hbm [resolvable:$true] %s64_s16 }
   0x7   :  { %s4637_s17 = smov 128   ;;  %s4638_s18 = smov 8  }
   0x8   :  { %46 = dma.hbm_to_vmem [thread:$0]  %s39_s11, 2048, %s41_s13, [#allocation6], %s4637_s17, %s4637_s17, %s4638_s18  }
   0x9   :  { %s4639_s19 = smov [#allocation8]   ;;  %s4640_s21 = smov 64  }
   0xa   :  { %s66_s20 = sshll.u32 %s4639_s19, 4  ;;  %s4641_s1 = smov 4   ;;  %s67_s20 = int_to_ptr.vmem [resolvable:$true] %s66_s20 }
   0xb   :  { %72 = dma.hbm_to_vmem [thread:$0]  %s65_s16, 256, %s67_s20, [#allocation9], %s4640_s21, %s4640_s21, %s4641_s1  }
   0xc   :  { %s90_s3 = sshll.u32 %s6827_s5, 4  ;;  %s4642_s24 = smov [#allocation11]   ;;  %s91_s3 = int_to_ptr.hbm [resolvable:$true] %s90_s3 }
   0xd   :  { %s92_s25 = sshll.u32 %s4642_s24, 4  ;;  %s25_s28 = sshll.u32 %s6822_s0, 4  ;;  %s93_s25 = int_to_ptr.vmem [resolvable:$true] %s92_s25  ;;  %s26_s28 = int_to_ptr.hbm [resolvable:$true] %s25_s28 }
   0xe   :  { %98 = dma.hbm_to_vmem [thread:$0]  %s91_s3, 256, %s93_s25, [#allocation12], %s4640_s21, %s4640_s21, %s4641_s1  }
   0xf   :  { %s4643_s29 = smov [#allocation2]   ;;  %s51_s12 = sshll.u32 %s6824_s2, 4  ;;  %s52_s12 = int_to_ptr.hbm [resolvable:$true] %s51_s12 }
  0x10   :  { %s27_s30 = sshll.u32 %s4643_s29, 4  ;;  %s77_s0 = sshll.u32 %s6826_s4, 4  ;;  %s28_s30 = int_to_ptr.vmem [resolvable:$true] %s27_s30  ;;  %s78_s0 = int_to_ptr.hbm [resolvable:$true] %s77_s0 }
  0x11   :  { %33 = dma.hbm_to_vmem [thread:$0]  %s26_s28, 2048, %s28_s30, [#allocation3], %s4637_s17, %s4637_s17, %s4638_s18  }
  0x12   :  { %s4644_s14 = smov [#allocation7]   ;;  %s4645_s16 = smov [#allocation10]  }
  0x13   :  { %s53_s15 = sshll.u32 %s4644_s14, 4  ;;  %s79_s2 = sshll.u32 %s4645_s16, 4  ;;  %s54_s15 = int_to_ptr.vmem [resolvable:$true] %s53_s15  ;;  %s80_s2 = int_to_ptr.vmem [resolvable:$true] %s79_s2 }
  0x14   :  { %59 = dma.hbm_to_vmem [thread:$0]  %s52_s12, 2048, %s54_s15, [#allocation6], %s4637_s17, %s4637_s17, %s4638_s18  }
  0x15   :  { %s103_s22 = sshll.u32 %s6828_s6, 4  ;;  %s4646_s4 = smov [#allocation13]   ;;  %s104_s22 = int_to_ptr.hbm [resolvable:$true] %s103_s22 }
  0x16   :  { %85 = dma.hbm_to_vmem [thread:$0]  %s78_s0, 256, %s80_s2, [#allocation9], %s4640_s21, %s4640_s21, %s4641_s1  }
  0x17   :  { %s105_s23 = sshll.u32 %s4646_s4, 4  ;;  %s106_s23 = int_to_ptr.vmem [resolvable:$true] %s105_s23 }
  0x18   :  { %111 = dma.hbm_to_vmem [thread:$0]  %s104_s22, 256, %s106_s23, [#allocation12], %s4640_s21, %s4640_s21, %s4641_s1  }
  0x19   :  { %4624 = dma.done.wait [#allocation3], 2048  }
  0x1a   :  { %4625 = vsyncadd [#allocation3], 4294965248 }
  0x1b   :  { %4626 = dma.done.wait [#allocation6], 4096  }
  0x1c   :  { %4627 = vsyncadd [#allocation6], 4294963200 }
  0x1d   :  { %4628 = dma.done.wait [#allocation9], 512  }
  0x1e   :  { %4629 = vsyncadd [#allocation9], 4294966784 }
  0x1f   :  { %4630 = dma.done.wait [#allocation12], 512  }
  0x20   :  { %4631 = vsyncadd [#allocation12], 4294966784  ;;  %v3998_v0 = vld [vmem:[#allocation8 + $0x8] sm:$0xff]  ;;  %v147_v1 = vld [vmem:[#allocation2 + $0x20] sm:$0xff]  ;;  %vm231_vm0 = vcmask 261120   ;;  %s4647_s6 = smov 120  }
  0x21   :  { %v148_v2 = vld [vmem:[#allocation2 + $0x28] sm:$0xff]  ;;  %v163_v3 = vpack.c.bf16 %v147_v1, %v147_v1  ;;  %4005 = vmatpush.bf16.msra.mxu1 %v3998_v0  ;;  %v3997_v4 = vld [vmem:[#allocation8] sm:$0xff]  ;;  %262 = vmatpush.bf16.msra.mxu0 %v3998_v0  ;;  %v4000_v8 = vld [vmem:[#allocation10 + $0x8] sm:$0xff]  ;;  %vm701_vm1 = vcmask 64512   ;;  %vm932_vm2 = vcmask 130048   ;;  %s4648_s21 = smov 112  }
  0x22   :  { %v164_v5 = vpack.c.bf16 %v148_v2, %v148_v2  ;;  %v143_v6 = vld [vmem:[#allocation2] sm:$0xff]  ;;  %v144_v9 = vld [vmem:[#allocation2 + $0x8] sm:$0xff]  ;;  %4006 = vmatpush.bf16.msra.mxu2 %v3998_v0  ;;  %4007 = vmatpush.bf16.msra.mxu3 %v3998_v0  ;;  %v3999_v16 = vld [vmem:[#allocation10] sm:$0xff]  ;;  %s4649_s1 = smov 104   ;;  %s4650_s3 = smov 16   ;;  %vm3647_vm3 = vcmask 195584  }
  0x23   :  { %v199_v7 = vunpack.c.l.b16 %v163_v3  ;;  %v159_v10 = vpack.c.bf16 %v143_v6, %v143_v6  ;;  %v160_v12 = vpack.c.bf16 %v144_v9, %v144_v9  ;;  %v149_v18 = vld [vmem:[#allocation2 + $0x30] sm:$0xff]  ;;  %v150_v19 = vld [vmem:[#allocation2 + $0x38] sm:$0xff]  ;;  %v321_v32 = vld [vmem:[#allocation5] sm:$0xff]  ;;  %s4651_s24 = smov 24   ;;  %s4652_s25 = smov 32   ;;  %vm3389_vm4 = vcmask 392192  }
  0x24   :  { %v200_v11 = vunpack.c.l.b16 %v164_v5  ;;  %v145_v20 = vld [vmem:[#allocation2 + $0x10] sm:$0xff]  ;;  %v146_v21 = vld [vmem:[#allocation2 + $0x18] sm:$0xff]  ;;  %v165_v22 = vpack.c.bf16 %v149_v18, %v149_v18  ;;  %v166_v23 = vpack.c.bf16 %v150_v19, %v150_v19  ;;  %v322_v33 = vld [vmem:[#allocation5 + $0x8] sm:$0xff]  ;;  %v337_v34 = vpack.c.bf16 %v321_v32, %v321_v32  ;;  %s4654_s28 = smov [#allocation15]   ;;  %s3848_s11 = sshll.u32 %s6831_s9, 4  ;;  %s3849_s11 = int_to_ptr.hbm [resolvable:$true] %s3848_s11 }
  0x25   :  { %v195_v13 = vunpack.c.l.b16 %v159_v10  ;;  %4008 = vmatpush.bf16.msra.mxu1 %v3997_v4  ;;  %263 = vmatpush.bf16.msra.mxu0 %v3997_v4  ;;  %v196_v15 = vunpack.c.l.b16 %v160_v12  ;;  %v161_v24 = vpack.c.bf16 %v145_v20, %v145_v20  ;;  %v162_v25 = vpack.c.bf16 %v146_v21, %v146_v21  ;;  %v323_v39 = vld [vmem:[#allocation5 + $0x10] sm:$0xff]  ;;  %v324_v40 = vld [vmem:[#allocation5 + $0x18] sm:$0xff]  ;;  %v151_v46 = vld [vmem:[#allocation2 + $0x40] sm:$0xff]  ;;  %s3846_s29 = sshll.u32 %s4654_s28, 4  ;;  %s4655_s9 = smov [#allocation14]   ;;  %s3847_s29 = int_to_ptr.vmem [resolvable:$true] %s3846_s29 }
  0x26   :  { %v213_v14 = vpack.c.b16 %v200_v11, %v199_v7  ;;  %4009 = vmatpush.bf16.msra.mxu2 %v3997_v4  ;;  %4010 = vmatpush.bf16.msra.mxu3 %v3997_v4  ;;  %v201_v26 = vunpack.c.l.b16 %v165_v22  ;;  %v202_v27 = vunpack.c.l.b16 %v166_v23  ;;  %v338_v35 = vpack.c.bf16 %v322_v33, %v322_v33  ;;  %v152_v47 = vld [vmem:[#allocation2 + $0x48] sm:$0xff]  ;;  %v325_v48 = vld [vmem:[#allocation5 + $0x20] sm:$0xff]  ;;  %v153_v60 = vld [vmem:[#allocation2 + $0x50] sm:$0xff]  ;;  %s3833_s12 = sshll.u32 %s4655_s9, 4  ;;  %s3835_s0 = sshll.u32 %s6830_s8, 4  ;;  %s3834_s12 = int_to_ptr.vmem [resolvable:$true] %s3833_s12  ;;  %s3836_s0 = int_to_ptr.hbm [resolvable:$true] %s3835_s0 }
  0x27   :  { %v211_v17 = vpack.c.b16 %v196_v15, %v195_v13  ;;  %v197_v28 = vunpack.c.l.b16 %v161_v24  ;;  %v198_v29 = vunpack.c.l.b16 %v162_v25  ;;  %v373_v36 = vunpack.c.l.b16 %v337_v34  ;;  %v326_v49 = vld [vmem:[#allocation5 + $0x28] sm:$0xff]  ;;  %v154_v61 = vld [vmem:[#allocation2 + $0x58] sm:$0xff]  ;;  %v327_v62 = vld [vmem:[#allocation5 + $0x30] sm:$0xff] }
  0x28   :  { %3879 = vmatmul.msk.bf16.vlgmr.msra.gmra.mxu1 %vm231_vm0, %v213_v14  ;;  %v214_v30 = vpack.c.b16 %v202_v27, %v201_v26  ;;  %v374_v37 = vunpack.c.l.b16 %v338_v35  ;;  %v339_v41 = vpack.c.bf16 %v323_v39, %v323_v39  ;;  %v340_v42 = vpack.c.bf16 %v324_v40, %v324_v40  ;;  %v328_v63 = vld [vmem:[#allocation5 + $0x38] sm:$0xff]  ;;  %v329_v10 = vld [vmem:[#allocation5 + $0x40] sm:$0xff]  ;;  %v330_v11 = vld [vmem:[#allocation5 + $0x48] sm:$0xff] }
  0x29   :  { %439 = vmatpush.bf16.msrb.mxu1 %v4000_v8  ;;  %3877 = vmatmul.msk.bf16.vlgmr.msra.gmra.mxu0 %vm231_vm0, %v211_v17  ;;  %v212_v31 = vpack.c.b16 %v198_v29, %v197_v28  ;;  %v167_v50 = vpack.c.bf16 %v151_v46, %v151_v46  ;;  %v168_v51 = vpack.c.bf16 %v152_v47, %v152_v47  ;;  %v155_v12 = vld [vmem:[#allocation2 + $0x60] sm:$0xff]  ;;  %v156_v13 = vld [vmem:[#allocation2 + $0x68] sm:$0xff]  ;;  %v331_v24 = vld [vmem:[#allocation5 + $0x50] sm:$0xff]  ;;  %vm3406_vm5 = vcmask 523264  }
  0x2a   :  { %v389_v38 = vpack.c.b16 %v374_v37, %v373_v36  ;;  %v375_v43 = vunpack.c.l.b16 %v339_v41  ;;  %v376_v44 = vunpack.c.l.b16 %v340_v42  ;;  %v341_v54 = vpack.c.bf16 %v325_v48, %v325_v48  ;;  %v332_v25 = vld [vmem:[#allocation5 + $0x58] sm:$0xff]  ;;  %v333_v37 = vld [vmem:[#allocation5 + $0x60] sm:$0xff]  ;;  %v335_v48 = vld [vmem:[#allocation5 + $0x70] sm:$0xff] }
  0x2b   :  { %v203_v52 = vunpack.c.l.b16 %v167_v50  ;;  %v204_v53 = vunpack.c.l.b16 %v168_v51  ;;  %v342_v55 = vpack.c.bf16 %v326_v49, %v326_v49  ;;  %v169_v0 = vpack.c.bf16 %v153_v60, %v153_v60  ;;  %v158_v32 = vld [vmem:[#allocation2 + $0x78] sm:$0xff] }
  0x2c   :  { %v390_v45 = vpack.c.b16 %v376_v44, %v375_v43  ;;  %v377_v57 = vunpack.c.l.b16 %v341_v54  ;;  %v170_v1 = vpack.c.bf16 %v154_v61, %v154_v61  ;;  %v343_v4 = vpack.c.bf16 %v327_v62, %v327_v62  ;;  %v336_v49 = vld [vmem:[#allocation5 + $0x78] sm:$0xff] }
  0x2d   :  { %440 = vmatpush.bf16.msrb.mxu1 %v3999_v16  ;;  %v215_v56 = vpack.c.b16 %v204_v53, %v203_v52  ;;  %v378_v58 = vunpack.c.l.b16 %v342_v55  ;;  %v205_v2 = vunpack.c.l.b16 %v169_v0  ;;  %v344_v5 = vpack.c.bf16 %v328_v63, %v328_v63 }
  0x2e   :  { %v206_v3 = vunpack.c.l.b16 %v170_v1  ;;  %v379_v7 = vunpack.c.l.b16 %v343_v4  ;;  %v171_v14 = vpack.c.bf16 %v155_v12, %v155_v12  ;;  %v172_v15 = vpack.c.bf16 %v156_v13, %v156_v13 }
  0x2f   :  { %3881 = vmatmul.msk.bf16.vlgmr.msra.gmra.mxu2 %vm231_vm0, %v215_v56  ;;  %v391_v59 = vpack.c.b16 %v378_v58, %v377_v57  ;;  %v380_v8 = vunpack.c.l.b16 %v344_v5  ;;  %v345_v16 = vpack.c.bf16 %v329_v10, %v329_v10  ;;  %v346_v17 = vpack.c.bf16 %v330_v11, %v330_v11 }
  0x30   :  { %v216_v6 = vpack.c.b16 %v206_v3, %v205_v2  ;;  %v207_v18 = vunpack.c.l.b16 %v171_v14  ;;  %v208_v19 = vunpack.c.l.b16 %v172_v15  ;;  %v347_v26 = vpack.c.bf16 %v331_v24, %v331_v24 }
  0x31   :  { %v392_v9 = vpack.c.b16 %v380_v8, %v379_v7  ;;  %v381_v21 = vunpack.c.l.b16 %v345_v16  ;;  %v382_v22 = vunpack.c.l.b16 %v346_v17  ;;  %v348_v27 = vpack.c.bf16 %v332_v25, %v332_v25 }
  0x32   :  { %v217_v20 = vpack.c.b16 %v208_v19, %v207_v18  ;;  %v383_v28 = vunpack.c.l.b16 %v347_v26  ;;  %v174_v34 = vpack.c.bf16 %v158_v32, %v158_v32  ;;  %v349_v40 = vpack.c.bf16 %v333_v37, %v333_v37 }
  0x33   :  { %v393_v23 = vpack.c.b16 %v382_v22, %v381_v21  ;;  %v384_v29 = vunpack.c.l.b16 %v348_v27  ;;  %v351_v51 = vpack.c.bf16 %v335_v48, %v335_v48  ;;  %v352_v52 = vpack.c.bf16 %v336_v49, %v336_v49 }
  0x34   :  { %3883 = vmatmul.msk.bf16.vlgmr.msra.gmra.mxu3 %vm231_vm0, %v217_v20  ;;  %v210_v36 = vunpack.c.l.b16 %v174_v34  ;;  %v385_v42 = vunpack.c.l.b16 %v349_v40  ;;  %v4002_v34 = vld [vmem:[#allocation11 + $0x8] sm:$0xff] }
  0x35   :  { %v387_v60 = vunpack.c.l.b16 %v351_v51  ;;  %v388_v61 = vunpack.c.l.b16 %v352_v52  ;;  %600 = vmatpush.bf16.msrb.mxu2 %v4002_v34  ;;  %v484_v51 = vld [vmem:[#allocation7 + $0x10] sm:$0xff]  ;;  %v485_v52 = vld [vmem:[#allocation7 + $0x18] sm:$0xff] }
  0x37   :  { %v396_v4 = vpack.c.b16 %v388_v61, %v387_v60 }
  0x38   :  { %3880 = vmatmul.msk.bf16.gmra.mxu1 %vm231_vm0, %v214_v30  ;;  %v394_v30 = vpack.c.b16 %v384_v29, %v383_v28 }
  0x39   :  { %3878 = vmatmul.msk.bf16.gmra.mxu0 %vm231_vm0, %v212_v31  ;;  %v157_v31 = vld [vmem:[#allocation2 + $0x70] sm:$0xff] }
  0x3a   :  { %v173_v33 = vpack.c.bf16 %v157_v31, %v157_v31 }
  0x3c   :  { %v209_v35 = vunpack.c.l.b16 %v173_v33 }
  0x3e   :  { %v218_v39 = vpack.c.b16 %v210_v36, %v209_v35  ;;  %v482_v35 = vld [vmem:[#allocation7] sm:$0xff]  ;;  %v483_v36 = vld [vmem:[#allocation7 + $0x8] sm:$0xff] }
  0x3f   :  { %3882 = vmatmul.msk.bf16.gmra.mxu2 %vm231_vm0, %v216_v6  ;;  %v498_v37 = vpack.c.bf16 %v482_v35, %v482_v35 }
  0x44   :  { %3884 = vmatmul.msk.bf16.gmra.mxu3 %vm231_vm0, %v218_v39  ;;  %v4001_v39 = vld [vmem:[#allocation11] sm:$0xff] }
  0x45   :  { %601 = vmatpush.bf16.msrb.mxu2 %v4001_v39  ;;  %v489_v39 = vld [vmem:[#allocation7 + $0x38] sm:$0xff] }
  0x48   :  { %3893 = vmatmul.msk.bf16.vlgmr.msrb.gmra.mxu1 %vm231_vm0, %v389_v38  ;;  %v334_v38 = vld [vmem:[#allocation5 + $0x68] sm:$0xff] }
  0x49   :  { %v350_v41 = vpack.c.bf16 %v334_v38, %v334_v38  ;;  %v499_v38 = vpack.c.bf16 %v483_v36, %v483_v36 }
  0x4b   :  { %v386_v43 = vunpack.c.l.b16 %v350_v41  ;;  %v534_v41 = vunpack.c.l.b16 %v498_v37 }
  0x4d   :  { %v395_v44 = vpack.c.b16 %v386_v43, %v385_v42  ;;  %v535_v42 = vunpack.c.l.b16 %v499_v38  ;;  %v488_v38 = vld [vmem:[#allocation7 + $0x30] sm:$0xff] }
  0x58   :  { %3894 = vmatmul.msk.bf16.gmra.mxu1 %vm231_vm0, %v390_v45 }
  0x68   :  { %3895 = vmatmul.msk.bf16.gmra.mxu1 %vm231_vm0, %v391_v59 }
  0x78   :  { %3896 = vmatmul.msk.bf16.gmra.mxu1 %vm231_vm0, %v392_v9 }
  0x88   :  { %3897 = vmatmul.msk.bf16.gmra.mxu1 %vm231_vm0, %v393_v23 }
  0x98   :  { %3898 = vmatmul.msk.bf16.gmra.mxu1 %vm231_vm0, %v394_v30 }
  0xa5   :  { %v275_v45 = vpop.f32.mrf.mxu1 }
  0xa6   :  { %v265_v46 = vpop.f32.mrf.mxu0  ;;  %v309_v50 = vmul.f32 0.35355338, %v275_v45  ;;  %v550_v45 = vpack.c.b16 %v535_v42, %v534_v41  ;;  %v504_v41 = vpack.c.bf16 %v488_v38, %v488_v38  ;;  %v505_v42 = vpack.c.bf16 %v489_v39, %v489_v39 }
  0xa7   :  { %v305_v47 = vmul.f32 0.35355338, %v265_v46 }
  0xa8   :  { %3899 = vmatmul.msk.bf16.gmra.mxu1 %vm231_vm0, %v395_v44  ;;  %v647_v55 = vpack.c.bf16 %v309_v50, %v309_v50  ;;  %3909 = vmatmul.msk.bf16.vlgmr.msrb.gmra.mxu2 %vm231_vm0, %v550_v45  ;;  %v540_v45 = vunpack.c.l.b16 %v504_v41 }
  0xa9   :  { %v643_v54 = vpack.c.bf16 %v305_v47, %v305_v47 }
  0xaa   :  { %v754_v0 = vunpack.c.l.b16 %v647_v55 }
  0xab   :  { %v693_v62 = vunpack.c.l.b16 %v643_v54  ;;  %v501_v54 = vpack.c.bf16 %v485_v52, %v485_v52 }
  0xad   :  { %v277_v53 = vpop.f32.mrf.mxu1 }
  0xae   :  { %v310_v56 = vmul.f32 0.35355338, %v277_v53  ;;  %v267_v57 = vpop.f32.mrf.mxu0  ;;  %v500_v53 = vpack.c.bf16 %v484_v51, %v484_v51 }
  0xaf   :  { %v306_v58 = vmul.f32 0.35355338, %v267_v57  ;;  %v537_v57 = vunpack.c.l.b16 %v501_v54 }
  0xb0   :  { %v648_v59 = vpack.c.bf16 %v310_v56, %v310_v56  ;;  %v536_v56 = vunpack.c.l.b16 %v500_v53 }
  0xb1   :  { %v644_v63 = vpack.c.bf16 %v306_v58, %v306_v58 }
  0xb2   :  { %v755_v1 = vunpack.c.l.b16 %v648_v59  ;;  %v285_v59 = vpop.f32.mrf.mxu2 }
  0xb3   :  { %v694_v2 = vunpack.c.l.b16 %v644_v63 }
  0xb4   :  { %v4763_v3 = vpack.c.b16 %v755_v1, %v754_v0 }
  0xb5   :  { %v4765_v5 = vpop.f32.mrf.mxu1  ;;  %v4767_v6 = vpack.c.b16 %v694_v2, %v693_v62  ;;  %v551_v62 = vpack.c.b16 %v537_v57, %v536_v56 }
  0xb6   :  { %1413 = vrot.lane.b32.xlu1 %v4763_v3, %s4647_s6  ;;  %v270_v7 = vpop.f32.mrf.mxu0  ;;  %v311_v63 = vmul.f32 0.35355338, %v4765_v5 }
  0xb7   :  { %1365 = vrot.lane.b32.xlu2 %v4767_v6, %s4647_s6  ;;  %v307_v8 = vmul.f32 0.35355338, %v270_v7 }
  0xb8   :  { %3900 = vmatmul.msk.bf16.gmra.mxu1 %vm231_vm0, %v396_v4  ;;  %3910 = vmatmul.msk.bf16.gmra.mxu2 %vm231_vm0, %v551_v62  ;;  %v649_v7 = vpack.c.bf16 %v311_v63, %v311_v63 }
  0xb9   :  { %v645_v10 = vpack.c.bf16 %v307_v8, %v307_v8 }
  0xbb   :  { %v724_v13 = vunpack.c.l.b16 %v645_v10 }
  0xbd   :  { %v4774_v9 = vpop.f32.mrf.mxu1 }
  0xbe   :  { %v272_v11 = vpop.f32.mrf.mxu0  ;;  %v312_v60 = vmul.f32 0.35355338, %v4774_v9  ;;  %v784_v9 = vunpack.c.l.b16 %v649_v7 }
  0xbf   :  { %v308_v12 = vmul.f32 0.35355338, %v272_v11 }
  0xc0   :  { %v650_v2 = vpack.c.bf16 %v312_v60, %v312_v60 }
  0xc1   :  { %v646_v14 = vpack.c.bf16 %v308_v12, %v308_v12  ;;  %v287_v12 = vpop.f32.mrf.mxu2 }
  0xc2   :  { %v785_v11 = vunpack.c.l.b16 %v650_v2 }
  0xc3   :  { %v725_v15 = vunpack.c.l.b16 %v646_v14  ;;  %v487_v14 = vld [vmem:[#allocation7 + $0x28] sm:$0xff] }
  0xc5   :  { %v442_v16 = vpop.f32.mrf.mxu1  ;;  %v4776_v17 = vpack.c.b16 %v725_v15, %v724_v13  ;;  %v486_v13 = vld [vmem:[#allocation7 + $0x20] sm:$0xff]  ;;  %v4812_v15 = vpack.c.b16 %v785_v11, %v784_v9 }
  0xc6   :  { %v659_v18 = vpack.c.bf16 %v442_v16, %v442_v16  ;;  %v502_v5 = vpack.c.bf16 %v486_v13, %v486_v13  ;;  %v503_v16 = vpack.c.bf16 %v487_v14, %v487_v14 }
  0xc7   :  { %1389 = vrot.lane.b32.xlu2 %v4776_v17, %s4647_s6 }
  0xc8   :  { %v698_v21 = vunpack.c.l.b16 %v659_v18 }
  0xcd   :  { %v444_v19 = vpop.f32.mrf.mxu1 }
  0xce   :  { %v660_v20 = vpack.c.bf16 %v444_v19, %v444_v19  ;;  %v538_v19 = vunpack.c.l.b16 %v502_v5 }
  0xd0   :  { %v699_v22 = vunpack.c.l.b16 %v660_v20  ;;  %v539_v20 = vunpack.c.l.b16 %v503_v16 }
  0xd2   :  { %v4780_v23 = vpack.c.b16 %v699_v22, %v698_v21  ;;  %v313_v22 = vmul.f32 0.35355338, %v285_v59 }
  0xd4   :  { %1367 = vrot.lane.b32.xlu1 %v4780_v23, %s4647_s6  ;;  %v706_v24 = vsel %vm701_vm1, %v4780_v23, 0 }
  0xd5   :  { %v447_v25 = vpop.f32.mrf.mxu1  ;;  %715 = vmatpush.bf16.xpose.msrb.mxu3 %v706_v24 }
  0xd6   :  { %v661_v26 = vpack.c.bf16 %v447_v25, %v447_v25  ;;  %v314_v25 = vmul.f32 0.35355338, %v287_v12 }
  0xd8   :  { %v729_v29 = vunpack.c.l.b16 %v661_v26  ;;  %v552_v26 = vpack.c.b16 %v539_v20, %v538_v19 }
  0xda   :  { %3911 = vmatmul.msk.bf16.gmra.mxu2 %vm231_vm0, %v552_v26 }
  0xdc   :  { %3917 = vmatmul.msk.bf16.vlgmr.msrb.gmra.mxu3 %vm701_vm1, %v4767_v6 }
  0xdd   :  { %v449_v27 = vpop.f32.mrf.mxu1 }
  0xde   :  { %v662_v28 = vpack.c.bf16 %v449_v27, %v449_v27 }
  0xe0   :  { %v730_v30 = vunpack.c.l.b16 %v662_v28 }
  0xe2   :  { %v4788_v31 = vpack.c.b16 %v730_v30, %v729_v29  ;;  %v290_v29 = vpop.f32.mrf.mxu2  ;;  %v651_v30 = vpack.c.bf16 %v313_v22, %v313_v22 }
  0xe4   :  { %v736_v32 = vsel %vm701_vm1, %v4788_v31, 0  ;;  %1391 = vrot.lane.b32.xlu2 %v4788_v31, %s4647_s6  ;;  %v814_v36 = vunpack.c.l.b16 %v651_v30  ;;  %v492_v30 = vld [vmem:[#allocation7 + $0x50] sm:$0xff] }
  0xe5   :  { %v452_v33 = vpop.f32.mrf.mxu1  ;;  %745 = vmatpush.bf16.xpose.msra.mxu3 %v736_v32 }
  0xe6   :  { %v663_v40 = vpack.c.bf16 %v452_v33, %v452_v33  ;;  %v652_v33 = vpack.c.bf16 %v314_v25, %v314_v25 }
  0xe8   :  { %v759_v46 = vunpack.c.l.b16 %v663_v40  ;;  %v815_v37 = vunpack.c.l.b16 %v652_v33  ;;  %v493_v33 = vld [vmem:[#allocation7 + $0x58] sm:$0xff] }
  0xea   :  { %v4823_v40 = vpack.c.b16 %v815_v37, %v814_v36  ;;  %v508_v36 = vpack.c.bf16 %v492_v30, %v492_v30  ;;  %v509_v37 = vpack.c.bf16 %v493_v33, %v493_v33 }
  0xec   :  { %3918 = vmatmul.msk.bf16.vlgmr.msra.gmra.mxu3 %vm701_vm1, %v4776_v17  ;;  %v544_v41 = vunpack.c.l.b16 %v508_v36 }
  0xed   :  { %v454_v43 = vpop.f32.mrf.mxu1 }
  0xee   :  { %v664_v44 = vpack.c.bf16 %v454_v43, %v454_v43  ;;  %v292_v43 = vpop.f32.mrf.mxu2 }
  0xef   :  { %v316_v52 = vmul.f32 0.35355338, %v292_v43 }
  0xf0   :  { %v760_v47 = vunpack.c.l.b16 %v664_v44 }
  0xf2   :  { %v4797_v48 = vpack.c.b16 %v760_v47, %v759_v46  ;;  %v541_v46 = vunpack.c.l.b16 %v505_v42  ;;  %v545_v42 = vunpack.c.l.b16 %v509_v37 }
  0xf4   :  { %v766_v49 = vsel %vm701_vm1, %v4797_v48, 0  ;;  %1415 = vrot.lane.b32.xlu0 %v4797_v48, %s4647_s6  ;;  %v553_v53 = vpack.c.b16 %v541_v46, %v540_v45  ;;  %v555_v46 = vpack.c.b16 %v545_v42, %v544_v41  ;;  %v496_v41 = vld [vmem:[#allocation7 + $0x70] sm:$0xff]  ;;  %v497_v42 = vld [vmem:[#allocation7 + $0x78] sm:$0xff] }
  0xf5   :  { %v457_v50 = vpop.f32.mrf.mxu1  ;;  %775 = vmatpush.bf16.xpose.msrb.mxu3 %v766_v49  ;;  %v295_v49 = vpop.f32.mrf.mxu3 }
  0xf6   :  { %v665_v55 = vpack.c.bf16 %v457_v50, %v457_v50  ;;  %v315_v50 = vmul.f32 0.35355338, %v290_v29  ;;  %3912 = vmatmul.msk.bf16.gmra.mxu2 %vm231_vm0, %v553_v53  ;;  %v317_v14 = vmul.f32 0.35355338, %v295_v49 }
  0xf8   :  { %v789_v0 = vunpack.c.l.b16 %v665_v55  ;;  %v653_v56 = vpack.c.bf16 %v315_v50, %v315_v50 }
  0xfc   :  { %3919 = vmatmul.msk.bf16.vlgmr.msrb.gmra.mxu3 %vm701_vm1, %v4763_v3 }
  0xfd   :  { %v459_v58 = vpop.f32.mrf.mxu1  ;;  %v297_v63 = vpop.f32.mrf.mxu3 }
  0xfe   :  { %v666_v61 = vpack.c.bf16 %v459_v58, %v459_v58  ;;  %v654_v58 = vpack.c.bf16 %v316_v52, %v316_v52  ;;  %v318_v16 = vmul.f32 0.35355338, %v297_v63 }
 0x100   :  { %v790_v1 = vunpack.c.l.b16 %v666_v61  ;;  %v844_v61 = vunpack.c.l.b16 %v653_v56  ;;  %v845_v62 = vunpack.c.l.b16 %v654_v58  ;;  %v494_v56 = vld [vmem:[#allocation7 + $0x60] sm:$0xff]  ;;  %v495_v58 = vld [vmem:[#allocation7 + $0x68] sm:$0xff] }
 0x102   :  { %v4808_v4 = vpack.c.b16 %v790_v1, %v789_v0  ;;  %v490_v0 = vld [vmem:[#allocation7 + $0x40] sm:$0xff]  ;;  %v491_v1 = vld [vmem:[#allocation7 + $0x48] sm:$0xff] }
 0x103   :  { %v506_v2 = vpack.c.bf16 %v490_v0, %v490_v0  ;;  %v507_v7 = vpack.c.bf16 %v491_v1, %v491_v1 }
 0x104   :  { %v796_v8 = vsel %vm701_vm1, %v4808_v4, 0 }
 0x105   :  { %v462_v10 = vpop.f32.mrf.mxu1  ;;  %805 = vmatpush.bf16.xpose.msra.mxu3 %v796_v8  ;;  %v4832_v8 = vpack.c.b16 %v845_v62, %v844_v61  ;;  %v543_v11 = vunpack.c.l.b16 %v507_v7 }
 0x106   :  { %v667_v18 = vpack.c.bf16 %v462_v10, %v462_v10  ;;  %v542_v10 = vunpack.c.l.b16 %v506_v2 }
 0x108   :  { %v819_v27 = vunpack.c.l.b16 %v667_v18  ;;  %v554_v9 = vpack.c.b16 %v543_v11, %v542_v10  ;;  %v300_v18 = vpop.f32.mrf.mxu3 }
 0x109   :  { %v319_v38 = vmul.f32 0.35355338, %v300_v18 }
 0x10a   :  { %3913 = vmatmul.msk.bf16.gmra.mxu2 %vm231_vm0, %v554_v9 }
 0x10c   :  { %3920 = vmatmul.msk.bf16.vlgmr.msra.gmra.mxu3 %vm701_vm1, %v4812_v15 }
 0x10d   :  { %v464_v21 = vpop.f32.mrf.mxu1 }
 0x10e   :  { %v668_v24 = vpack.c.bf16 %v464_v21, %v464_v21  ;;  %v655_v21 = vpack.c.bf16 %v317_v14, %v317_v14 }
 0x110   :  { %v820_v28 = vunpack.c.l.b16 %v668_v24  ;;  %v656_v24 = vpack.c.bf16 %v318_v16, %v318_v16  ;;  %v302_v29 = vpop.f32.mrf.mxu3 }
 0x111   :  { %v320_v39 = vmul.f32 0.35355338, %v302_v29 }
 0x112   :  { %v4817_v32 = vpack.c.b16 %v820_v28, %v819_v27  ;;  %v874_v27 = vunpack.c.l.b16 %v655_v21  ;;  %v875_v28 = vunpack.c.l.b16 %v656_v24 }
 0x113   :  { %v658_v49 = vpack.c.bf16 %v320_v39, %v320_v39 }
 0x114   :  { %v826_v34 = vsel %vm701_vm1, %v4817_v32, 0  ;;  %1463 = vrot.lane.b32.xlu0 %v4817_v32, %s4647_s6 }
 0x115   :  { %v467_v35 = vpop.f32.mrf.mxu1  ;;  %835 = vmatpush.bf16.xpose.msrb.mxu3 %v826_v34  ;;  %v4841_v34 = vpack.c.b16 %v875_v28, %v874_v27  ;;  %v905_v53 = vunpack.c.l.b16 %v658_v49 }
 0x116   :  { %v669_v44 = vpack.c.bf16 %v467_v35, %v467_v35 }
 0x118   :  { %v849_v54 = vunpack.c.l.b16 %v669_v44 }
 0x11a   :  { %3914 = vmatmul.msk.bf16.gmra.mxu2 %vm231_vm0, %v555_v46 }
 0x11c   :  { %3921 = vmatmul.msk.bf16.vlgmr.msrb.gmra.mxu3 %vm701_vm1, %v4823_v40 }
 0x11d   :  { %v469_v47 = vpop.f32.mrf.mxu1 }
 0x11e   :  { %v670_v51 = vpack.c.bf16 %v469_v47, %v469_v47  ;;  %v657_v47 = vpack.c.bf16 %v319_v38, %v319_v38 }
 0x120   :  { %v850_v55 = vunpack.c.l.b16 %v670_v51  ;;  %v904_v52 = vunpack.c.l.b16 %v657_v47 }
 0x122   :  { %v4828_v57 = vpack.c.b16 %v850_v55, %v849_v54  ;;  %v4850_v55 = vpack.c.b16 %v905_v53, %v904_v52 }
 0x124   :  { %v856_v59 = vsel %vm701_vm1, %v4828_v57, 0 }
 0x125   :  { %v472_v60 = vpop.f32.mrf.mxu1  ;;  %865 = vmatpush.bf16.xpose.msra.mxu3 %v856_v59  ;;  %v510_v59 = vpack.c.bf16 %v494_v56, %v494_v56 }
 0x126   :  { %v671_v12 = vpack.c.bf16 %v472_v60, %v472_v60  ;;  %v511_v60 = vpack.c.bf16 %v495_v58, %v495_v58 }
 0x127   :  { %v546_v61 = vunpack.c.l.b16 %v510_v59 }
 0x128   :  { %v879_v19 = vunpack.c.l.b16 %v671_v12  ;;  %v547_v62 = vunpack.c.l.b16 %v511_v60 }
 0x12a   :  { %v556_v63 = vpack.c.b16 %v547_v62, %v546_v61 }
 0x12b   :  { %v603_v12 = vpop.f32.mrf.mxu2 }
 0x12c   :  { %3922 = vmatmul.msk.bf16.vlgmr.msra.gmra.mxu3 %vm701_vm1, %v4832_v8  ;;  %3915 = vmatmul.msk.bf16.gmra.mxu2 %vm231_vm0, %v556_v63  ;;  %v675_v14 = vpack.c.bf16 %v603_v12, %v603_v12 }
 0x12d   :  { %v474_v13 = vpop.f32.mrf.mxu1 }
 0x12e   :  { %v672_v5 = vpack.c.bf16 %v474_v13, %v474_v13  ;;  %v1116_v16 = vunpack.c.l.b16 %v675_v14 }
 0x130   :  { %v880_v20 = vunpack.c.l.b16 %v672_v5 }
 0x132   :  { %v4837_v22 = vpack.c.b16 %v880_v20, %v879_v19 }
 0x133   :  { %v605_v5 = vpop.f32.mrf.mxu2 }
 0x134   :  { %v886_v25 = vsel %vm701_vm1, %v4837_v22, 0  ;;  %v676_v18 = vpack.c.bf16 %v605_v5, %v605_v5 }
 0x135   :  { %895 = vmatpush.bf16.xpose.msrb.mxu3 %v886_v25  ;;  %v477_v26 = vpop.f32.mrf.mxu1 }
 0x136   :  { %v673_v35 = vpack.c.bf16 %v477_v26, %v477_v26  ;;  %v1117_v19 = vunpack.c.l.b16 %v676_v18 }
 0x138   :  { %v909_v44 = vunpack.c.l.b16 %v673_v35  ;;  %v4875_v24 = vpack.c.b16 %v1117_v19, %v1116_v16 }
 0x13a   :  { %1130 = vmatpush.bf16.msrb.mxu0 %v4875_v24 }
 0x13b   :  { %v608_v25 = vpop.f32.mrf.mxu2 }
 0x13c   :  { %3923 = vmatmul.msk.bf16.vlgmr.msrb.gmra.mxu3 %vm701_vm1, %v4841_v34  ;;  %v677_v28 = vpack.c.bf16 %v608_v25, %v608_v25 }
 0x13d   :  { %v479_v43 = vpop.f32.mrf.mxu1 }
 0x13e   :  { %v674_v45 = vpack.c.bf16 %v479_v43, %v479_v43  ;;  %v1144_v30 = vunpack.c.l.b16 %v677_v28  ;;  %v512_v43 = vpack.c.bf16 %v496_v41, %v496_v41 }
 0x140   :  { %v910_v50 = vunpack.c.l.b16 %v674_v45  ;;  %v548_v46 = vunpack.c.l.b16 %v512_v43 }
 0x142   :  { %v4846_v51 = vpack.c.b16 %v910_v50, %v909_v44  ;;  %v513_v44 = vpack.c.bf16 %v497_v42, %v497_v42 }
 0x143   :  { %v610_v29 = vpop.f32.mrf.mxu2 }
 0x144   :  { %v916_v54 = vsel %vm701_vm1, %v4846_v51, 0  ;;  %v678_v33 = vpack.c.bf16 %v610_v29, %v610_v29  ;;  %v549_v47 = vunpack.c.l.b16 %v513_v44  ;;  %v4929_v44 = vpop.permute.xlu2 %1365 }
 0x145   :  { %925 = vmatpush.bf16.xpose.msra.mxu3 %v916_v54 }
 0x146   :  { %v1145_v35 = vunpack.c.l.b16 %v678_v33  ;;  %v557_v52 = vpack.c.b16 %v549_v47, %v548_v46 }
 0x148   :  { %v4886_v38 = vpack.c.b16 %v1145_v35, %v1144_v30  ;;  %3916 = vmatmul.msk.bf16.gmra.mxu2 %vm231_vm0, %v557_v52 }
 0x14a   :  { %1158 = vmatpush.bf16.msra.mxu1 %v4886_v38 }
 0x14c   :  { %3924 = vmatmul.msk.bf16.vlgmr.msra.gmra.mxu3 %vm701_vm1, %v4850_v55 }
 0x15d   :  { %v613_v39 = vpop.f32.mrf.mxu2 }
 0x15e   :  { %v679_v50 = vpack.c.bf16 %v613_v39, %v613_v39 }
 0x15f   :  { %v4855_v0 = vpop.f32.mrf.mxu3 }
 0x160   :  { %v933_v1 = vsel %vm932_vm2, %v4855_v0, -inf  ;;  %v1172_v54 = vunpack.c.l.b16 %v679_v50 }
 0x161   :  { %934 = vmax.xlane.f32.xlu0 %v933_v1 }
 0x165   :  { %v615_v53 = vpop.f32.mrf.mxu2 }
 0x166   :  { %v680_v56 = vpack.c.bf16 %v615_v53, %v615_v53  ;;  %v4923_v42 = vpop.permute.xlu0 %1415 }
 0x167   :  { %v4859_v2 = vpop.f32.mrf.mxu3 }
 0x168   :  { %v936_v7 = vsel %vm932_vm2, %v4859_v2, -inf  ;;  %v1173_v58 = vunpack.c.l.b16 %v680_v56 }
 0x169   :  { %937 = vmax.xlane.f32.xlu0 %v936_v7 }
 0x16a   :  { %v4898_v61 = vpack.c.b16 %v1173_v58, %v1172_v54  ;;  %v4939_v58 = vpop.permute.xlu2 %1389 }
 0x16c   :  { %1186 = vmatpush.bf16.msra.mxu2 %v4898_v61 }
 0x16f   :  { %v4863_v10 = vpop.f32.mrf.mxu3 }
 0x170   :  { %v939_v11 = vsel %vm932_vm2, %v4863_v10, -inf }
 0x171   :  { %940 = vmax.xlane.f32.xlu2 %v939_v11 }
 0x177   :  { %v4867_v9 = vpop.f32.mrf.mxu3 }
 0x178   :  { %v942_v13 = vsel %vm932_vm2, %v4867_v9, -inf }
 0x179   :  { %943 = vmax.xlane.f32.xlu2 %v942_v13  ;;  %v618_v62 = vpop.f32.mrf.mxu2 }
 0x17a   :  { %v681_v7 = vpack.c.bf16 %v618_v62, %v618_v62 }
 0x17c   :  { %v1200_v12 = vunpack.c.l.b16 %v681_v7 }
 0x17f   :  { %v4871_v20 = vpop.f32.mrf.mxu3 }
 0x180   :  { %v945_v21 = vsel %vm932_vm2, %v4871_v20, -inf }
 0x181   :  { %946 = vmax.xlane.f32.xlu1 %v945_v21  ;;  %v620_v11 = vpop.f32.mrf.mxu2 }
 0x182   :  { %v682_v13 = vpack.c.bf16 %v620_v11, %v620_v11 }
 0x184   :  { %v1201_v14 = vunpack.c.l.b16 %v682_v13  ;;  %v1392_v13 = vpop.permute.xlu2 %1391 }
 0x186   :  { %v4909_v18 = vpack.c.b16 %v1201_v14, %v1200_v12  ;;  %v4933_v50 = vpop.permute.xlu0 %1463 }
 0x187   :  { %v4878_v26 = vpop.f32.mrf.mxu3 }
 0x188   :  { %v948_v27 = vsel %vm932_vm2, %v4878_v26, -inf  ;;  %1214 = vmatpush.bf16.msrb.mxu3 %v4909_v18 }
 0x189   :  { %949 = vmax.xlane.f32.xlu1 %v948_v27 }
 0x18d   :  { %v623_v19 = vpop.f32.mrf.mxu2 }
 0x18e   :  { %v683_v27 = vpack.c.bf16 %v623_v19, %v623_v19 }
 0x18f   :  { %v4882_v36 = vpop.f32.mrf.mxu3 }
 0x190   :  { %v951_v37 = vsel %vm932_vm2, %v4882_v36, -inf  ;;  %v1228_v29 = vunpack.c.l.b16 %v683_v27 }
 0x191   :  { %952 = vmax.xlane.f32.xlu2 %v951_v37 }
 0x195   :  { %v625_v28 = vpop.f32.mrf.mxu2 }
 0x196   :  { %v684_v30 = vpack.c.bf16 %v625_v28, %v625_v28 }
 0x197   :  { %v4889_v45 = vpop.f32.mrf.mxu3 }
 0x198   :  { %v954_v49 = vsel %vm932_vm2, %v4889_v45, -inf  ;;  %v1229_v33 = vunpack.c.l.b16 %v684_v30  ;;  %v4955_v30 = vpop.permute.xlu1 %1413 }
 0x199   :  { %955 = vmax.xlane.f32.xlu0 %v954_v49 }
 0x19a   :  { %v4920_v39 = vpack.c.b16 %v1229_v33, %v1228_v29 }
 0x19c   :  { %1242 = vmatpush.bf16.msra.mxu0 %v4920_v39 }
 0x19d   :  { %v628_v41 = vpop.f32.mrf.mxu2 }
 0x19e   :  { %v685_v47 = vpack.c.bf16 %v628_v41, %v628_v41 }
 0x19f   :  { %v4894_v59 = vpop.f32.mrf.mxu3 }
 0x1a0   :  { %v957_v60 = vsel %vm932_vm2, %v4894_v59, -inf  ;;  %v1256_v52 = vunpack.c.l.b16 %v685_v47 }
 0x1a1   :  { %958 = vmax.xlane.f32.xlu0 %v957_v60 }
 0x1a5   :  { %v630_v49 = vpop.f32.mrf.mxu2 }
 0x1a6   :  { %v686_v53 = vpack.c.bf16 %v630_v49, %v630_v49 }
 0x1a7   :  { %v4901_v63 = vpop.f32.mrf.mxu3 }
 0x1a8   :  { %v960_v1 = vsel %vm932_vm2, %v4901_v63, -inf  ;;  %v1257_v54 = vunpack.c.l.b16 %v686_v53 }
 0x1a9   :  { %961 = vmax.xlane.f32.xlu1 %v960_v1 }
 0x1aa   :  { %v4937_v56 = vpack.c.b16 %v1257_v54, %v1256_v52  ;;  %v1368_v54 = vpop.permute.xlu1 %1367 }
 0x1ac   :  { %1270 = vmatpush.bf16.msrb.mxu1 %v4937_v56 }
 0x1af   :  { %v4905_v5 = vpop.f32.mrf.mxu3  ;;  %v633_v60 = vpop.f32.mrf.mxu2 }
 0x1b0   :  { %v963_v16 = vsel %vm932_vm2, %v4905_v5, -inf  ;;  %v687_v7 = vpack.c.bf16 %v633_v60, %v633_v60 }
 0x1b1   :  { %964 = vmax.xlane.f32.xlu0 %v963_v16 }
 0x1b2   :  { %v1284_v16 = vunpack.c.l.b16 %v687_v7 }
 0x1b7   :  { %v4912_v21 = vpop.f32.mrf.mxu3  ;;  %v635_v12 = vpop.f32.mrf.mxu2 }
 0x1b8   :  { %v966_v25 = vsel %vm932_vm2, %v4912_v21, -inf  ;;  %v688_v19 = vpack.c.bf16 %v635_v12, %v635_v12 }
 0x1b9   :  { %967 = vmax.xlane.f32.xlu1 %v966_v25 }
 0x1ba   :  { %v1285_v27 = vunpack.c.l.b16 %v688_v19 }
 0x1bc   :  { %v4946_v29 = vpack.c.b16 %v1285_v27, %v1284_v16 }
 0x1be   :  { %1298 = vmatpush.bf16.msrb.mxu2 %v4946_v29 }
 0x1bf   :  { %v4916_v35 = vpop.f32.mrf.mxu3 }
 0x1c0   :  { %v969_v37 = vsel %vm932_vm2, %v4916_v35, -inf }
 0x1c1   :  { %970 = vmax.xlane.f32.xlu1 %v969_v37 }
 0x1c5   :  { %1461 = vrot.lane.b32.xlu0 %v4823_v40, %s4647_s6 }
 0x1c7   :  { %v4927_v43 = vpop.f32.mrf.mxu3 }
 0x1c8   :  { %v972_v46 = vsel %vm932_vm2, %v4927_v43, -inf }
 0x1c9   :  { %973 = vmax.xlane.f32.xlu2 %v972_v46 }
 0x1cd   :  { %1487 = vrot.lane.b32.xlu0 %v4828_v57, %s4647_s6 }
 0x1cf   :  { %v4964_v49 = vpop.f32.mrf.mxu3 }
 0x1d4   :  { %v935_v62 = vpop.xlane.xlu0 %934 }
 0x1d5   :  { %v981_v1 = vsub.f32 %v4855_v0, %v935_v62 }
 0x1d7   :  { %v997_v11 = vmul.f32 1.442695, %v981_v1  ;;  %v1373_v1 = vsel %vm701_vm1, %v1368_v54, 0  ;;  %v4975_v12 = vpop.f32.mrf.mxu3 }
 0x1d9   :  { %4152 = vpow2.f32 %v997_v11 }
 0x1da   :  { %1439 = vrot.lane.b32.xlu1 %v4808_v4, %s4647_s6 }
 0x1dc   :  { %v938_v14 = vpop.xlane.xlu0 %937 }
 0x1dd   :  { %v982_v25 = vsub.f32 %v4859_v2, %v938_v14 }
 0x1df   :  { %v999_v28 = vmul.f32 1.442695, %v982_v25  ;;  %v4953_v0 = vpop.eup %4152 }
 0x1e0   :  { %6939 = vst [vmem:[#allocation23_spill] sm:$0xff] %v4953_v0  ;;  %v1093_v37 = vpack.c.bf16 %v4953_v0, %v4953_v0 }
 0x1e1   :  { %4154 = vpow2.f32 %v999_v28  ;;  %1511 = vrot.lane.b32.xlu2 %v4837_v22, %s4647_s6 }
 0x1e2   :  { %1437 = vrot.lane.b32.xlu1 %v4812_v15, %s4647_s6  ;;  %v1111_v52 = vunpack.c.l.b16 %v1093_v37 }
 0x1e4   :  { %v941_v33 = vpop.xlane.xlu2 %940 }
 0x1e5   :  { %v983_v2 = vsub.f32 %v4863_v10, %v941_v33 }
 0x1e7   :  { %v4960_v41 = vpop.eup %4154  ;;  %v1001_v47 = vmul.f32 1.442695, %v983_v2 }
 0x1e8   :  { %6940 = vst [vmem:[#allocation24_spill] sm:$0xff] %v4960_v41  ;;  %v1094_v46 = vpack.c.bf16 %v4960_v41, %v4960_v41 }
 0x1e9   :  { %4156 = vpow2.f32 %v1001_v47  ;;  %v1397_v47 = vsel %vm701_vm1, %v1392_v13, 0 }
 0x1ea   :  { %1485 = vrot.lane.b32.xlu1 %v4832_v8, %s4647_s6  ;;  %v1112_v53 = vunpack.c.l.b16 %v1094_v46 }
 0x1ec   :  { %v944_v60 = vpop.xlane.xlu2 %943  ;;  %v1113_v62 = vpack.c.b16 %v1112_v53, %v1111_v52 }
 0x1ed   :  { %v984_v10 = vsub.f32 %v4867_v9, %v944_v60  ;;  %v978_v9 = vsel %vm932_vm2, %v4975_v12, -inf }
 0x1ee   :  { %3925 = vmatmul.msk.bf16.vlgmr.msrb.gmra.mxu0 %vm932_vm2, %v1113_v62 }
 0x1ef   :  { %v1003_v7 = vmul.f32 1.442695, %v984_v10  ;;  %1382 = vmatpush.bf16.xpose.msrb.mxu0 %v1373_v1  ;;  %v4973_v11 = vpop.eup %4156  ;;  %v975_v1 = vsel %vm932_vm2, %v4964_v49, -inf }
 0x1f0   :  { %6941 = vst [vmem:[#allocation25_spill] sm:$0xff] %v4973_v11  ;;  %v1095_v19 = vpack.c.bf16 %v4973_v11, %v4973_v11 }
 0x1f1   :  { %4158 = vpow2.f32 %v1003_v7 }
 0x1f2   :  { %1838 = vrot.lane.b32.xlu1 %v4920_v39, %s4647_s6  ;;  %v1139_v33 = vunpack.c.l.b16 %v1095_v19  ;;  %v1421_v19 = vsel %vm701_vm1, %v4923_v42, 0 }
 0x1f4   :  { %v947_v14 = vpop.xlane.xlu1 %946 }
 0x1f5   :  { %v985_v16 = vsub.f32 %v4871_v20, %v947_v14 }
 0x1f7   :  { %v4982_v25 = vpop.eup %4158  ;;  %979 = vmax.xlane.f32.xlu0 %v978_v9  ;;  %v1005_v28 = vmul.f32 1.442695, %v985_v16 }
 0x1f8   :  { %6942 = vst [vmem:[#allocation26_spill] sm:$0xff] %v4982_v25  ;;  %v1096_v27 = vpack.c.bf16 %v4982_v25, %v4982_v25 }
 0x1f9   :  { %4160 = vpow2.f32 %v1005_v28 }
 0x1fa   :  { %1813 = vrot.lane.b32.xlu1 %v4909_v18, %s4647_s6  ;;  %v1140_v2 = vunpack.c.l.b16 %v1096_v27 }
 0x1fc   :  { %v950_v37 = vpop.xlane.xlu1 %949  ;;  %v1141_v20 = vpack.c.b16 %v1140_v2, %v1139_v33 }
 0x1fd   :  { %v986_v46 = vsub.f32 %v4878_v26, %v950_v37 }
 0x1fe   :  { %3926 = vmatmul.msk.bf16.vlgmr.msra.gmra.mxu1 %vm932_vm2, %v1141_v20 }
 0x1ff   :  { %v1007_v52 = vmul.f32 1.442695, %v986_v46  ;;  %1406 = vmatpush.bf16.xpose.msra.mxu1 %v1397_v47  ;;  %v4993_v53 = vpop.eup %4160 }
 0x200   :  { %6943 = vst [vmem:[#allocation27_spill] sm:$0xff] %v4993_v53  ;;  %v1097_v62 = vpack.c.bf16 %v4993_v53, %v4993_v53 }
 0x201   :  { %4162 = vpow2.f32 %v1007_v52 }
 0x202   :  { %1888 = vrot.lane.b32.xlu1 %v4946_v29, %s4647_s6  ;;  %v1167_v7 = vunpack.c.l.b16 %v1097_v62  ;;  %v638_v62 = vpop.f32.mrf.mxu2 }
 0x204   :  { %v953_v54 = vpop.xlane.xlu2 %952 }
 0x205   :  { %v987_v60 = vsub.f32 %v4882_v36, %v953_v54 }
 0x207   :  { %v4998_v10 = vpop.eup %4162  ;;  %v1009_v13 = vmul.f32 1.442695, %v987_v60 }
 0x208   :  { %6944 = vst [vmem:[#allocation28_spill] sm:$0xff] %v4998_v10  ;;  %v1098_v26 = vpack.c.bf16 %v4998_v10, %v4998_v10 }
 0x209   :  { %4164 = vpow2.f32 %v1009_v13 }
 0x20a   :  { %1991 = vrot.lane.b32.xlu1 %v4788_v31, %s4648_s21  ;;  %976 = vmax.xlane.f32.xlu2 %v975_v1  ;;  %v1168_v14 = vunpack.c.l.b16 %v1098_v26  ;;  %v689_v1 = vpack.c.bf16 %v638_v62, %v638_v62 }
 0x20b   :  { %1535 = vrot.lane.b32.xlu0 %v4846_v51, %s4647_s6 }
 0x20c   :  { %v956_v36 = vpop.xlane.xlu0 %955  ;;  %v1169_v16 = vpack.c.b16 %v1168_v14, %v1167_v7 }
 0x20d   :  { %v988_v9 = vsub.f32 %v4889_v45, %v956_v36  ;;  %v640_v36 = vpop.f32.mrf.mxu2 }
 0x20e   :  { %3927 = vmatmul.msk.bf16.vlgmr.msra.gmra.mxu2 %vm932_vm2, %v1169_v16 }
 0x20f   :  { %v1011_v27 = vmul.f32 1.442695, %v988_v9  ;;  %1430 = vmatpush.bf16.xpose.msra.mxu2 %v1421_v19  ;;  %v5014_v28 = vpop.eup %4164  ;;  %v1312_v9 = vunpack.c.l.b16 %v689_v1  ;;  %v690_v19 = vpack.c.bf16 %v640_v36, %v640_v36 }
 0x210   :  { %6945 = vst [vmem:[#allocation29_spill] sm:$0xff] %v5014_v28  ;;  %v1099_v45 = vpack.c.bf16 %v5014_v28, %v5014_v28 }
 0x211   :  { %4166 = vpow2.f32 %v1011_v27 }
 0x212   :  { %2039 = vrot.lane.b32.xlu1 %v4808_v4, %s4648_s21  ;;  %v1195_v46 = vunpack.c.l.b16 %v1099_v45  ;;  %v1313_v45 = vunpack.c.l.b16 %v690_v19 }
 0x213   :  { %1738 = vrot.lane.b32.xlu0 %v4875_v24, %s4647_s6 }
 0x214   :  { %v959_v33 = vpop.xlane.xlu0 %958 }
 0x215   :  { %v989_v2 = vsub.f32 %v4894_v59, %v959_v33 }
 0x217   :  { %v5021_v42 = vpop.eup %4166  ;;  %v1013_v20 = vmul.f32 1.442695, %v989_v2 }
 0x218   :  { %6946 = vst [vmem:[#allocation30_spill] sm:$0xff] %v5021_v42  ;;  %v1100_v37 = vpack.c.bf16 %v5021_v42, %v5021_v42 }
 0x219   :  { %4168 = vpow2.f32 %v1013_v20  ;;  %v5046_v20 = vpack.c.b16 %v1313_v45, %v1312_v9 }
 0x21a   :  { %v1196_v47 = vunpack.c.l.b16 %v1100_v37 }
 0x21b   :  { %1967 = vrot.lane.b32.xlu0 %v4780_v23, %s4648_s21  ;;  %1326 = vmatpush.bf16.msra.mxu3 %v5046_v20 }
 0x21c   :  { %v962_v52 = vpop.xlane.xlu1 %961  ;;  %v1197_v54 = vpack.c.b16 %v1196_v47, %v1195_v46  ;;  %v1469_v47 = vsel %vm701_vm1, %v4933_v50, 0 }
 0x21d   :  { %v990_v60 = vsub.f32 %v4901_v63, %v962_v52 }
 0x21e   :  { %3928 = vmatmul.msk.bf16.vlgmr.msrb.gmra.mxu3 %vm932_vm2, %v1197_v54 }
 0x21f   :  { %v1015_v59 = vmul.f32 1.442695, %v990_v60  ;;  %v5031_v26 = vpop.eup %4168 }
 0x220   :  { %6947 = vst [vmem:[#allocation31_spill] sm:$0xff] %v5031_v26  ;;  %v1101_v63 = vpack.c.bf16 %v5031_v26, %v5031_v26 }
 0x221   :  { %4170 = vpow2.f32 %v1015_v59 }
 0x222   :  { %1509 = vrot.lane.b32.xlu2 %v4841_v34, %s4647_s6  ;;  %v1223_v33 = vunpack.c.l.b16 %v1101_v63 }
 0x223   :  { %2063 = vrot.lane.b32.xlu0 %v4817_v32, %s4648_s21 }
 0x224   :  { %v965_v13 = vpop.xlane.xlu0 %964 }
 0x225   :  { %v991_v7 = vsub.f32 %v4905_v5, %v965_v13 }
 0x227   :  { %v5038_v14 = vpop.eup %4170  ;;  %v1017_v27 = vmul.f32 1.442695, %v991_v7 }
 0x228   :  { %6948 = vst [vmem:[#allocation32_spill] sm:$0xff] %v5038_v14  ;;  %v1102_v16 = vpack.c.bf16 %v5038_v14, %v5038_v14 }
 0x229   :  { %4172 = vpow2.f32 %v1017_v27 }
 0x22a   :  { %1533 = vrot.lane.b32.xlu2 %v4850_v55, %s4647_s6  ;;  %v1224_v2 = vunpack.c.l.b16 %v1102_v16 }
 0x22b   :  { %2061 = vrot.lane.b32.xlu0 %v4823_v40, %s4648_s21 }
 0x22c   :  { %v968_v5 = vpop.xlane.xlu1 %967  ;;  %v1225_v37 = vpack.c.b16 %v1224_v2, %v1223_v33 }
 0x22d   :  { %v992_v46 = vsub.f32 %v4912_v21, %v968_v5 }
 0x22e   :  { %3929 = vmatmul.msk.bf16.vlgmr.msra.gmra.mxu0 %vm932_vm2, %v1225_v37 }
 0x22f   :  { %v1019_v52 = vmul.f32 1.442695, %v992_v46  ;;  %1478 = vmatpush.bf16.xpose.msra.mxu0 %v1469_v47  ;;  %v5055_v54 = vpop.eup %4172 }
 0x230   :  { %6949 = vst [vmem:[#allocation33_spill] sm:$0xff] %v5055_v54  ;;  %v1103_v50 = vpack.c.bf16 %v5055_v54, %v5055_v54 }
 0x231   :  { %4174 = vpow2.f32 %v1019_v52 }
 0x232   :  { %1788 = vrot.lane.b32.xlu2 %v4898_v61, %s4647_s6  ;;  %v1251_v7 = vunpack.c.l.b16 %v1103_v50 }
 0x233   :  { %2087 = vrot.lane.b32.xlu0 %v4828_v57, %s4648_s21 }
 0x234   :  { %v971_v60 = vpop.xlane.xlu1 %970 }
 0x235   :  { %v993_v21 = vsub.f32 %v4916_v35, %v971_v60 }
 0x237   :  { %v5062_v59 = vpop.eup %4174  ;;  %v1462_v62 = vpop.permute.xlu0 %1461  ;;  %v1021_v1 = vmul.f32 1.442695, %v993_v21 }
 0x238   :  { %6950 = vst [vmem:[#allocation34_spill] sm:$0xff] %v5062_v59  ;;  %v1104_v13 = vpack.c.bf16 %v5062_v59, %v5062_v59 }
 0x239   :  { %4176 = vpow2.f32 %v1021_v1 }
 0x23a   :  { %1763 = vrot.lane.b32.xlu2 %v4886_v38, %s4647_s6  ;;  %v1252_v63 = vunpack.c.l.b16 %v1104_v13 }
 0x23c   :  { %v974_v36 = vpop.xlane.xlu2 %973  ;;  %v1253_v16 = vpack.c.b16 %v1252_v63, %v1251_v7 }
 0x23d   :  { %v994_v35 = vsub.f32 %v4927_v43, %v974_v36 }
 0x23e   :  { %3930 = vmatmul.msk.bf16.vlgmr.msrb.gmra.mxu1 %vm932_vm2, %v1253_v16  ;;  %3933 = vmatmul.msk.bf16.vlgmr.msrb.gmra.mxu0 %vm701_vm1, %v4929_v44 }
 0x23f   :  { %v1023_v9 = vmul.f32 1.442695, %v994_v35  ;;  %v1488_v19 = vpop.permute.xlu0 %1487  ;;  %v5075_v33 = vpop.eup %4176 }
 0x240   :  { %v1493_v27 = vsel %vm701_vm1, %v1488_v19, 0  ;;  %6951 = vst [vmem:[#allocation35_spill] sm:$0xff] %v5075_v33  ;;  %v1105_v2 = vpack.c.bf16 %v5075_v33, %v5075_v33 }
 0x241   :  { %4178 = vpow2.f32 %v1023_v9  ;;  %1502 = vmatpush.bf16.xpose.msrb.mxu1 %v1493_v27 }
 0x242   :  { %1863 = vrot.lane.b32.xlu2 %v4937_v56, %s4647_s6  ;;  %v1279_v44 = vunpack.c.l.b16 %v1105_v2 }
 0x244   :  { %v1512_v37 = vpop.permute.xlu2 %1511 }
 0x245   :  { %v1517_v60 = vsel %vm701_vm1, %v1512_v37, 0 }
 0x247   :  { %v5079_v43 = vpop.eup %4178 }
 0x248   :  { %6952 = vst [vmem:[#allocation36_spill] sm:$0xff] %v5079_v43  ;;  %v1106_v45 = vpack.c.bf16 %v5079_v43, %v5079_v43 }
 0x24a   :  { %1965 = vrot.lane.b32.xlu2 %v4767_v6, %s4648_s21  ;;  %v1280_v5 = vunpack.c.l.b16 %v1106_v45 }
 0x24c   :  { %v1440_v46 = vpop.permute.xlu1 %1439  ;;  %v1281_v47 = vpack.c.b16 %v1280_v5, %v1279_v44 }
 0x24d   :  { %v1445_v52 = vsel %vm701_vm1, %v1440_v46, 0 }
 0x24e   :  { %3931 = vmatmul.msk.bf16.vlgmr.msrb.gmra.mxu2 %vm932_vm2, %v1281_v47  ;;  %3934 = vmatmul.msk.bf16.vlgmr.msra.gmra.mxu1 %vm701_vm1, %v4939_v58 }
 0x24f   :  { %1454 = vmatpush.bf16.xpose.msrb.mxu3 %v1445_v52  ;;  %3937 = vmatmul.msk.bf16.vlgmr.msra.gmra.mxu0 %vm701_vm1, %v1462_v62 }
 0x250   :  { %1526 = vmatpush.bf16.xpose.msrb.mxu2 %v1517_v60 }
 0x252   :  { %2015 = vrot.lane.b32.xlu2 %v4797_v48, %s4648_s21 }
 0x254   :  { %v1438_v21 = vpop.permute.xlu1 %1437 }
 0x25a   :  { %1913 = vrot.lane.b32.xlu2 %v5046_v20, %s4647_s6 }
 0x25c   :  { %v1486_v50 = vpop.permute.xlu1 %1485 }
 0x25e   :  { %3935 = vmatmul.msk.bf16.vlgmr.msra.gmra.mxu2 %vm701_vm1, %v4955_v30  ;;  %3938 = vmatmul.msk.bf16.vlgmr.msrb.gmra.mxu1 %vm701_vm1, %v1486_v50 }
 0x262   :  { %2013 = vrot.lane.b32.xlu2 %v4763_v3, %s4648_s21 }
 0x264   :  { %v1839_v36 = vpop.permute.xlu1 %1838 }
 0x26a   :  { %1989 = vrot.lane.b32.xlu2 %v4776_v17, %s4648_s21  ;;  %v980_v58 = vpop.xlane.xlu0 %979 }
 0x26b   :  { %v996_v62 = vsub.f32 %v4975_v12, %v980_v58  ;;  %v5117_v52 = vpop.f32.mrf.mxu0 }
 0x26c   :  { %v1814_v45 = vpop.permute.xlu1 %1813  ;;  %6955 = vst [vmem:[#allocation39_spill] sm:$0xff] %v5117_v52 }
 0x26d   :  { %v1027_v13 = vmul.f32 1.442695, %v996_v62 }
 0x26f   :  { %4180 = vpow2.f32 %v1027_v13 }
 0x272   :  { %2111 = vrot.lane.b32.xlu2 %v4837_v22, %s4648_s21 }
 0x273   :  { %v5120_v50 = vpop.f32.mrf.mxu0 }
 0x274   :  { %v1889_v47 = vpop.permute.xlu1 %1888  ;;  %6956 = vst [vmem:[#allocation40_spill] sm:$0xff] %v5120_v50 }
 0x275   :  { %v5106_v16 = vpop.eup %4180 }
 0x276   :  { %6953 = vst [vmem:[#allocation37_spill] sm:$0xff] %v5106_v16  ;;  %v1108_v19 = vpack.c.bf16 %v5106_v16, %v5106_v16 }
 0x278   :  { %v1308_v2 = vunpack.c.l.b16 %v1108_v19 }
 0x27b   :  { %v5122_v62 = vpop.f32.mrf.mxu1 }
 0x27c   :  { %6957 = vst [vmem:[#allocation41_spill] sm:$0xff] %v5122_v62 }
 0x27d   :  { %v977_v1 = vpop.xlane.xlu2 %976  ;;  %v1536_v7 = vpop.permute.xlu0 %1535 }
 0x27e   :  { %v995_v30 = vsub.f32 %v4964_v49, %v977_v1  ;;  %v1541_v37 = vsel %vm701_vm1, %v1536_v7, 0 }
 0x280   :  { %v1025_v63 = vmul.f32 1.442695, %v995_v30 }
 0x282   :  { %4182 = vpow2.f32 %v1025_v63 }
 0x283   :  { %v5129_v7 = vpop.f32.mrf.mxu1 }
 0x284   :  { %6959 = vst [vmem:[#allocation43_spill] sm:$0xff] %v5129_v7 }
 0x285   :  { %v1510_v35 = vpop.permute.xlu2 %1509  ;;  %v1739_v9 = vpop.permute.xlu0 %1738 }
 0x286   :  { %3939 = vmatmul.msk.bf16.vlgmr.msrb.gmra.mxu2 %vm701_vm1, %v1510_v35  ;;  %1751 = vmatpush.bf16.msrb.mxu0 %v1739_v9 }
 0x288   :  { %v5111_v12 = vpop.eup %4182 }
 0x289   :  { %6954 = vst [vmem:[#allocation38_spill] sm:$0xff] %v5111_v12  ;;  %v1107_v27 = vpack.c.bf16 %v5111_v12, %v5111_v12 }
 0x28a   :  { %1851 = vmatpush.bf16.msra.mxu0 %v1839_v36 }
 0x28b   :  { %v1307_v49 = vunpack.c.l.b16 %v1107_v27 }
 0x28d   :  { %v1534_v44 = vpop.permute.xlu2 %1533  ;;  %v1309_v5 = vpack.c.b16 %v1308_v2, %v1307_v49 }
 0x28f   :  { %3932 = vmatmul.msk.bf16.vlgmr.msra.gmra.mxu3 %vm932_vm2, %v1309_v5 }
 0x290   :  { %1550 = vmatpush.bf16.xpose.msra.mxu3 %v1541_v37 }
 0x291   :  { %v5141_v19 = vpop.f32.mrf.mxu2 }
 0x292   :  { %6962 = vst [vmem:[#allocation46_spill] sm:$0xff] %v5141_v19 }
 0x295   :  { %v1789_v46 = vpop.permute.xlu2 %1788 }
 0x296   :  { %1801 = vmatpush.bf16.msra.mxu2 %v1789_v46 }
 0x29a   :  { %1901 = vmatpush.bf16.msrb.mxu2 %v1889_v47 }
 0x29d   :  { %v1764_v60 = vpop.permute.xlu2 %1763 }
 0x29e   :  { %1776 = vmatpush.bf16.msra.mxu1 %v1764_v60 }
 0x29f   :  { %3936 = vmatmul.msk.bf16.vlgmr.msrb.gmra.mxu3 %vm701_vm1, %v1438_v21 }
 0x2a0   :  { %1826 = vmatpush.bf16.msrb.mxu3 %v1814_v45  ;;  %v5149_v45 = vpop.f32.mrf.mxu2 }
 0x2a1   :  { %6964 = vst [vmem:[#allocation48_spill] sm:$0xff] %v5149_v45 }
 0x2a5   :  { %v1864_v58 = vpop.permute.xlu2 %1863 }
 0x2a6   :  { %1876 = vmatpush.bf16.msrb.mxu1 %v1864_v58 }
 0x2ab   :  { %v5124_v13 = vpop.f32.mrf.mxu0 }
 0x2ac   :  { %6958 = vst [vmem:[#allocation42_spill] sm:$0xff] %v5124_v13 }
 0x2ad   :  { %v5126_v1 = vpop.permute.xlu2 %1965 }
 0x2af   :  { %3940 = vmatmul.msk.bf16.vlgmr.msra.gmra.mxu3 %vm701_vm1, %v1534_v44 }
 0x2b3   :  { %v5131_v30 = vpop.f32.mrf.mxu0 }
 0x2b4   :  { %6960 = vst [vmem:[#allocation44_spill] sm:$0xff] %v5131_v30 }
 0x2b5   :  { %v5133_v63 = vpop.permute.xlu2 %2015 }
 0x2bb   :  { %v5135_v21 = vpop.f32.mrf.mxu1  ;;  %v5137_v36 = vpop.f32.mrf.mxu0 }
 0x2bc   :  { %6961 = vst [vmem:[#allocation45_spill] sm:$0xff] %v5135_v21  ;;  %v1557_v35 = vsel %vm932_vm2, %v5137_v36, -inf }
 0x2bd   :  { %1558 = vmax.xlane.f32.xlu1 %v1557_v35  ;;  %v1914_v9 = vpop.permute.xlu2 %1913 }
 0x2be   :  { %1926 = vmatpush.bf16.msra.mxu3 %v1914_v9 }
 0x2c3   :  { %v5143_v27 = vpop.f32.mrf.mxu1  ;;  %v5145_v49 = vpop.f32.mrf.mxu0 }
 0x2c4   :  { %6963 = vst [vmem:[#allocation47_spill] sm:$0xff] %v5143_v27  ;;  %v1560_v2 = vsel %vm932_vm2, %v5145_v49, -inf  ;;  %v5211_v27 = vpop.permute.xlu1 %1991 }
 0x2c5   :  { %1561 = vmax.xlane.f32.xlu0 %v1560_v2  ;;  %v5217_v13 = vpop.permute.xlu2 %2013 }
 0x2cb   :  { %v5151_v44 = vpop.f32.mrf.mxu1 }
 0x2cc   :  { %v1563_v5 = vsel %vm932_vm2, %v5151_v44, -inf  ;;  %v5155_v37 = vpop.f32.mrf.mxu0 }
 0x2cd   :  { %1564 = vmax.xlane.f32.xlu2 %v1563_v5  ;;  %v1581_v58 = vsel %vm932_vm2, %v5155_v37, -inf  ;;  %v5231_v30 = vpop.permute.xlu2 %1989 }
 0x2d1   :  { %v5157_v46 = vpop.f32.mrf.mxu2 }
 0x2d2   :  { %6965 = vst [vmem:[#allocation49_spill] sm:$0xff] %v5157_v46 }
 0x2d3   :  { %v5159_v47 = vpop.f32.mrf.mxu1 }
 0x2d4   :  { %v1566_v60 = vsel %vm932_vm2, %v5159_v47, -inf  ;;  %v5165_v35 = vpop.f32.mrf.mxu0 }
 0x2d5   :  { %1567 = vmax.xlane.f32.xlu1 %v1566_v60  ;;  %1582 = vmax.xlane.f32.xlu2 %v1581_v58  ;;  %v1584_v5 = vsel %vm932_vm2, %v5165_v35, -inf }
 0x2d9   :  { %v5167_v9 = vpop.f32.mrf.mxu2 }
 0x2da   :  { %6966 = vst [vmem:[#allocation50_spill] sm:$0xff] %v5167_v9 }
 0x2db   :  { %v5169_v2 = vpop.f32.mrf.mxu1 }
 0x2dc   :  { %v1587_v46 = vsel %vm932_vm2, %v5169_v2, -inf }
 0x2dd   :  { %1585 = vmax.xlane.f32.xlu1 %v1584_v5  ;;  %1588 = vmax.xlane.f32.xlu2 %v1587_v46  ;;  %v5189_v46 = vpop.f32.mrf.mxu3 }
 0x2de   :  { %6967 = vst [vmem:[#allocation51_spill] sm:$0xff] %v5189_v46 }
 0x2e1   :  { %v5175_v16 = vpop.f32.mrf.mxu2 }
 0x2e2   :  { %v1569_v60 = vsel %vm932_vm2, %v5175_v16, -inf }
 0x2e3   :  { %v5177_v12 = vpop.f32.mrf.mxu1 }
 0x2e4   :  { %v1590_v58 = vsel %vm932_vm2, %v5177_v12, -inf }
 0x2e5   :  { %1570 = vmax.xlane.f32.xlu2 %v1569_v60  ;;  %1591 = vmax.xlane.f32.xlu0 %v1590_v58  ;;  %v5195_v52 = vpop.f32.mrf.mxu3 }
 0x2e6   :  { %6968 = vst [vmem:[#allocation52_spill] sm:$0xff] %v5195_v52 }
 0x2e9   :  { %v5183_v9 = vpop.f32.mrf.mxu2 }
 0x2ea   :  { %v1572_v33 = vsel %vm932_vm2, %v5183_v9, -inf }
 0x2eb   :  { %1573 = vmax.xlane.f32.xlu1 %v1572_v33  ;;  %v1968_v33 = vpop.permute.xlu0 %1967 }
 0x2ec   :  { %v1973_v62 = vsel %vm701_vm1, %v1968_v33, 0 }
 0x2f3   :  { %v5207_v43 = vpop.permute.xlu0 %2063 }
 0x2fd   :  { %2109 = vrot.lane.b32.xlu2 %v4841_v34, %s4648_s21 }
 0x305   :  { %2133 = vrot.lane.b32.xlu2 %v4850_v55, %s4648_s21 }
 0x309   :  { %v5193_v5 = vpop.f32.mrf.mxu2 }
 0x30a   :  { %v1593_v60 = vsel %vm932_vm2, %v5193_v5, -inf }
 0x30b   :  { %1594 = vmax.xlane.f32.xlu1 %v1593_v60 }
 0x30d   :  { %2338 = vrot.lane.b32.xlu2 %v4875_v24, %s4648_s21 }
 0x312   :  { %v5201_v58 = vpop.f32.mrf.mxu3 }
 0x313   :  { %6969 = vst [vmem:[#allocation53_spill] sm:$0xff] %v5201_v58  ;;  %v5219_v58 = vpop.permute.xlu0 %2061 }
 0x315   :  { %2388 = vrot.lane.b32.xlu2 %v4898_v61, %s4648_s21 }
 0x31a   :  { %v5205_v50 = vpop.f32.mrf.mxu3 }
 0x31b   :  { %6970 = vst [vmem:[#allocation54_spill] sm:$0xff] %v5205_v50  ;;  %v5223_v50 = vpop.permute.xlu1 %2039  ;;  %v5233_v54 = vpop.permute.xlu0 %2087 }
 0x31d   :  { %2565 = vrot.lane.b32.xlu2 %v4767_v6, %s4649_s1 }
 0x322   :  { %v5213_v60 = vpop.f32.mrf.mxu3 }
 0x323   :  { %v1575_v21 = vsel %vm932_vm2, %v5213_v60, -inf }
 0x324   :  { %1576 = vmax.xlane.f32.xlu0 %v1575_v21  ;;  %v5235_v21 = vpop.f32.mrf.mxu2 }
 0x325   :  { %2591 = vrot.lane.b32.xlu2 %v4788_v31, %s4649_s1  ;;  %v1596_v46 = vsel %vm932_vm2, %v5235_v21, -inf }
 0x32a   :  { %v5225_v59 = vpop.f32.mrf.mxu3 }
 0x32b   :  { %v1578_v6 = vsel %vm932_vm2, %v5225_v59, -inf }
 0x32c   :  { %1579 = vmax.xlane.f32.xlu1 %v1578_v6  ;;  %v5242_v6 = vpop.permute.xlu2 %2111 }
 0x32d   :  { %2615 = vrot.lane.b32.xlu2 %v4797_v48, %s4649_s1 }
 0x330   :  { %v1559_v52 = vpop.xlane.xlu1 %1558 }
 0x331   :  { %v1605_v31 = vsub.f32 %v5137_v36, %v1559_v52 }
 0x333   :  { %v1621_v26 = vmul.f32 1.442695, %v1605_v31 }
 0x334   :  { %1597 = vmax.xlane.f32.xlu1 %v1596_v46 }
 0x335   :  { %2589 = vrot.lane.b32.xlu2 %v4776_v17, %s4649_s1  ;;  %4184 = vpow2.f32 %v1621_v26 }
 0x338   :  { %2085 = vrot.lane.b32.xlu0 %v4832_v8, %s4648_s21  ;;  %v1562_v48 = vpop.xlane.xlu0 %1561 }
 0x339   :  { %v1606_v14 = vsub.f32 %v5145_v49, %v1562_v48 }
 0x33b   :  { %v1623_v7 = vmul.f32 1.442695, %v1606_v14  ;;  %v5249_v52 = vpop.eup %4184 }
 0x33c   :  { %6971 = vst [vmem:[#allocation55_spill] sm:$0xff] %v5249_v52  ;;  %v1717_v46 = vpack.c.bf16 %v5249_v52, %v5249_v52 }
 0x33d   :  { %4186 = vpow2.f32 %v1623_v7  ;;  %2513 = vrot.lane.b32.xlu2 %v5046_v20, %s4648_s21 }
 0x33e   :  { %v1735_v7 = vunpack.c.l.b16 %v1717_v46 }
 0x340   :  { %v1565_v36 = vpop.xlane.xlu2 %1564  ;;  %2363 = vrot.lane.b32.xlu0 %v4886_v38, %s4648_s21 }
 0x341   :  { %v1607_v17 = vsub.f32 %v5151_v44, %v1565_v36 }
 0x343   :  { %v5256_v31 = vpop.eup %4186  ;;  %v1625_v14 = vmul.f32 1.442695, %v1607_v17 }
 0x344   :  { %6972 = vst [vmem:[#allocation56_spill] sm:$0xff] %v5256_v31  ;;  %v1718_v26 = vpack.c.bf16 %v5256_v31, %v5256_v31 }
 0x345   :  { %2639 = vrot.lane.b32.xlu2 %v4808_v4, %s4649_s1  ;;  %4188 = vpow2.f32 %v1625_v14 }
 0x346   :  { %v1736_v49 = vunpack.c.l.b16 %v1718_v26 }
 0x348   :  { %v1568_v48 = vpop.xlane.xlu1 %1567  ;;  %v1583_v19 = vpop.xlane.xlu2 %1582  ;;  %2463 = vrot.lane.b32.xlu0 %v4937_v56, %s4648_s21  ;;  %v1737_v44 = vpack.c.b16 %v1736_v49, %v1735_v7 }
 0x349   :  { %v1608_v36 = vsub.f32 %v5159_v47, %v1568_v48  ;;  %v1613_v45 = vsub.f32 %v5155_v37, %v1583_v19 }
 0x34a   :  { %3941 = vmatmul.msk.bf16.vlgmr.msrb.gmra.mxu0 %vm932_vm2, %v1737_v44 }
 0x34b   :  { %v1627_v17 = vmul.f32 1.442695, %v1608_v36  ;;  %1982 = vmatpush.bf16.xpose.msrb.mxu0 %v1973_v62  ;;  %v1637_v4 = vmul.f32 1.442695, %v1613_v45  ;;  %v5272_v46 = vpop.eup %4188 }
 0x34c   :  { %6973 = vst [vmem:[#allocation57_spill] sm:$0xff] %v5272_v46  ;;  %v1719_v62 = vpack.c.bf16 %v5272_v46, %v5272_v46 }
 0x34d   :  { %4190 = vpow2.f32 %v1627_v17  ;;  %2663 = vrot.lane.b32.xlu2 %v4817_v32, %s4649_s1  ;;  %2037 = vrot.lane.b32.xlu1 %v4812_v15, %s4648_s21 }
 0x34e   :  { %4192 = vpow2.f32 %v1637_v4  ;;  %v1760_v14 = vunpack.c.l.b16 %v1719_v62  ;;  %v1997_v4 = vsel %vm701_vm1, %v5211_v27, 0 }
 0x350   :  { %v1586_v26 = vpop.xlane.xlu1 %1585  ;;  %v1589_v47 = vpop.xlane.xlu2 %1588  ;;  %2413 = vrot.lane.b32.xlu0 %v4909_v18, %s4648_s21 }
 0x351   :  { %v1614_v19 = vsub.f32 %v5165_v35, %v1586_v26  ;;  %v1615_v45 = vsub.f32 %v5169_v2, %v1589_v47 }
 0x353   :  { %v5280_v37 = vpop.eup %4190  ;;  %v1639_v32 = vmul.f32 1.442695, %v1614_v19  ;;  %v1641_v49 = vmul.f32 1.442695, %v1615_v45 }
 0x354   :  { %6974 = vst [vmem:[#allocation58_spill] sm:$0xff] %v5280_v37  ;;  %v1720_v33 = vpack.c.bf16 %v5280_v37, %v5280_v37  ;;  %v5286_v48 = vpop.eup %4192 }
 0x355   :  { %4194 = vpow2.f32 %v1639_v32  ;;  %2661 = vrot.lane.b32.xlu2 %v4823_v40, %s4649_s1  ;;  %6975 = vst [vmem:[#allocation59_spill] sm:$0xff] %v5286_v48  ;;  %v1725_v40 = vpack.c.bf16 %v5286_v48, %v5286_v48 }
 0x356   :  { %v1761_v7 = vunpack.c.l.b16 %v1720_v33  ;;  %4196 = vpow2.f32 %v1641_v49 }
 0x358   :  { %v1571_v35 = vpop.xlane.xlu2 %1570  ;;  %2613 = vrot.lane.b32.xlu0 %v4763_v3, %s4649_s1  ;;  %v1592_v2 = vpop.xlane.xlu0 %1591  ;;  %v1762_v44 = vpack.c.b16 %v1761_v7, %v1760_v14  ;;  %v2069_v7 = vsel %vm701_vm1, %v5207_v43, 0 }
 0x359   :  { %v1609_v36 = vsub.f32 %v5175_v16, %v1571_v35  ;;  %v1616_v17 = vsub.f32 %v5177_v12, %v1592_v2  ;;  %v1835_v12 = vunpack.c.l.b16 %v1725_v40  ;;  %v2093_v40 = vsel %vm701_vm1, %v5233_v54, 0  ;;  %v5341_v54 = vpop.f32.mrf.mxu3 }
 0x35a   :  { %3942 = vmatmul.msk.bf16.vlgmr.msra.gmra.mxu1 %vm932_vm2, %v1762_v44 }
 0x35b   :  { %v5297_v26 = vpop.eup %4194  ;;  %v1629_v47 = vmul.f32 1.442695, %v1609_v36  ;;  %v1643_v19 = vmul.f32 1.442695, %v1616_v17  ;;  %2006 = vmatpush.bf16.xpose.msra.mxu1 %v1997_v4 }
 0x35c   :  { %v1726_v3 = vpack.c.bf16 %v5297_v26, %v5297_v26  ;;  %v5304_v45 = vpop.eup %4196 }
 0x35d   :  { %2711 = vrot.lane.b32.xlu2 %v4837_v22, %s4649_s1  ;;  %4198 = vpow2.f32 %v1643_v19  ;;  %6976 = vst [vmem:[#allocation60_spill] sm:$0xff] %v5304_v45  ;;  %v1727_v22 = vpack.c.bf16 %v5304_v45, %v5304_v45 }
 0x35e   :  { %v1574_v16 = vpop.xlane.xlu1 %1573  ;;  %v1836_v27 = vunpack.c.l.b16 %v1726_v3  ;;  %4200 = vpow2.f32 %v1629_v47 }
 0x35f   :  { %v1610_v62 = vsub.f32 %v5183_v9, %v1574_v16  ;;  %v2021_v16 = vsel %vm701_vm1, %v5133_v63, 0 }
 0x360   :  { %v5306_v32 = vpop.permute.xlu2 %2109  ;;  %2687 = vrot.lane.b32.xlu0 %v4828_v57, %s4649_s1  ;;  %v1837_v33 = vpack.c.b16 %v1836_v27, %v1835_v12  ;;  %v1860_v57 = vunpack.c.l.b16 %v1727_v22 }
 0x361   :  { %v1631_v14 = vmul.f32 1.442695, %v1610_v62  ;;  %v5351_v63 = vpop.f32.mrf.mxu3 }
 0x362   :  { %3945 = vmatmul.msk.bf16.vlgmr.msra.gmra.mxu0 %vm932_vm2, %v1837_v33 }
 0x363   :  { %4202 = vpow2.f32 %v1631_v14  ;;  %2078 = vmatpush.bf16.xpose.msra.mxu0 %v2069_v7  ;;  %v5315_v9 = vpop.eup %4198 }
 0x364   :  { %v5317_v49 = vpop.eup %4200  ;;  %v1728_v35 = vpack.c.bf16 %v5315_v9, %v5315_v9 }
 0x365   :  { %6977 = vst [vmem:[#allocation61_spill] sm:$0xff] %v5317_v49  ;;  %2735 = vrot.lane.b32.xlu2 %v4846_v51, %s4649_s1  ;;  %v1721_v43 = vpack.c.bf16 %v5317_v49, %v5317_v49 }
 0x366   :  { %v1861_v2 = vunpack.c.l.b16 %v1728_v35  ;;  %v1653_v35 = vsel %vm932_vm2, %v5249_v52, 0.0 }
 0x367   :  { %v1785_v47 = vunpack.c.l.b16 %v1721_v43 }
 0x368   :  { %v5325_v44 = vpop.permute.xlu2 %2133  ;;  %v1862_v17 = vpack.c.b16 %v1861_v2, %v1860_v57 }
 0x369   :  { %v5327_v36 = vpop.eup %4202 }
 0x36a   :  { %6978 = vst [vmem:[#allocation62_spill] sm:$0xff] %v5327_v36  ;;  %v1722_v4 = vpack.c.bf16 %v5327_v36, %v5327_v36  ;;  %3946 = vmatmul.msk.bf16.vlgmr.msrb.gmra.mxu1 %vm932_vm2, %v1862_v17 }
 0x36b   :  { %2102 = vmatpush.bf16.xpose.msrb.mxu1 %v2093_v40 }
 0x36c   :  { %v1786_v19 = vunpack.c.l.b16 %v1722_v4 }
 0x36d   :  { %2963 = vrot.lane.b32.xlu2 %v4886_v38, %s4649_s1  ;;  %v1599_v38 = vsel %vm932_vm2, %v5341_v54, -inf }
 0x36e   :  { %v1787_v3 = vpack.c.b16 %v1786_v19, %v1785_v47  ;;  %v2045_v47 = vsel %vm701_vm1, %v5223_v50, 0 }
 0x370   :  { %3943 = vmatmul.msk.bf16.vlgmr.msra.gmra.mxu2 %vm932_vm2, %v1787_v3  ;;  %v2339_v12 = vpop.permute.xlu2 %2338 }
 0x371   :  { %2030 = vmatpush.bf16.xpose.msra.mxu2 %v2021_v16 }
 0x372   :  { %3949 = vmatmul.msk.bf16.vlgmr.msrb.gmra.mxu0 %vm701_vm1, %v5126_v1  ;;  %v1602_v1 = vsel %vm932_vm2, %v5351_v63, -inf }
 0x373   :  { %2351 = vmatpush.bf16.msrb.mxu0 %v2339_v12 }
 0x375   :  { %3088 = vrot.lane.b32.xlu2 %v4946_v29, %s4649_s1 }
 0x377   :  { %1600 = vmax.xlane.f32.xlu1 %v1599_v38 }
 0x37a   :  { %3950 = vmatmul.msk.bf16.vlgmr.msra.gmra.mxu1 %vm701_vm1, %v5231_v30 }
 0x37e   :  { %v1595_v27 = vpop.xlane.xlu1 %1594 }
 0x37f   :  { %v1617_v7 = vsub.f32 %v5193_v5, %v1595_v27 }
 0x381   :  { %v1645_v22 = vmul.f32 1.442695, %v1617_v7 }
 0x382   :  { %3953 = vmatmul.msk.bf16.vlgmr.msra.gmra.mxu0 %vm701_vm1, %v5219_v58  ;;  %v1032_v58 = vsel %vm932_vm2, %v4960_v41, 0.0 }
 0x38a   :  { %1603 = vmax.xlane.f32.xlu0 %v1602_v1  ;;  %v2117_v1 = vsel %vm701_vm1, %v5242_v6, 0 }
 0x390   :  { %2135 = vrot.lane.b32.xlu1 %v4846_v51, %s4648_s21 }
 0x397   :  { %v1577_v62 = vpop.xlane.xlu0 %1576 }
 0x398   :  { %v1611_v33 = vsub.f32 %v5213_v60, %v1577_v62  ;;  %2438 = vrot.lane.b32.xlu1 %v4920_v39, %s4648_s21 }
 0x39a   :  { %v1633_v30 = vmul.f32 1.442695, %v1611_v33 }
 0x39c   :  { %4204 = vpow2.f32 %v1633_v30 }
 0x39e   :  { %1033 = vadd.xlane.f32.xlu2 %v1032_v58  ;;  %2685 = vrot.lane.b32.xlu0 %v4832_v8, %s4649_s1 }
 0x39f   :  { %v1580_v14 = vpop.xlane.xlu1 %1579 }
 0x3a0   :  { %v1612_v51 = vsub.f32 %v5225_v59, %v1580_v14  ;;  %2567 = vrot.lane.b32.xlu1 %v4780_v23, %s4649_s1 }
 0x3a2   :  { %v1635_v60 = vmul.f32 1.442695, %v1612_v51  ;;  %v5370_v57 = vpop.eup %4204 }
 0x3a3   :  { %6979 = vst [vmem:[#allocation63_spill] sm:$0xff] %v5370_v57  ;;  %v1723_v23 = vpack.c.bf16 %v5370_v57, %v5370_v57 }
 0x3a4   :  { %4206 = vpow2.f32 %v1635_v60 }
 0x3a5   :  { %4208 = vpow2.f32 %v1645_v22 }
 0x3a6   :  { %1654 = vadd.xlane.f32.xlu2 %v1653_v35  ;;  %2733 = vrot.lane.b32.xlu0 %v4850_v55, %s4649_s1  ;;  %v1810_v55 = vunpack.c.l.b16 %v1723_v23 }
 0x3a7   :  { %v1598_v8 = vpop.xlane.xlu1 %1597 }
 0x3a8   :  { %v1618_v5 = vsub.f32 %v5235_v21, %v1598_v8  ;;  %2488 = vrot.lane.b32.xlu1 %v4946_v29, %s4648_s21  ;;  %v1659_v21 = vsel %vm932_vm2, %v5272_v46, 0.0 }
 0x3aa   :  { %v5379_v59 = vpop.eup %4206  ;;  %v1647_v2 = vmul.f32 1.442695, %v1618_v5  ;;  %v2086_v43 = vpop.permute.xlu0 %2085  ;;  %v1665_v5 = vsel %vm932_vm2, %v5317_v49, 0.0 }
 0x3ab   :  { %6980 = vst [vmem:[#allocation64_spill] sm:$0xff] %v5379_v59  ;;  %v1724_v17 = vpack.c.bf16 %v5379_v59, %v5379_v59  ;;  %3954 = vmatmul.msk.bf16.vlgmr.msrb.gmra.mxu1 %vm701_vm1, %v2086_v43  ;;  %v5386_v40 = vpop.eup %4208  ;;  %v1656_v43 = vsel %vm932_vm2, %v5256_v31, 0.0 }
 0x3ac   :  { %4210 = vpow2.f32 %v1647_v2  ;;  %v1729_v19 = vpack.c.bf16 %v5386_v40, %v5386_v40 }
 0x3ad   :  { %v1811_v4 = vunpack.c.l.b16 %v1724_v17 }
 0x3ae   :  { %1660 = vadd.xlane.f32.xlu2 %v1659_v21  ;;  %2938 = vrot.lane.b32.xlu0 %v4875_v24, %s4649_s1  ;;  %v1885_v24 = vunpack.c.l.b16 %v1729_v19  ;;  %v1674_v21 = vsel %vm932_vm2, %v5379_v59, 0.0  ;;  %v1671_v19 = vsel %vm932_vm2, %v5370_v57, 0.0 }
 0x3af   :  { %v1812_v29 = vpack.c.b16 %v1811_v4, %v1810_v55 }
 0x3b0   :  { %2637 = vrot.lane.b32.xlu1 %v4812_v15, %s4649_s1  ;;  %v1668_v15 = vsel %vm932_vm2, %v5327_v36, 0.0 }
 0x3b1   :  { %3944 = vmatmul.msk.bf16.vlgmr.msrb.gmra.mxu3 %vm932_vm2, %v1812_v29 }
 0x3b2   :  { %v5397_v3 = vpop.eup %4210  ;;  %2054 = vmatpush.bf16.xpose.msrb.mxu3 %v2045_v47  ;;  %v2364_v16 = vpop.permute.xlu0 %2363 }
 0x3b3   :  { %6981 = vst [vmem:[#allocation65_spill] sm:$0xff] %v5397_v3  ;;  %v1730_v12 = vpack.c.bf16 %v5397_v3, %v5397_v3  ;;  %2376 = vmatpush.bf16.msra.mxu1 %v2364_v16 }
 0x3b5   :  { %v1886_v38 = vunpack.c.l.b16 %v1730_v12 }
 0x3b6   :  { %1669 = vadd.xlane.f32.xlu2 %v1668_v15  ;;  %2988 = vrot.lane.b32.xlu0 %v4898_v61, %s4649_s1  ;;  %v2389_v61 = vpop.permute.xlu2 %2388 }
 0x3b7   :  { %v1887_v50 = vpack.c.b16 %v1886_v38, %v1885_v24 }
 0x3b8   :  { %2709 = vrot.lane.b32.xlu1 %v4841_v34, %s4649_s1 }
 0x3b9   :  { %3947 = vmatmul.msk.bf16.vlgmr.msrb.gmra.mxu2 %vm932_vm2, %v1887_v50 }
 0x3ba   :  { %2126 = vmatpush.bf16.xpose.msrb.mxu2 %v2117_v1  ;;  %v2464_v27 = vpop.permute.xlu0 %2463 }
 0x3bb   :  { %2476 = vmatpush.bf16.msrb.mxu1 %v2464_v27 }
 0x3be   :  { %3063 = vrot.lane.b32.xlu0 %v4937_v56, %s4649_s1  ;;  %v5430_v62 = vpop.permute.xlu2 %2565 }
 0x3bf   :  { %v2038_v30 = vpop.permute.xlu1 %2037 }
 0x3c0   :  { %3013 = vrot.lane.b32.xlu1 %v4909_v18, %s4649_s1 }
 0x3c6   :  { %v5440_v14 = vpop.permute.xlu2 %2591 }
 0x3c7   :  { %v5420_v34 = vpop.f32.mrf.mxu0 }
 0x3c8   :  { %3038 = vrot.lane.b32.xlu1 %v4920_v39, %s4649_s1  ;;  %v2414_v39 = vpop.permute.xlu0 %2413 }
 0x3c9   :  { %3951 = vmatmul.msk.bf16.vlgmr.msra.gmra.mxu2 %vm701_vm1, %v5217_v13  ;;  %v1029_v13 = vsel %vm932_vm2, %v4953_v0, 0.0 }
 0x3ca   :  { %2401 = vmatpush.bf16.msra.mxu2 %v2389_v61 }
 0x3ce   :  { %v5450_v35 = vpop.permute.xlu2 %2615 }
 0x3cf   :  { %v5426_v56 = vpop.f32.mrf.mxu0 }
 0x3d0   :  { %3113 = vrot.lane.b32.xlu1 %v5046_v20, %s4649_s1  ;;  %v5438_v58 = vpop.permute.xlu0 %2613 }
 0x3d6   :  { %v5466_v29 = vpop.permute.xlu2 %2589 }
 0x3d7   :  { %v5422_v6 = vpop.f32.mrf.mxu1 }
 0x3d8   :  { %v5448_v22 = vpop.permute.xlu0 %2687 }
 0x3d9   :  { %3955 = vmatmul.msk.bf16.vlgmr.msrb.gmra.mxu2 %vm701_vm1, %v5306_v32  ;;  %v1662_v32 = vsel %vm932_vm2, %v5280_v37, 0.0 }
 0x3de   :  { %v2514_v1 = vpop.permute.xlu2 %2513 }
 0x3df   :  { %v5428_v18 = vpop.f32.mrf.mxu1  ;;  %v5432_v33 = vpop.f32.mrf.mxu0 }
 0x3e7   :  { %v5436_v20 = vpop.f32.mrf.mxu1  ;;  %v5444_v7 = vpop.f32.mrf.mxu0 }
 0x3e8   :  { %6982 = vst [vmem:[#allocation66_spill] sm:$0xff] %v5436_v20  ;;  %1030 = vadd.xlane.f32.xlu0 %v1029_v13 }
 0x3ea   :  { %v1601_v60 = vpop.xlane.xlu1 %1600 }
 0x3eb   :  { %v1619_v8 = vsub.f32 %v5341_v54, %v1601_v60 }
 0x3ed   :  { %v1649_v17 = vmul.f32 1.442695, %v1619_v8 }
 0x3ef   :  { %v5446_v51 = vpop.f32.mrf.mxu1  ;;  %v5461_v55 = vpop.f32.mrf.mxu0  ;;  %4212 = vpow2.f32 %v1649_v17 }
 0x3f0   :  { %6983 = vst [vmem:[#allocation67_spill] sm:$0xff] %v5446_v51  ;;  %1663 = vadd.xlane.f32.xlu0 %v1662_v32 }
 0x3f5   :  { %v5470_v12 = vpop.eup %4212 }
 0x3f6   :  { %6984 = vst [vmem:[#allocation68_spill] sm:$0xff] %v5470_v12 }
 0x3f7   :  { %v5455_v23 = vpop.f32.mrf.mxu1  ;;  %v5472_v24 = vpop.f32.mrf.mxu0 }
 0x3f8   :  { %1666 = vadd.xlane.f32.xlu0 %v1665_v5  ;;  %v2163_v2 = vsel %vm932_vm2, %v5455_v23, -inf  ;;  %v2160_v50 = vsel %vm932_vm2, %v5472_v24, -inf }
 0x3f9   :  { %2164 = vmax.xlane.f32.xlu2 %v2163_v2 }
 0x3fa   :  { %1657 = vadd.xlane.f32.xlu1 %v1656_v43  ;;  %v5490_v43 = vpop.permute.xlu2 %2639 }
 0x3fd   :  { %v1604_v4 = vpop.xlane.xlu0 %1603 }
 0x3fe   :  { %v1620_v54 = vsub.f32 %v5351_v63, %v1604_v4  ;;  %v1731_v63 = vpack.c.bf16 %v5470_v12, %v5470_v12  ;;  %v1683_v12 = vsel %vm932_vm2, %v5304_v45, 0.0 }
 0x3ff   :  { %v5482_v60 = vpop.f32.mrf.mxu0 }
 0x400   :  { %v1651_v47 = vmul.f32 1.442695, %v1620_v54  ;;  %1675 = vadd.xlane.f32.xlu0 %v1674_v21  ;;  %v1910_v61 = vunpack.c.l.b16 %v1731_v63  ;;  %v2181_v5 = vsel %vm932_vm2, %v5482_v60, -inf  ;;  %v5495_v54 = vpop.f32.mrf.mxu1 }
 0x402   :  { %4214 = vpow2.f32 %v1651_v47  ;;  %v2136_v16 = vpop.permute.xlu1 %2135  ;;  %1672 = vadd.xlane.f32.xlu1 %v1671_v19  ;;  %v5492_v4 = vpop.permute.xlu2 %2663 }
 0x403   :  { %v2141_v8 = vsel %vm701_vm1, %v2136_v16, 0  ;;  %v1803_v16 = vpop.f32.mrf.mxu2 }
 0x408   :  { %v5476_v38 = vpop.eup %4214 }
 0x409   :  { %6985 = vst [vmem:[#allocation69_spill] sm:$0xff] %v5476_v38  ;;  %v1732_v15 = vpack.c.bf16 %v5476_v38, %v5476_v38 }
 0x40a   :  { %v2439_v27 = vpop.permute.xlu1 %2438  ;;  %2161 = vmax.xlane.f32.xlu1 %v2160_v50  ;;  %v5497_v21 = vpop.permute.xlu2 %2661 }
 0x40b   :  { %v1911_v13 = vunpack.c.l.b16 %v1732_v15  ;;  %2451 = vmatpush.bf16.msra.mxu0 %v2439_v27  ;;  %v1805_v50 = vpop.f32.mrf.mxu2 }
 0x40d   :  { %v1912_v32 = vpack.c.b16 %v1911_v13, %v1910_v61 }
 0x40f   :  { %3948 = vmatmul.msk.bf16.vlgmr.msra.gmra.mxu3 %vm932_vm2, %v1912_v32 }
 0x410   :  { %2150 = vmatpush.bf16.xpose.msra.mxu3 %v2141_v8  ;;  %v5505_v63 = vpop.permute.xlu0 %2685 }
 0x412   :  { %v5488_v2 = vpop.permute.xlu1 %2567  ;;  %2182 = vmax.xlane.f32.xlu1 %v2181_v5 }
 0x418   :  { %v5513_v27 = vpop.permute.xlu0 %2733 }
 0x419   :  { %6986 = vst [vmem:[#allocation70_spill] sm:$0xff] %v5513_v27 }
 0x41a   :  { %v2489_v17 = vpop.permute.xlu1 %2488 }
 0x41b   :  { %2501 = vmatpush.bf16.msrb.mxu2 %v2489_v17 }
 0x41f   :  { %3952 = vmatmul.msk.bf16.vlgmr.msrb.gmra.mxu3 %vm701_vm1, %v2038_v30  ;;  %v5511_v30 = vpop.permute.xlu2 %2711 }
 0x420   :  { %2426 = vmatpush.bf16.msrb.mxu3 %v2414_v39 }
 0x422   :  { %v5519_v32 = vpop.permute.xlu1 %2637 }
 0x427   :  { %v5515_v61 = vpop.permute.xlu2 %2735 }
 0x428   :  { %v5499_v47 = vpop.f32.mrf.mxu1 }
 0x429   :  { %v2187_v19 = vsel %vm932_vm2, %v5499_v47, -inf }
 0x42a   :  { %2188 = vmax.xlane.f32.xlu2 %v2187_v19  ;;  %v5527_v5 = vpop.permute.xlu1 %2709 }
 0x42f   :  { %3956 = vmatmul.msk.bf16.vlgmr.msra.gmra.mxu3 %vm701_vm1, %v5325_v44  ;;  %v5521_v44 = vpop.permute.xlu0 %2938  ;;  %v5525_v8 = vpop.permute.xlu2 %2963 }
 0x430   :  { %2526 = vmatpush.bf16.msra.mxu3 %v2514_v1  ;;  %v5507_v15 = vpop.f32.mrf.mxu1 }
 0x431   :  { %v2190_v39 = vsel %vm932_vm2, %v5507_v15, -inf }
 0x432   :  { %2191 = vmax.xlane.f32.xlu2 %v2190_v39  ;;  %v5537_v0 = vpop.permute.xlu1 %3013 }
 0x437   :  { %v5533_v39 = vpop.permute.xlu0 %2988  ;;  %v5535_v41 = vpop.permute.xlu2 %3088 }
 0x43a   :  { %v5547_v46 = vpop.permute.xlu1 %3038 }
 0x43c   :  { %v5517_v13 = vpop.f32.mrf.mxu2 }
 0x43d   :  { %6987 = vst [vmem:[#allocation71_spill] sm:$0xff] %v5517_v13 }
 0x43f   :  { %v5543_v37 = vpop.xlane.xlu2 %1033  ;;  %v5545_v57 = vpop.permute.xlu0 %3063 }
 0x440   :  { %6989 = vst [vmem:[#allocation73_spill] sm:$0xff] %v5543_v37 }
 0x442   :  { %v5555_v38 = vpop.permute.xlu1 %3113 }
 0x443   :  { %6991 = vst [vmem:[#allocation75_spill] sm:$0xff] %v5555_v38 }
 0x444   :  { %v5523_v1 = vpop.f32.mrf.mxu2 }
 0x445   :  { %6988 = vst [vmem:[#allocation72_spill] sm:$0xff] %v5523_v1 }
 0x447   :  { %v1655_v52 = vpop.xlane.xlu2 %1654 }
 0x448   :  { %4216 = vrcp.f32 %v1655_v52 }
 0x44c   :  { %v5529_v17 = vpop.f32.mrf.mxu2 }
 0x44d   :  { %v2169_v19 = vsel %vm932_vm2, %v5529_v17, -inf }
 0x44e   :  { %2170 = vmax.xlane.f32.xlu1 %v2169_v19 }
 0x44f   :  { %v5561_v20 = vpop.xlane.xlu2 %1660 }
 0x454   :  { %v5539_v59 = vpop.f32.mrf.mxu2 }
 0x455   :  { %v2172_v49 = vsel %vm932_vm2, %v5539_v59, -inf }
 0x456   :  { %2173 = vmax.xlane.f32.xlu2 %v2172_v49  ;;  %v1038_v49 = vsel %vm932_vm2, %v4982_v25, 0.0 }
 0x457   :  { %v1670_v52 = vpop.xlane.xlu2 %1669 }
 0x45b   :  { %v5553_v36 = vpop.xlane.xlu0 %1030 }
 0x45c   :  { %v5549_v31 = vpop.f32.mrf.mxu2  ;;  %6990 = vst [vmem:[#allocation74_spill] sm:$0xff] %v5553_v36 }
 0x45d   :  { %v2193_v19 = vsel %vm932_vm2, %v5549_v31, -inf }
 0x45e   :  { %2194 = vmax.xlane.f32.xlu2 %v2193_v19  ;;  %v5565_v19 = vpop.eup %4216 }
 0x45f   :  { %6992 = vst [vmem:[#allocation76_spill] sm:$0xff] %v5565_v19  ;;  %v1933_v25 = vmul.f32 %v5565_v19, %v5420_v34 }
 0x463   :  { %v5559_v37 = vpop.xlane.xlu0 %1663 }
 0x466   :  { %1039 = vadd.xlane.f32.xlu2 %v1038_v49 }
 0x46b   :  { %v1667_v1 = vpop.xlane.xlu0 %1666 }
 0x46d   :  { %v1658_v51 = vpop.xlane.xlu1 %1657 }
 0x46e   :  { %4218 = vrcp.f32 %v1658_v51  ;;  %1684 = vadd.xlane.f32.xlu2 %v1683_v12  ;;  %v5578_v12 = vpop.f32.mrf.mxu3 }
 0x46f   :  { %4220 = vrcp.f32 %v1667_v1  ;;  %6996 = vst [vmem:[#allocation80_spill] sm:$0xff] %v5578_v12 }
 0x470   :  { %4222 = vrcp.f32 %v1670_v52 }
 0x474   :  { %v5567_v36 = vpop.eup %4218 }
 0x475   :  { %6993 = vst [vmem:[#allocation77_spill] sm:$0xff] %v5567_v36  ;;  %v1934_v49 = vmul.f32 %v5567_v36, %v5426_v56  ;;  %v5574_v45 = vpop.eup %4220  ;;  %v5593_v52 = vpop.xlane.xlu1 %1672 }
 0x476   :  { %6994 = vst [vmem:[#allocation78_spill] sm:$0xff] %v5574_v45  ;;  %v5576_v51 = vpop.eup %4222  ;;  %v1937_v38 = vmul.f32 %v5574_v45, %v1803_v16  ;;  %v5583_v56 = vpop.f32.mrf.mxu3 }
 0x477   :  { %v4031_v13 = vpack.i.bf16 %v1934_v49, %v1933_v25  ;;  %6995 = vst [vmem:[#allocation79_spill] sm:$0xff] %v5576_v51  ;;  %v1938_v27 = vmul.f32 %v5576_v51, %v1805_v50  ;;  %v2157_v49 = vsel %vm932_vm2, %v5461_v55, -inf  ;;  %v2165_v16 = vpop.xlane.xlu2 %2164  ;;  %v5604_v36 = vpop.f32.mrf.mxu0 }
 0x478   :  { %6997 = vst [vmem:[#allocation81_spill] sm:$0xff] %v5583_v56 }
 0x479   :  { %4032 = vrot.lane.b32.xlu0 %v4031_v13, %s4638_s18  ;;  %v4041_v34 = vpack.i.bf16 %v1938_v27, %v1937_v38  ;;  %v2166_v38 = vsel %vm932_vm2, %v5495_v54, -inf  ;;  %v2207_v27 = vsub.f32 %v5455_v23, %v2165_v16  ;;  %v1692_v23 = vsel %vm932_vm2, %v5397_v3, 0.0 }
 0x47b   :  { %v2225_v51 = vmul.f32 1.442695, %v2207_v27 }
 0x47d   :  { %4224 = vpow2.f32 %v2225_v51 }
 0x47e   :  { %4226 = vrcp.f32 %v5559_v37 }
 0x47f   :  { %4228 = vrcp.f32 %v5561_v20 }
 0x486   :  { %4042 = vrot.lane.b32.xlu2 %v4041_v34, %s4638_s18  ;;  %v1047_v34 = vsel %vm932_vm2, %v5014_v28, 0.0 }
 0x492   :  { %v5585_v1 = vpop.f32.mrf.mxu3 }
 0x493   :  { %6998 = vst [vmem:[#allocation82_spill] sm:$0xff] %v5585_v1 }
 0x49a   :  { %v5587_v25 = vpop.f32.mrf.mxu3 }
 0x49b   :  { %6999 = vst [vmem:[#allocation83_spill] sm:$0xff] %v5587_v25  ;;  %v5624_v25 = vpop.eup %4224 }
 0x49c   :  { %7000 = vst [vmem:[#allocation84_spill] sm:$0xff] %v5624_v25  ;;  %v2259_v51 = vsel %vm932_vm2, %v5624_v25, 0.0  ;;  %v5640_v12 = vpop.eup %4226 }
 0x49d   :  { %v5616_v16 = vpop.xlane.xlu2 %2188  ;;  %v1936_v37 = vmul.f32 %v5640_v12, %v5428_v18 }
 0x4a2   :  { %v5589_v13 = vpop.f32.mrf.mxu3 }
 0x4a3   :  { %2158 = vmax.xlane.f32.xlu0 %v2157_v49  ;;  %v5606_v49 = vpop.xlane.xlu1 %2161 }
 0x4aa   :  { %v5595_v45 = vpop.f32.mrf.mxu3 }
 0x4ab   :  { %2167 = vmax.xlane.f32.xlu0 %v2166_v38  ;;  %v2178_v50 = vsel %vm932_vm2, %v5595_v45, -inf  ;;  %v2184_v38 = vsel %vm932_vm2, %v5604_v36, -inf  ;;  %v5618_v28 = vpop.xlane.xlu1 %2182 }
 0x4ac   :  { %2179 = vmax.xlane.f32.xlu1 %v2178_v50  ;;  %v1677_v50 = vsel %vm932_vm2, %v5286_v48, 0.0 }
 0x4af   :  { %1048 = vadd.xlane.f32.xlu2 %v1047_v34  ;;  %v2175_v34 = vsel %vm932_vm2, %v5589_v13, -inf }
 0x4b2   :  { %v5608_v19 = vpop.f32.mrf.mxu3 }
 0x4b3   :  { %2185 = vmax.xlane.f32.xlu0 %v2184_v38 }
 0x4b4   :  { %1678 = vadd.xlane.f32.xlu1 %v1677_v50  ;;  %v5630_v50 = vpop.f32.mrf.mxu2 }
 0x4b5   :  { %v2196_v1 = vsel %vm932_vm2, %v5630_v50, -inf }
 0x4b7   :  { %1693 = vadd.xlane.f32.xlu2 %v1692_v23  ;;  %v2192_v23 = vpop.xlane.xlu2 %2191 }
 0x4ba   :  { %v5620_v27 = vpop.f32.mrf.mxu3 }
 0x4bb   :  { %2176 = vmax.xlane.f32.xlu0 %v2175_v34  ;;  %v2202_v38 = vsel %vm932_vm2, %v5620_v27, -inf }
 0x4bc   :  { %2203 = vmax.xlane.f32.xlu1 %v2202_v38 }
 0x4bf   :  { %2260 = vadd.xlane.f32.xlu2 %v2259_v51  ;;  %v1035_v51 = vsel %vm932_vm2, %v4973_v11, 0.0  ;;  %v2621_v11 = vsel %vm701_vm1, %v5450_v35, 0  ;;  %v1686_v35 = vsel %vm932_vm2, %v5315_v9, 0.0 }
 0x4c1   :  { %v2171_v3 = vpop.xlane.xlu1 %2170 }
 0x4c2   :  { %v2209_v48 = vsub.f32 %v5529_v17, %v2171_v3  ;;  %v5642_v17 = vpop.eup %4228 }
 0x4c3   :  { %2197 = vmax.xlane.f32.xlu0 %v2196_v1  ;;  %v1935_v20 = vmul.f32 %v5642_v17, %v5422_v6  ;;  %v1680_v6 = vsel %vm932_vm2, %v5297_v26, 0.0 }
 0x4c4   :  { %v2229_v34 = vmul.f32 1.442695, %v2209_v48 }
 0x4c6   :  { %4230 = vpow2.f32 %v2229_v34  ;;  %v4036_v34 = vpack.i.bf16 %v1936_v37, %v1935_v20  ;;  %v1044_v37 = vsel %vm932_vm2, %v4998_v10, 0.0  ;;  %v1050_v20 = vsel %vm932_vm2, %v5021_v42, 0.0 }
 0x4c9   :  { %v2174_v38 = vpop.xlane.xlu2 %2173 }
 0x4ca   :  { %v2210_v56 = vsub.f32 %v5539_v59, %v2174_v38  ;;  %v2199_v59 = vsel %vm932_vm2, %v5608_v19, -inf }
 0x4cb   :  { %1036 = vadd.xlane.f32.xlu0 %v1035_v51 }
 0x4cc   :  { %v2231_v3 = vmul.f32 1.442695, %v2210_v56  ;;  %v5646_v48 = vpop.eup %4230 }
 0x4cd   :  { %v2321_v1 = vpack.c.bf16 %v5646_v48, %v5646_v48 }
 0x4ce   :  { %4232 = vpow2.f32 %v2231_v3 }
 0x4cf   :  { %v2385_v18 = vunpack.c.l.b16 %v2321_v1  ;;  %v2216_v1 = vsub.f32 %v5507_v15, %v2192_v23 }
 0x4d3   :  { %2200 = vmax.xlane.f32.xlu0 %v2199_v59  ;;  %v1041_v59 = vsel %vm932_vm2, %v4993_v53, 0.0 }
 0x4d4   :  { %v5654_v56 = vpop.eup %4232 }
 0x4d5   :  { %7001 = vst [vmem:[#allocation85_spill] sm:$0xff] %v5654_v56  ;;  %v2322_v38 = vpack.c.bf16 %v5654_v56, %v5654_v56  ;;  %4037 = vrot.lane.b32.xlu1 %v4036_v34, %s4638_s18  ;;  %v5671_v34 = vpop.xlane.xlu0 %1675 }
 0x4d7   :  { %v2386_v51 = vunpack.c.l.b16 %v2322_v38 }
 0x4d9   :  { %v2387_v3 = vpack.c.b16 %v2386_v51, %v2385_v18  ;;  %v1689_v18 = vsel %vm932_vm2, %v5386_v40, 0.0  ;;  %v2206_v51 = vsub.f32 %v5472_v24, %v5606_v49  ;;  %v2265_v24 = vsel %vm932_vm2, %v5646_v48, 0.0 }
 0x4da   :  { %v2213_v49 = vsub.f32 %v5482_v60, %v5618_v28 }
 0x4db   :  { %3959 = vmatmul.msk.bf16.vlgmr.msra.gmra.mxu2 %vm932_vm2, %v2387_v3  ;;  %1681 = vadd.xlane.f32.xlu0 %v1680_v6  ;;  %v2223_v15 = vmul.f32 1.442695, %v2206_v51 }
 0x4dc   :  { %2630 = vmatpush.bf16.xpose.msra.mxu2 %v2621_v11  ;;  %v2243_v11 = vmul.f32 1.442695, %v2216_v1  ;;  %v2237_v28 = vmul.f32 1.442695, %v2213_v49 }
 0x4de   :  { %4234 = vpow2.f32 %v2243_v11 }
 0x4df   :  { %4236 = vpow2.f32 %v2223_v15 }
 0x4e3   :  { %1045 = vadd.xlane.f32.xlu0 %v1044_v37 }
 0x4e4   :  { %v5681_v3 = vpop.eup %4234 }
 0x4e5   :  { %7002 = vst [vmem:[#allocation86_spill] sm:$0xff] %v5681_v3  ;;  %v2286_v6 = vsel %vm932_vm2, %v5681_v3, 0.0 }
 0x4eb   :  { %1051 = vadd.xlane.f32.xlu0 %v1050_v20  ;;  %v5675_v38 = vpop.permute.xlu0 %4032 }
 0x4ff   :  { %1042 = vadd.xlane.f32.xlu1 %v1041_v59  ;;  %v5686_v59 = vpop.eup %4236 }
 0x507   :  { %1687 = vadd.xlane.f32.xlu1 %v1686_v35 }
 0x50f   :  { %1690 = vadd.xlane.f32.xlu1 %v1689_v18 }
 0x516   :  { %v2159_v23 = vpop.xlane.xlu0 %2158 }
 0x517   :  { %v2205_v37 = vsub.f32 %v5461_v55, %v2159_v23  ;;  %2287 = vadd.xlane.f32.xlu1 %v2286_v6  ;;  %v2318_v55 = vpack.c.bf16 %v5686_v59, %v5686_v59 }
 0x519   :  { %v2221_v20 = vmul.f32 1.442695, %v2205_v37 }
 0x51b   :  { %4238 = vpow2.f32 %v2221_v20 }
 0x51e   :  { %v2168_v1 = vpop.xlane.xlu0 %2167 }
 0x51f   :  { %v2208_v35 = vsub.f32 %v5495_v54, %v2168_v1  ;;  %v2180_v11 = vpop.xlane.xlu1 %2179  ;;  %2266 = vadd.xlane.f32.xlu1 %v2265_v24  ;;  %v2336_v54 = vunpack.c.l.b16 %v2318_v55  ;;  %v2215_v1 = vsub.f32 %v5499_v47, %v5616_v16 }
 0x520   :  { %v2212_v18 = vsub.f32 %v5595_v45, %v2180_v11  ;;  %v2319_v11 = vpack.c.bf16 %v5624_v25, %v5624_v25  ;;  %v7042_v25 = vld [vmem:[#allocation32_spill] sm:$0xff] }
 0x521   :  { %v5696_v51 = vpop.eup %4238  ;;  %v2227_v15 = vmul.f32 1.442695, %v2208_v35  ;;  %v2573_v35 = vsel %vm701_vm1, %v5488_v2, 0  ;;  %v2241_v47 = vmul.f32 1.442695, %v2215_v1 }
 0x522   :  { %7003 = vst [vmem:[#allocation87_spill] sm:$0xff] %v5696_v51  ;;  %v2235_v23 = vmul.f32 1.442695, %v2212_v18  ;;  %v2253_v6 = vsel %vm932_vm2, %v5696_v51, 0.0  ;;  %v2317_v37 = vpack.c.bf16 %v5696_v51, %v5696_v51  ;;  %v2360_v16 = vunpack.c.l.b16 %v2319_v11  ;;  %v7038_v51 = vld [vmem:[#allocation81_spill] sm:$0xff] }
 0x523   :  { %4240 = vpow2.f32 %v2227_v15  ;;  %2254 = vadd.xlane.f32.xlu0 %v2253_v6 }
 0x524   :  { %4242 = vpow2.f32 %v2235_v23  ;;  %v2335_v60 = vunpack.c.l.b16 %v2317_v37  ;;  %v2195_v23 = vpop.xlane.xlu2 %2194 }
 0x525   :  { %4244 = vpow2.f32 %v2237_v28 }
 0x526   :  { %v2186_v45 = vpop.xlane.xlu0 %2185  ;;  %v2337_v20 = vpack.c.b16 %v2336_v54, %v2335_v60  ;;  %v2217_v54 = vsub.f32 %v5549_v31, %v2195_v23 }
 0x527   :  { %v2214_v24 = vsub.f32 %v5604_v36, %v2186_v45  ;;  %v2256_v36 = vsel %vm932_vm2, %v5686_v59, 0.0  ;;  %v5731_v11 = vpop.xlane.xlu1 %1678 }
 0x528   :  { %3957 = vmatmul.msk.bf16.vlgmr.msrb.gmra.mxu0 %vm932_vm2, %v2337_v20  ;;  %v2597_v20 = vsel %vm701_vm1, %v5440_v14, 0 }
 0x529   :  { %v5710_v49 = vpop.eup %4240  ;;  %v2239_v18 = vmul.f32 1.442695, %v2214_v24  ;;  %2582 = vmatpush.bf16.xpose.msrb.mxu0 %v2573_v35 }
 0x52a   :  { %7004 = vst [vmem:[#allocation88_spill] sm:$0xff] %v5710_v49  ;;  %v5712_v55 = vpop.eup %4242  ;;  %v2320_v15 = vpack.c.bf16 %v5710_v49, %v5710_v49 }
 0x52b   :  { %7005 = vst [vmem:[#allocation89_spill] sm:$0xff] %v5712_v55  ;;  %4246 = vpow2.f32 %v2239_v18  ;;  %2257 = vadd.xlane.f32.xlu0 %v2256_v36  ;;  %v2274_v2 = vsel %vm932_vm2, %v5712_v55, 0.0  ;;  %v5720_v37 = vpop.eup %4244 }
 0x52c   :  { %v2361_v6 = vunpack.c.l.b16 %v2320_v15  ;;  %2275 = vadd.xlane.f32.xlu1 %v2274_v2  ;;  %7006 = vst [vmem:[#allocation90_spill] sm:$0xff] %v5720_v37  ;;  %4248 = vpow2.f32 %v2241_v47  ;;  %v2325_v1 = vpack.c.bf16 %v5720_v37, %v5720_v37  ;;  %v2277_v18 = vsel %vm932_vm2, %v5720_v37, 0.0 }
 0x52d   :  { %v2328_v2 = vpack.c.bf16 %v5681_v3, %v5681_v3 }
 0x52e   :  { %v2177_v28 = vpop.xlane.xlu0 %2176  ;;  %v2362_v60 = vpack.c.b16 %v2361_v6, %v2360_v16  ;;  %v2435_v15 = vunpack.c.l.b16 %v2325_v1 }
 0x52f   :  { %v2211_v45 = vsub.f32 %v5589_v13, %v2177_v28  ;;  %v2245_v13 = vmul.f32 1.442695, %v2217_v54  ;;  %v2669_v28 = vsel %vm701_vm1, %v5492_v4, 0  ;;  %v2324_v54 = vpack.c.bf16 %v5712_v55, %v5712_v55 }
 0x530   :  { %3958 = vmatmul.msk.bf16.vlgmr.msra.gmra.mxu1 %vm932_vm2, %v2362_v60  ;;  %v2461_v1 = vunpack.c.l.b16 %v2328_v2 }
 0x531   :  { %v5729_v24 = vpop.eup %4246  ;;  %v2233_v35 = vmul.f32 1.442695, %v2211_v45  ;;  %2606 = vmatpush.bf16.xpose.msra.mxu1 %v2597_v20 }
 0x532   :  { %7007 = vst [vmem:[#allocation91_spill] sm:$0xff] %v5729_v24  ;;  %v2280_v31 = vsel %vm932_vm2, %v5729_v24, 0.0  ;;  %v2326_v14 = vpack.c.bf16 %v5729_v24, %v5729_v24  ;;  %v5739_v47 = vpop.eup %4248 }
 0x533   :  { %4250 = vpow2.f32 %v2233_v35  ;;  %2278 = vadd.xlane.f32.xlu0 %v2277_v18  ;;  %2281 = vadd.xlane.f32.xlu2 %v2280_v31  ;;  %7008 = vst [vmem:[#allocation92_spill] sm:$0xff] %v5739_v47  ;;  %v2327_v60 = vpack.c.bf16 %v5739_v47, %v5739_v47  ;;  %v2411_v31 = vunpack.c.l.b16 %v2324_v54 }
 0x534   :  { %v2436_v36 = vunpack.c.l.b16 %v2326_v14  ;;  %4252 = vpow2.f32 %v2245_v13  ;;  %v2204_v13 = vpop.xlane.xlu1 %2203 }
 0x535   :  { %v2460_v18 = vunpack.c.l.b16 %v2327_v60 }
 0x536   :  { %v2198_v16 = vpop.xlane.xlu0 %2197  ;;  %v2437_v23 = vpack.c.b16 %v2436_v36, %v2435_v15 }
 0x537   :  { %v2218_v6 = vsub.f32 %v5630_v50, %v2198_v16  ;;  %v2262_v50 = vsel %vm932_vm2, %v5710_v49, 0.0  ;;  %v2462_v16 = vpack.c.b16 %v2461_v1, %v2460_v18 }
 0x538   :  { %3961 = vmatmul.msk.bf16.vlgmr.msra.gmra.mxu0 %vm932_vm2, %v2437_v23  ;;  %v2220_v23 = vsub.f32 %v5620_v27, %v2204_v13 }
 0x539   :  { %v5751_v45 = vpop.eup %4250  ;;  %v2247_v20 = vmul.f32 1.442695, %v2218_v6  ;;  %2678 = vmatpush.bf16.xpose.msra.mxu0 %v2669_v28  ;;  %v2645_v6 = vsel %vm701_vm1, %v5490_v43, 0  ;;  %v2693_v28 = vsel %vm701_vm1, %v5448_v22, 0  ;;  %v2283_v43 = vsel %vm932_vm2, %v5739_v47, 0.0 }
 0x53a   :  { %7009 = vst [vmem:[#allocation93_spill] sm:$0xff] %v5751_v45  ;;  %v2323_v35 = vpack.c.bf16 %v5751_v45, %v5751_v45  ;;  %v2271_v4 = vsel %vm932_vm2, %v5751_v45, 0.0  ;;  %v5759_v15 = vpop.eup %4252 }
 0x53b   :  { %4254 = vpow2.f32 %v2247_v20  ;;  %2263 = vadd.xlane.f32.xlu0 %v2262_v50  ;;  %2272 = vadd.xlane.f32.xlu2 %v2271_v4  ;;  %7010 = vst [vmem:[#allocation94_spill] sm:$0xff] %v5759_v15  ;;  %v2329_v60 = vpack.c.bf16 %v5759_v15, %v5759_v15  ;;  %v2251_v20 = vmul.f32 1.442695, %v2220_v23 }
 0x53c   :  { %v2410_v14 = vunpack.c.l.b16 %v2323_v35 }
 0x53d   :  { %v2485_v1 = vunpack.c.l.b16 %v2329_v60 }
 0x53e   :  { %v1037_v36 = vpop.xlane.xlu0 %1036  ;;  %v2412_v2 = vpack.c.b16 %v2411_v31, %v2410_v14  ;;  %v5780_v31 = vpop.xlane.xlu2 %1039 }
 0x53f   :  { %4256 = vrcp.f32 %v1037_v36  ;;  %v2717_v36 = vsel %vm701_vm1, %v5511_v30, 0  ;;  %v2268_v30 = vsel %vm932_vm2, %v5654_v56, 0.0 }
 0x540   :  { %3960 = vmatmul.msk.bf16.vlgmr.msrb.gmra.mxu3 %vm932_vm2, %v2412_v2  ;;  %3962 = vmatmul.msk.bf16.vlgmr.msrb.gmra.mxu1 %vm932_vm2, %v2462_v16  ;;  %4258 = vpow2.f32 %v2251_v20  ;;  %v7013_v2 = vld [vmem:[#allocation41_spill] sm:$0xff] }
 0x541   :  { %v5770_v54 = vpop.eup %4254  ;;  %2654 = vmatpush.bf16.xpose.msrb.mxu3 %v2645_v6  ;;  %2702 = vmatpush.bf16.xpose.msrb.mxu1 %v2693_v28 }
 0x542   :  { %7011 = vst [vmem:[#allocation95_spill] sm:$0xff] %v5770_v54  ;;  %v2330_v27 = vpack.c.bf16 %v5770_v54, %v5770_v54  ;;  %v2292_v22 = vsel %vm932_vm2, %v5770_v54, 0.0 }
 0x543   :  { %2284 = vadd.xlane.f32.xlu0 %v2283_v43  ;;  %2293 = vadd.xlane.f32.xlu2 %v2292_v22 }
 0x544   :  { %v2486_v35 = vunpack.c.l.b16 %v2330_v27 }
 0x545   :  { %v5778_v50 = vpop.eup %4256 }
 0x546   :  { %7012 = vst [vmem:[#allocation96_spill] sm:$0xff] %v5778_v50  ;;  %v2201_v4 = vpop.xlane.xlu0 %2200  ;;  %v2487_v18 = vpack.c.b16 %v2486_v35, %v2485_v1  ;;  %v1335_v16 = vmul.f32 %v5778_v50, %v7013_v2  ;;  %v5799_v28 = vpop.eup %4258  ;;  %v7016_v2 = vld [vmem:[#allocation48_spill] sm:$0xff] }
 0x547   :  { %v2219_v14 = vsub.f32 %v5608_v19, %v2201_v4  ;;  %v5783_v13 = vpop.permute.xlu1 %4037  ;;  %7014 = vst [vmem:[#allocation41_spill] sm:$0xff] %v5799_v28  ;;  %v5808_v27 = vpop.xlane.xlu2 %1684 }
 0x548   :  { %v4039_v23 = vunpack.i.l.bf16 %v5783_v13  ;;  %3963 = vmatmul.msk.bf16.vlgmr.msrb.gmra.mxu2 %vm932_vm2, %v2487_v18  ;;  %3965 = vmatmul.msk.bf16.vlgmr.msrb.gmra.mxu0 %vm701_vm1, %v5430_v62  ;;  %v2332_v62 = vpack.c.bf16 %v5799_v28, %v5799_v28 }
 0x549   :  { %v2249_v6 = vmul.f32 1.442695, %v2219_v14  ;;  %2726 = vmatpush.bf16.xpose.msrb.mxu2 %v2717_v36  ;;  %2951 = vmatpush.bf16.msrb.mxu0 %v5521_v44  ;;  %v2741_v14 = vsel %vm701_vm1, %v5515_v61, 0 }
 0x54a   :  { %v5795_v19 = vsel %vm701_vm1, %v1335_v16, %v4039_v23  ;;  %v2511_v20 = vunpack.c.l.b16 %v2332_v62 }
 0x54b   :  { %4260 = vpow2.f32 %v2249_v6  ;;  %2269 = vadd.xlane.f32.xlu0 %v2268_v30 }
 0x54c   :  { %4262 = vrcp.f32 %v5731_v11  ;;  %v2289_v11 = vsel %vm932_vm2, %v5759_v15, 0.0 }
 0x54e   :  { %v1682_v60 = vpop.xlane.xlu0 %1681 }
 0x54f   :  { %4264 = vrcp.f32 %v1682_v60 }
 0x550   :  { %3966 = vmatmul.msk.bf16.vlgmr.msra.gmra.mxu1 %vm701_vm1, %v5466_v29 }
 0x551   :  { %v5806_v44 = vpop.eup %4260  ;;  %2976 = vmatpush.bf16.msra.mxu1 %v5525_v8 }
 0x552   :  { %v2331_v43 = vpack.c.bf16 %v5806_v44, %v5806_v44  ;;  %v5815_v22 = vpop.eup %4262 }
 0x553   :  { %2290 = vadd.xlane.f32.xlu0 %v2289_v11  ;;  %v5821_v18 = vmul.f32 %v5815_v22, %v5432_v33  ;;  %v4043_v33 = vpop.permute.xlu2 %4042  ;;  %v7022_v11 = vld [vmem:[#allocation71_spill] sm:$0xff] }
 0x554   :  { %v2510_v1 = vunpack.c.l.b16 %v2331_v43  ;;  %v4045_v61 = vunpack.i.h.bf16 %v4043_v33  ;;  %v4044_v23 = vunpack.i.l.bf16 %v4043_v33 }
 0x555   :  { %v5817_v35 = vpop.eup %4264 }
 0x556   :  { %v1046_v29 = vpop.xlane.xlu0 %1045  ;;  %v2512_v4 = vpack.c.b16 %v2511_v20, %v2510_v1  ;;  %v5825_v8 = vmul.f32 %v5817_v35, %v5444_v7  ;;  %v7023_v1 = vld [vmem:[#allocation72_spill] sm:$0xff] }
 0x557   :  { %4266 = vrcp.f32 %v1046_v29 }
 0x558   :  { %3964 = vmatmul.msk.bf16.vlgmr.msra.gmra.mxu3 %vm932_vm2, %v2512_v4  ;;  %3967 = vmatmul.msk.bf16.vlgmr.msra.gmra.mxu2 %vm701_vm1, %v5438_v58 }
 0x559   :  { %3969 = vmatmul.msk.bf16.vlgmr.msra.gmra.mxu0 %vm701_vm1, %v5497_v21  ;;  %2750 = vmatpush.bf16.xpose.msra.mxu3 %v2741_v14 }
 0x55a   :  { %3001 = vmatpush.bf16.msra.mxu2 %v5533_v39  ;;  %3051 = vmatpush.bf16.msra.mxu0 %v5547_v46 }
 0x55b   :  { %v5854_v21 = vpop.xlane.xlu2 %1048 }
 0x55d   :  { %v5838_v7 = vpop.eup %4266 }
 0x55e   :  { %7015 = vst [vmem:[#allocation97_spill] sm:$0xff] %v5838_v7  ;;  %v1338_v16 = vmul.f32 %v5838_v7, %v7016_v2  ;;  %v5882_v14 = vpop.xlane.xlu0 %1051 }
 0x560   :  { %3970 = vmatmul.msk.bf16.vlgmr.msrb.gmra.mxu1 %vm701_vm1, %v5505_v63  ;;  %v5845_v58 = vsel %vm701_vm1, %v1338_v16, %v4045_v61  ;;  %v7017_v63 = vld [vmem:[#allocation70_spill] sm:$0xff]  ;;  %v2403_v16 = vpop.f32.mrf.mxu2 }
 0x561   :  { %3076 = vmatpush.bf16.msrb.mxu1 %v5545_v57  ;;  %v7019_v57 = vld [vmem:[#allocation75_spill] sm:$0xff] }
 0x568   :  { %3968 = vmatmul.msk.bf16.vlgmr.msrb.gmra.mxu3 %vm701_vm1, %v5519_v32  ;;  %3971 = vmatmul.msk.bf16.vlgmr.msrb.gmra.mxu2 %vm701_vm1, %v5527_v5  ;;  %v7020_v32 = vld [vmem:[#allocation46_spill] sm:$0xff] }
 0x569   :  { %3026 = vmatpush.bf16.msrb.mxu3 %v5537_v0  ;;  %3101 = vmatpush.bf16.msrb.mxu2 %v5535_v41  ;;  %v1694_v41 = vpop.xlane.xlu2 %1693 }
 0x572   :  { %v1043_v46 = vpop.xlane.xlu1 %1042 }
 0x573   :  { %4268 = vrcp.f32 %v1043_v46 }
 0x574   :  { %4270 = vrcp.f32 %v1694_v41 }
 0x578   :  { %3972 = vmatmul.msk.bf16.vlgmr.msra.gmra.mxu3 %vm701_vm1, %v7017_v63 }
 0x579   :  { %v5858_v39 = vpop.eup %4268  ;;  %3126 = vmatpush.bf16.msra.mxu3 %v7019_v57 }
 0x57a   :  { %7018 = vst [vmem:[#allocation48_spill] sm:$0xff] %v5858_v39  ;;  %v1337_v6 = vmul.f32 %v5858_v39, %v7020_v32  ;;  %v5863_v5 = vpop.xlane.xlu1 %1687  ;;  %v5868_v60 = vpop.eup %4270 }
 0x57b   :  { %7021 = vst [vmem:[#allocation70_spill] sm:$0xff] %v5868_v60  ;;  %v5878_v29 = vmul.f32 %v5868_v60, %v7023_v1  ;;  %v2261_v32 = vpop.xlane.xlu2 %2260 }
 0x57c   :  { %v5866_v0 = vsel %vm701_vm1, %v1337_v6, %v4044_v23 }
 0x582   :  { %v1691_v30 = vpop.xlane.xlu1 %1690 }
 0x583   :  { %4272 = vrcp.f32 %v1691_v30 }
 0x589   :  { %v5870_v62 = vpop.eup %4272 }
 0x58a   :  { %v2288_v43 = vpop.xlane.xlu1 %2287  ;;  %v5874_v20 = vmul.f32 %v5870_v62, %v7022_v11 }
 0x592   :  { %v2267_v33 = vpop.xlane.xlu1 %2266 }
 0x593   :  { %4274 = vrcp.f32 %v2267_v33 }
 0x596   :  { %v2255_v61 = vpop.xlane.xlu0 %2254 }
 0x597   :  { %4276 = vrcp.f32 %v2255_v61 }
 0x599   :  { %v5884_v2 = vpop.eup %4274 }
 0x59a   :  { %7024 = vst [vmem:[#allocation75_spill] sm:$0xff] %v5884_v2  ;;  %v5887_v46 = vmul.f32 %v5884_v2, %v2403_v16 }
 0x59d   :  { %v5889_v6 = vpop.eup %4276 }
 0x59e   :  { %v2258_v63 = vpop.xlane.xlu0 %2257  ;;  %7025 = vst [vmem:[#allocation46_spill] sm:$0xff] %v5889_v6 }
 0x59f   :  { %4278 = vrcp.f32 %v2258_v63  ;;  %v2276_v49 = vpop.xlane.xlu1 %2275 }
 0x5a0   :  { %4280 = vrcp.f32 %v2261_v32 }
 0x5a5   :  { %v2353_v57 = vpop.f32.mrf.mxu0  ;;  %v5891_v41 = vpop.eup %4278 }
 0x5a6   :  { %v2279_v23 = vpop.xlane.xlu0 %2278  ;;  %v2533_v1 = vmul.f32 %v5889_v6, %v2353_v57  ;;  %v5896_v61 = vpop.eup %4280 }
 0x5a7   :  { %4282 = vrcp.f32 %v2279_v23  ;;  %7026 = vst [vmem:[#allocation71_spill] sm:$0xff] %v5896_v61  ;;  %v2282_v63 = vpop.xlane.xlu2 %2281 }
 0x5ad   :  { %v2355_v30 = vpop.f32.mrf.mxu0  ;;  %v2378_v11 = vpop.f32.mrf.mxu1 }
 0x5ae   :  { %v2534_v33 = vmul.f32 %v5891_v41, %v2355_v30  ;;  %v2264_v4 = vpop.xlane.xlu0 %2263  ;;  %v5898_v36 = vpop.eup %4282  ;;  %v2535_v23 = vmul.f32 %v5896_v61, %v2378_v11 }
 0x5af   :  { %4284 = vrcp.f32 %v2264_v4  ;;  %7027 = vst [vmem:[#allocation72_spill] sm:$0xff] %v5898_v36  ;;  %v2273_v10 = vpop.xlane.xlu2 %2272 }
 0x5b0   :  { %v4046_v16 = vpack.i.bf16 %v2534_v33, %v2533_v1  ;;  %4286 = vrcp.f32 %v2282_v63 }
 0x5b2   :  { %4047 = vrot.lane.b32.xlu2 %v4046_v16, %s4650_s3 }
 0x5b5   :  { %v2380_v42 = vpop.f32.mrf.mxu1  ;;  %v2453_v39 = vpop.f32.mrf.mxu0 }
 0x5b6   :  { %v5900_v53 = vpop.eup %4284  ;;  %v5903_v57 = vmul.f32 %v5898_v36, %v2453_v39  ;;  %v2285_v32 = vpop.xlane.xlu0 %2284 }
 0x5b7   :  { %7028 = vst [vmem:[#allocation98_spill] sm:$0xff] %v5900_v53  ;;  %v2536_v4 = vmul.f32 %v5900_v53, %v2380_v42  ;;  %v5908_v1 = vpop.eup %4286  ;;  %4288 = vrcp.f32 %v2285_v32  ;;  %v2405_v42 = vpop.f32.mrf.mxu2 }
 0x5b8   :  { %7029 = vst [vmem:[#allocation99_spill] sm:$0xff] %v5908_v1  ;;  %4290 = vrcp.f32 %v2288_v43  ;;  %v2294_v24 = vpop.xlane.xlu2 %2293 }
 0x5b9   :  { %v4051_v30 = vpack.i.bf16 %v2536_v4, %v2535_v23 }
 0x5bb   :  { %4052 = vrot.lane.b32.xlu0 %v4051_v30, %s4650_s3 }
 0x5bd   :  { %v2455_v33 = vpop.f32.mrf.mxu0  ;;  %v2478_v16 = vpop.f32.mrf.mxu1 }
 0x5be   :  { %v5911_v7 = vmul.f32 %v5908_v1, %v2455_v33  ;;  %v2270_v39 = vpop.xlane.xlu0 %2269  ;;  %v5915_v63 = vpop.eup %4288 }
 0x5bf   :  { %4292 = vrcp.f32 %v2270_v39  ;;  %7030 = vst [vmem:[#allocation100_spill] sm:$0xff] %v5915_v63  ;;  %v5917_v23 = vpop.eup %4290  ;;  %v5924_v43 = vmul.f32 %v5915_v63, %v2478_v16 }
 0x5c0   :  { %7031 = vst [vmem:[#allocation101_spill] sm:$0xff] %v5917_v23 }
 0x5c3   :  { %v2428_v53 = vpop.f32.mrf.mxu3 }
 0x5c5   :  { %v5919_v4 = vpop.eup %4292  ;;  %v2480_v32 = vpop.f32.mrf.mxu1 }
 0x5c6   :  { %7032 = vst [vmem:[#allocation102_spill] sm:$0xff] %v5919_v4  ;;  %v5921_v30 = vpop.f32.mrf.mxu0  ;;  %v5927_v33 = vmul.f32 %v5919_v4, %v2405_v42  ;;  %v5930_v39 = vmul.f32 %v5917_v23, %v2480_v32  ;;  %v2291_v15 = vpop.xlane.xlu0 %2290 }
 0x5c7   :  { %v2757_v11 = vsel %vm932_vm2, %v5921_v30, -inf  ;;  %4294 = vrcp.f32 %v2291_v15 }
 0x5c8   :  { %2758 = vmax.xlane.f32.xlu1 %v2757_v11  ;;  %4296 = vrcp.f32 %v2294_v24 }
 0x5c9   :  { %4298 = vrcp.f32 %v5593_v52 }
 0x5ca   :  { %4300 = vrcp.f32 %v2276_v49  ;;  %v7037_v49 = vld [vmem:[#allocation80_spill] sm:$0xff] }
 0x5cb   :  { %v2503_v16 = vpop.f32.mrf.mxu2  ;;  %4302 = vrcp.f32 %v5671_v34 }
 0x5cc   :  { %4304 = vrcp.f32 %v2273_v10 }
 0x5cd   :  { %v5938_v42 = vpop.f32.mrf.mxu1  ;;  %v5940_v45 = vpop.eup %4294  ;;  %4306 = vrcp.f32 %v5780_v31 }
 0x5ce   :  { %7033 = vst [vmem:[#allocation103_spill] sm:$0xff] %v5940_v45  ;;  %v5942_v32 = vpop.eup %4296  ;;  %v5945_v11 = vmul.f32 %v5940_v45, %v2503_v16  ;;  %v5950_v3 = vpop.f32.mrf.mxu0 }
 0x5cf   :  { %7034 = vst [vmem:[#allocation104_spill] sm:$0xff] %v5942_v32  ;;  %v2760_v54 = vsel %vm932_vm2, %v5950_v3, -inf  ;;  %v5980_v37 = vpop.eup %4298 }
 0x5d0   :  { %v5982_v63 = vpop.eup %4300 }
 0x5d1   :  { %7035 = vst [vmem:[#allocation105_spill] sm:$0xff] %v5982_v63 }
 0x5d3   :  { %v2505_v23 = vpop.f32.mrf.mxu2 }
 0x5d4   :  { %v5948_v50 = vmul.f32 %v5942_v32, %v2505_v23 }
 0x5d5   :  { %v5952_v1 = vpop.f32.mrf.mxu1 }
 0x5d6   :  { %v2766_v15 = vsel %vm932_vm2, %v5952_v1, -inf  ;;  %v5964_v45 = vpop.f32.mrf.mxu0 }
 0x5d7   :  { %2767 = vmax.xlane.f32.xlu1 %v2766_v15  ;;  %v2781_v24 = vsel %vm932_vm2, %v5964_v45, -inf  ;;  %v2763_v15 = vsel %vm932_vm2, %v5938_v42, -inf }
 0x5db   :  { %2761 = vmax.xlane.f32.xlu2 %v2760_v54  ;;  %v5966_v32 = vpop.f32.mrf.mxu2 }
 0x5dc   :  { %v2769_v52 = vsel %vm932_vm2, %v5966_v32, -inf }
 0x5dd   :  { %v5960_v16 = vpop.f32.mrf.mxu1 }
 0x5de   :  { %v2787_v23 = vsel %vm932_vm2, %v5960_v16, -inf }
 0x5df   :  { %2788 = vmax.xlane.f32.xlu1 %v2787_v23 }
 0x5e3   :  { %2782 = vmax.xlane.f32.xlu2 %v2781_v24  ;;  %v5977_v23 = vpop.f32.mrf.mxu2  ;;  %v2430_v24 = vpop.f32.mrf.mxu3 }
 0x5e4   :  { %v2540_v47 = vmul.f32 %v5982_v63, %v2430_v24  ;;  %v7039_v24 = vld [vmem:[#allocation68_spill] sm:$0xff] }
 0x5e5   :  { %2764 = vmax.xlane.f32.xlu0 %v2763_v15  ;;  %v5972_v54 = vpop.f32.mrf.mxu1  ;;  %v5984_v15 = vpop.eup %4302  ;;  %v1695_v63 = vsel %vm932_vm2, %v7039_v24, 0.0 }
 0x5e6   :  { %v2790_v36 = vsel %vm932_vm2, %v5972_v54, -inf  ;;  %v5989_v6 = vpop.eup %4304  ;;  %v1940_v4 = vmul.f32 %v5984_v15, %v7038_v51 }
 0x5e7   :  { %7036 = vst [vmem:[#allocation106_spill] sm:$0xff] %v5989_v6  ;;  %v2539_v10 = vmul.f32 %v5989_v6, %v2428_v53 }
 0x5e9   :  { %v4066_v56 = vpack.i.bf16 %v2540_v47, %v2539_v10  ;;  %v6023_v10 = vpop.eup %4306 }
 0x5ea   :  { %7040 = vst [vmem:[#allocation80_spill] sm:$0xff] %v6023_v10 }
 0x5eb   :  { %2791 = vmax.xlane.f32.xlu2 %v2790_v36  ;;  %v1939_v36 = vmul.f32 %v5980_v37, %v7037_v49  ;;  %v5994_v34 = vpop.f32.mrf.mxu2  ;;  %v2298_v49 = vsel %vm932_vm2, %v5799_v28, 0.0  ;;  %v6008_v51 = vpop.f32.mrf.mxu3 }
 0x5ed   :  { %v4056_v55 = vpack.i.bf16 %v1940_v4, %v1939_v36 }
 0x5f3   :  { %2770 = vmax.xlane.f32.xlu2 %v2769_v52  ;;  %v6002_v52 = vpop.f32.mrf.mxu2  ;;  %v6010_v47 = vpop.f32.mrf.mxu3 }
 0x5f4   :  { %v2796_v53 = vsel %vm932_vm2, %v6002_v52, -inf }
 0x5f8   :  { %4067 = vrot.lane.b32.xlu1 %v4066_v56, %s4650_s3  ;;  %v6012_v56 = vpop.f32.mrf.mxu0 }
 0x5f9   :  { %4057 = vrot.lane.b32.xlu0 %v4056_v55, %s4638_s18  ;;  %v2772_v55 = vsel %vm932_vm2, %v5977_v23, -inf }
 0x5fb   :  { %1696 = vadd.xlane.f32.xlu2 %v1695_v63  ;;  %v2784_v63 = vsel %vm932_vm2, %v6012_v56, -inf  ;;  %v6019_v4 = vpop.f32.mrf.mxu3 }
 0x5fc   :  { %v2775_v36 = vsel %vm932_vm2, %v6019_v4, -inf }
 0x603   :  { %2797 = vmax.xlane.f32.xlu2 %v2796_v53  ;;  %v4040_v53 = vunpack.i.h.bf16 %v5783_v13  ;;  %v6038_v13 = vpop.f32.mrf.mxu3 }
 0x60b   :  { %2299 = vadd.xlane.f32.xlu2 %v2298_v49  ;;  %v7041_v49 = vld [vmem:[#allocation43_spill] sm:$0xff] }
 0x60c   :  { %v1336_v28 = vmul.f32 %v6023_v10, %v7041_v49  ;;  %v7043_v49 = vpack.i.bf16 %v5927_v33, %v5887_v46 }
 0x622   :  { %2773 = vmax.xlane.f32.xlu1 %v2772_v55 }
 0x623   :  { %2785 = vmax.xlane.f32.xlu0 %v2784_v63  ;;  %v3618_v63 = vsel %vm701_vm1, %v1336_v28, %v4040_v53  ;;  %v2778_v28 = vsel %vm932_vm2, %v6038_v13, -inf }
 0x62a   :  { %2776 = vmax.xlane.f32.xlu1 %v2775_v36  ;;  %v1056_v36 = vsel %vm932_vm2, %v7042_v25, 0.0 }
 0x62d   :  { %v4053_v55 = vpop.permute.xlu0 %4052 }
 0x62e   :  { %v4055_v6 = vunpack.i.h.bf16 %v4053_v55  ;;  %v4054_v60 = vunpack.i.l.bf16 %v4053_v55  ;;  %v6049_v55 = vpop.permute.xlu2 %4047 }
 0x630   :  { %v6030_v31 = vsel %vm932_vm2, %v3618_v63, %v4055_v6  ;;  %v6034_v61 = vsel %vm932_vm2, %v5795_v19, %v4054_v60 }
 0x632   :  { %1057 = vadd.xlane.f32.xlu1 %v1056_v36 }
 0x637   :  { %4062 = vrot.lane.b32.xlu0 %v7043_v49, %s4650_s3 }
 0x63a   :  { %2779 = vmax.xlane.f32.xlu1 %v2778_v28 }
 0x63b   :  { %v2759_v6 = vpop.xlane.xlu1 %2758 }
 0x63c   :  { %v2805_v53 = vsub.f32 %v5921_v30, %v2759_v6  ;;  %v7045_v30 = vpack.i.bf16 %v5825_v8, %v5821_v18 }
 0x63e   :  { %v2821_v19 = vmul.f32 1.442695, %v2805_v53 }
 0x640   :  { %4308 = vpow2.f32 %v2821_v19 }
 0x641   :  { %4310 = vrcp.f32 %v5863_v5 }
 0x642   :  { %4312 = vrcp.f32 %v5808_v27 }
 0x646   :  { %v6047_v60 = vpop.eup %4308 }
 0x647   :  { %7044 = vst [vmem:[#allocation81_spill] sm:$0xff] %v6047_v60  ;;  %v2853_v63 = vsel %vm932_vm2, %v6047_v60, 0.0  ;;  %v6061_v53 = vpop.eup %4310 }
 0x648   :  { %2854 = vadd.xlane.f32.xlu2 %v2853_v63  ;;  %v6065_v63 = vpop.eup %4312 }
 0x64a   :  { %v2768_v36 = vpop.xlane.xlu1 %2767 }
 0x64b   :  { %v2808_v49 = vsub.f32 %v5952_v1, %v2768_v36  ;;  %v7046_v36 = vld [vmem:[#allocation67_spill] sm:$0xff] }
 0x64c   :  { %v1944_v18 = vmul.f32 %v6061_v53, %v7046_v36 }
 0x64d   :  { %v2827_v6 = vmul.f32 1.442695, %v2808_v49 }
 0x64e   :  { %v2762_v46 = vpop.xlane.xlu2 %2761 }
 0x64f   :  { %v2806_v33 = vsub.f32 %v5950_v3, %v2762_v46  ;;  %v2917_v3 = vpack.c.bf16 %v6047_v60, %v6047_v60 }
 0x651   :  { %v2823_v28 = vmul.f32 1.442695, %v2806_v33  ;;  %v7047_v33 = vld [vmem:[#allocation66_spill] sm:$0xff] }
 0x652   :  { %v1943_v49 = vmul.f32 %v6065_v63, %v7047_v33  ;;  %v2789_v10 = vpop.xlane.xlu1 %2788 }
 0x653   :  { %4314 = vpow2.f32 %v2823_v28  ;;  %4072 = vrot.lane.b32.xlu1 %v7045_v30, %s4638_s18  ;;  %v2935_v28 = vunpack.c.l.b16 %v2917_v3 }
 0x654   :  { %4316 = vpow2.f32 %v2827_v6  ;;  %v4081_v25 = vpack.i.bf16 %v1944_v18, %v1943_v49 }
 0x656   :  { %v6063_v19 = vpop.xlane.xlu2 %2782 }
 0x658   :  { %v2765_v5 = vpop.xlane.xlu0 %2764 }
 0x659   :  { %v6069_v1 = vpop.eup %4314  ;;  %v2807_v27 = vsub.f32 %v5938_v42, %v2765_v5  ;;  %v2793_v5 = vsel %vm932_vm2, %v5994_v34, -inf }
 0x65a   :  { %v2918_v8 = vpack.c.bf16 %v6069_v1, %v6069_v1  ;;  %v6078_v6 = vpop.eup %4316 }
 0x65b   :  { %v2825_v46 = vmul.f32 1.442695, %v2807_v27  ;;  %v2815_v27 = vsub.f32 %v5960_v16, %v2789_v10  ;;  %v2920_v3 = vpack.c.bf16 %v6078_v6, %v6078_v6  ;;  %v7049_v16 = vpack.i.bf16 %v5930_v39, %v5924_v43  ;;  %v7051_v10 = vld [vmem:[#allocation31_spill] sm:$0xff]  ;;  %v7054_v39 = vld [vmem:[#allocation52_spill] sm:$0xff] }
 0x65c   :  { %v2936_v30 = vunpack.c.l.b16 %v2918_v8  ;;  %v1053_v8 = vsel %vm932_vm2, %v7051_v10, 0.0 }
 0x65d   :  { %4318 = vpow2.f32 %v2825_v46 }
 0x65e   :  { %v2792_v60 = vpop.xlane.xlu2 %2791  ;;  %v2937_v2 = vpack.c.b16 %v2936_v30, %v2935_v28  ;;  %4320 = vrcp.f32 %v5854_v21 }
 0x65f   :  { %v2816_v42 = vsub.f32 %v5972_v54, %v2792_v60  ;;  %4322 = vrcp.f32 %v5882_v14  ;;  %v2961_v60 = vunpack.c.l.b16 %v2920_v3 }
 0x660   :  { %4082 = vrot.lane.b32.xlu2 %v4081_v25, %s4638_s18  ;;  %3973 = vmatmul.msk.bf16.vlgmr.msrb.gmra.mxu0 %vm932_vm2, %v2937_v2  ;;  %v2841_v2 = vmul.f32 1.442695, %v2815_v27 }
 0x661   :  { %2794 = vmax.xlane.f32.xlu0 %v2793_v5  ;;  %v2843_v54 = vmul.f32 1.442695, %v2816_v42  ;;  %v7053_v42 = vld [vmem:[#allocation51_spill] sm:$0xff] }
 0x663   :  { %v6089_v36 = vpop.eup %4318  ;;  %4324 = vpow2.f32 %v2843_v54 }
 0x664   :  { %7048 = vst [vmem:[#allocation68_spill] sm:$0xff] %v6089_v36  ;;  %v2919_v25 = vpack.c.bf16 %v6089_v36, %v6089_v36  ;;  %v6098_v21 = vpop.eup %4320  ;;  %4326 = vpow2.f32 %v2841_v2 }
 0x665   :  { %7050 = vst [vmem:[#allocation43_spill] sm:$0xff] %v6098_v21  ;;  %v6102_v14 = vpop.eup %4322  ;;  %v1339_v43 = vmul.f32 %v6098_v21, %v7053_v42 }
 0x666   :  { %v2960_v18 = vunpack.c.l.b16 %v2919_v25  ;;  %7052 = vst [vmem:[#allocation67_spill] sm:$0xff] %v6102_v14  ;;  %v1340_v5 = vmul.f32 %v6102_v14, %v7054_v39  ;;  %v6111_v25 = vpop.f32.mrf.mxu3  ;;  %v7057_v39 = vld [vmem:[#allocation69_spill] sm:$0xff] }
 0x668   :  { %4087 = vrot.lane.b32.xlu2 %v7049_v16, %s4650_s3  ;;  %v2962_v46 = vpack.c.b16 %v2961_v60, %v2960_v18 }
 0x669   :  { %1054 = vadd.xlane.f32.xlu0 %v1053_v8  ;;  %v6109_v54 = vpop.eup %4324 }
 0x66a   :  { %3974 = vmatmul.msk.bf16.vlgmr.msra.gmra.mxu1 %vm932_vm2, %v2962_v46  ;;  %v4068_v33 = vpop.permute.xlu1 %4067  ;;  %7055 = vst [vmem:[#allocation66_spill] sm:$0xff] %v6109_v54  ;;  %v6115_v18 = vpop.eup %4326  ;;  %v2928_v46 = vpack.c.bf16 %v6109_v54, %v6109_v54 }
 0x66b   :  { %v4070_v49 = vunpack.i.h.bf16 %v4068_v33  ;;  %v4069_v28 = vunpack.i.l.bf16 %v4068_v33  ;;  %v4058_v30 = vpop.permute.xlu0 %4057  ;;  %7056 = vst [vmem:[#allocation51_spill] sm:$0xff] %v6115_v18  ;;  %v2799_v33 = vsel %vm932_vm2, %v6111_v25, -inf }
 0x66c   :  { %v4060_v27 = vunpack.i.h.bf16 %v4058_v30  ;;  %v4059_v3 = vunpack.i.l.bf16 %v4058_v30  ;;  %v2927_v30 = vpack.c.bf16 %v6115_v18, %v6115_v18  ;;  %v3061_v42 = vunpack.c.l.b16 %v2928_v46 }
 0x66d   :  { %v2856_v46 = vsel %vm932_vm2, %v6069_v1, 0.0 }
 0x66e   :  { %v3622_v2 = vsel %vm701_vm1, %v1340_v5, %v4060_v27  ;;  %v3621_v60 = vsel %vm701_vm1, %v1339_v43, %v4059_v3  ;;  %v3060_v43 = vunpack.c.l.b16 %v2927_v30  ;;  %v1698_v5 = vsel %vm932_vm2, %v7057_v39, 0.0  ;;  %v6131_v27 = vpop.f32.mrf.mxu3 }
 0x66f   :  { %v6118_v16 = vsel %vm932_vm2, %v3621_v60, %v4069_v28  ;;  %v6121_v8 = vsel %vm932_vm2, %v3622_v2, %v4070_v49  ;;  %v2802_v49 = vsel %vm932_vm2, %v6131_v27, -inf  ;;  %v2295_v3 = vsel %vm932_vm2, %v5806_v44, 0.0  ;;  %v7058_v2 = vld [vmem:[#allocation33_spill] sm:$0xff] }
 0x670   :  { %v3062_v28 = vpack.c.b16 %v3061_v42, %v3060_v43  ;;  %v1059_v60 = vsel %vm932_vm2, %v7058_v2, 0.0  ;;  %v2862_v30 = vsel %vm932_vm2, %v6078_v6, 0.0  ;;  %v2813_v43 = vsub.f32 %v5964_v45, %v6063_v19 }
 0x671   :  { %2800 = vmax.xlane.f32.xlu0 %v2799_v33  ;;  %v2771_v33 = vpop.xlane.xlu2 %2770 }
 0x672   :  { %v2809_v42 = vsub.f32 %v5966_v32, %v2771_v33 }
 0x679   :  { %1699 = vadd.xlane.f32.xlu0 %v1698_v5  ;;  %v2859_v5 = vsel %vm932_vm2, %v6089_v36, 0.0 }
 0x67a   :  { %3978 = vmatmul.msk.bf16.vlgmr.msrb.gmra.mxu1 %vm932_vm2, %v3062_v28  ;;  %v2829_v28 = vmul.f32 1.442695, %v2809_v42  ;;  %v6155_v42 = vpop.xlane.xlu2 %1696 }
 0x67c   :  { %4328 = vpow2.f32 %v2829_v28 }
 0x67d   :  { %2803 = vmax.xlane.f32.xlu1 %v2802_v49  ;;  %v2837_v49 = vmul.f32 1.442695, %v2813_v43 }
 0x67f   :  { %4330 = vpow2.f32 %v2837_v49 }
 0x681   :  { %2296 = vadd.xlane.f32.xlu0 %v2295_v3  ;;  %v2886_v3 = vsel %vm932_vm2, %v6109_v54, 0.0 }
 0x682   :  { %v6153_v19 = vpop.eup %4328  ;;  %v2798_v21 = vpop.xlane.xlu2 %2797 }
 0x683   :  { %7059 = vst [vmem:[#allocation52_spill] sm:$0xff] %v6153_v19  ;;  %v2921_v28 = vpack.c.bf16 %v6153_v19, %v6153_v19 }
 0x685   :  { %1060 = vadd.xlane.f32.xlu1 %v1059_v60  ;;  %v6157_v43 = vpop.eup %4330 }
 0x686   :  { %7060 = vst [vmem:[#allocation69_spill] sm:$0xff] %v6157_v43  ;;  %v2925_v49 = vpack.c.bf16 %v6157_v43, %v6157_v43 }
 0x689   :  { %2857 = vadd.xlane.f32.xlu0 %v2856_v46 }
 0x68d   :  { %2863 = vadd.xlane.f32.xlu1 %v2862_v30 }
 0x691   :  { %2860 = vadd.xlane.f32.xlu2 %v2859_v5  ;;  %v7061_v5 = vpack.i.bf16 %v5911_v7, %v5903_v57 }
 0x695   :  { %v2774_v60 = vpop.xlane.xlu1 %2773  ;;  %2887 = vadd.xlane.f32.xlu1 %v2886_v3 }
 0x696   :  { %v2810_v46 = vsub.f32 %v5977_v23, %v2774_v60  ;;  %v2786_v30 = vpop.xlane.xlu0 %2785 }
 0x697   :  { %v2814_v32 = vsub.f32 %v6012_v56, %v2786_v30 }
 0x698   :  { %v2831_v33 = vmul.f32 1.442695, %v2810_v46 }
 0x699   :  { %v2839_v45 = vmul.f32 1.442695, %v2814_v32  ;;  %v2985_v32 = vunpack.c.l.b16 %v2921_v28  ;;  %v2865_v28 = vsel %vm932_vm2, %v6153_v19, 0.0 }
 0x69a   :  { %4332 = vpow2.f32 %v2831_v33 }
 0x69b   :  { %4334 = vpow2.f32 %v2839_v45  ;;  %v3035_v45 = vunpack.c.l.b16 %v2925_v49 }
 0x69d   :  { %4077 = vrot.lane.b32.xlu0 %v7061_v5, %s4650_s3  ;;  %v2777_v23 = vpop.xlane.xlu1 %2776 }
 0x69e   :  { %v2811_v46 = vsub.f32 %v6019_v4, %v2777_v23  ;;  %v2818_v23 = vsub.f32 %v6002_v52, %v2798_v21 }
 0x6a0   :  { %v6165_v56 = vpop.eup %4332  ;;  %v2833_v2 = vmul.f32 1.442695, %v2811_v46 }
 0x6a1   :  { %7062 = vst [vmem:[#allocation107_spill] sm:$0xff] %v6165_v56  ;;  %v6169_v3 = vpop.eup %4334  ;;  %v2922_v60 = vpack.c.bf16 %v6165_v56, %v6165_v56  ;;  %v2868_v7 = vsel %vm932_vm2, %v6165_v56, 0.0 }
 0x6a2   :  { %7063 = vst [vmem:[#allocation108_spill] sm:$0xff] %v6169_v3  ;;  %v2926_v57 = vpack.c.bf16 %v6169_v3, %v6169_v3  ;;  %2869 = vadd.xlane.f32.xlu1 %v2868_v7  ;;  %v2880_v30 = vsel %vm932_vm2, %v6169_v3, 0.0  ;;  %4336 = vpow2.f32 %v2833_v2 }
 0x6a3   :  { %v2986_v33 = vunpack.c.l.b16 %v2922_v60  ;;  %2881 = vadd.xlane.f32.xlu2 %v2880_v30 }
 0x6a4   :  { %v3036_v5 = vunpack.c.l.b16 %v2926_v57 }
 0x6a5   :  { %v1058_v14 = vpop.xlane.xlu1 %1057  ;;  %v2987_v54 = vpack.c.b16 %v2986_v33, %v2985_v32 }
 0x6a6   :  { %v3037_v4 = vpack.c.b16 %v3036_v5, %v3035_v45 }
 0x6a7   :  { %3975 = vmatmul.msk.bf16.vlgmr.msra.gmra.mxu2 %vm932_vm2, %v2987_v54  ;;  %v2847_v54 = vmul.f32 1.442695, %v2818_v23 }
 0x6a8   :  { %3977 = vmatmul.msk.bf16.vlgmr.msra.gmra.mxu0 %vm932_vm2, %v3037_v4  ;;  %v6194_v21 = vpop.eup %4336  ;;  %v7067_v4 = vld [vmem:[#allocation44_spill] sm:$0xff] }
 0x6a9   :  { %v4063_v7 = vpop.permute.xlu0 %4062  ;;  %4338 = vpow2.f32 %v2847_v54  ;;  %v2871_v57 = vsel %vm932_vm2, %v6194_v21, 0.0 }
 0x6aa   :  { %v4065_v10 = vunpack.i.h.bf16 %v4063_v7  ;;  %v4064_v56 = vunpack.i.l.bf16 %v4063_v7 }
 0x6ab   :  { %2866 = vadd.xlane.f32.xlu2 %v2865_v28  ;;  %v7068_v28 = vld [vmem:[#allocation34_spill] sm:$0xff] }
 0x6ac   :  { %v6187_v49 = vsel %vm932_vm2, %v5845_v58, %v4065_v10  ;;  %v6191_v60 = vsel %vm932_vm2, %v5866_v0, %v4064_v56  ;;  %v2923_v58 = vpack.c.bf16 %v6194_v21, %v6194_v21  ;;  %v1062_v54 = vsel %vm932_vm2, %v7068_v28, 0.0 }
 0x6ad   :  { %v2780_v46 = vpop.xlane.xlu1 %2779 }
 0x6ae   :  { %v2812_v52 = vsub.f32 %v6038_v13, %v2780_v46  ;;  %v3010_v56 = vunpack.c.l.b16 %v2923_v58 }
 0x6af   :  { %v6198_v30 = vpop.eup %4338 }
 0x6b0   :  { %v2835_v2 = vmul.f32 1.442695, %v2812_v52  ;;  %7064 = vst [vmem:[#allocation109_spill] sm:$0xff] %v6198_v30  ;;  %v2892_v13 = vsel %vm932_vm2, %v6198_v30, 0.0 }
 0x6b2   :  { %4340 = vpow2.f32 %v2835_v2 }
 0x6b3   :  { %2872 = vadd.xlane.f32.xlu2 %v2871_v57  ;;  %4342 = vrcp.f32 %v1058_v14  ;;  %v2877_v14 = vsel %vm932_vm2, %v6157_v43, 0.0  ;;  %v2883_v57 = vsel %vm932_vm2, %v6115_v18, 0.0 }
 0x6b8   :  { %v6202_v0 = vpop.eup %4340 }
 0x6b9   :  { %7065 = vst [vmem:[#allocation110_spill] sm:$0xff] %v6202_v0  ;;  %v2924_v10 = vpack.c.bf16 %v6202_v0, %v6202_v0  ;;  %v6209_v45 = vpop.eup %4342 }
 0x6ba   :  { %7066 = vst [vmem:[#allocation111_spill] sm:$0xff] %v6209_v45  ;;  %v1342_v23 = vmul.f32 %v6209_v45, %v7067_v4 }
 0x6bb   :  { %v3011_v32 = vunpack.c.l.b16 %v2924_v10  ;;  %2893 = vadd.xlane.f32.xlu2 %v2892_v13  ;;  %v2930_v13 = vpack.c.bf16 %v6198_v30, %v6198_v30 }
 0x6bd   :  { %v3012_v33 = vpack.c.b16 %v3011_v32, %v3010_v56  ;;  %v2300_v32 = vpop.xlane.xlu2 %2299  ;;  %v3086_v4 = vunpack.c.l.b16 %v2930_v13  ;;  %v2874_v13 = vsel %vm932_vm2, %v6202_v0, 0.0 }
 0x6bf   :  { %3976 = vmatmul.msk.bf16.vlgmr.msrb.gmra.mxu3 %vm932_vm2, %v3012_v33 }
 0x6c5   :  { %v4073_v5 = vpop.permute.xlu1 %4072  ;;  %v2855_v45 = vpop.xlane.xlu2 %2854 }
 0x6c6   :  { %v4075_v7 = vunpack.i.h.bf16 %v4073_v5 }
 0x6c7   :  { %1063 = vadd.xlane.f32.xlu0 %v1062_v54  ;;  %v4074_v54 = vunpack.i.l.bf16 %v4073_v5 }
 0x6c8   :  { %v6216_v46 = vsel %vm701_vm1, %v1342_v23, %v4075_v7 }
 0x6cf   :  { %2878 = vadd.xlane.f32.xlu0 %v2877_v14  ;;  %v7071_v14 = vld [vmem:[#allocation42_spill] sm:$0xff] }
 0x6d4   :  { %v2795_v52 = vpop.xlane.xlu0 %2794 }
 0x6d5   :  { %v2817_v2 = vsub.f32 %v5994_v34, %v2795_v52 }
 0x6d7   :  { %v2845_v58 = vmul.f32 1.442695, %v2817_v2  ;;  %2884 = vadd.xlane.f32.xlu0 %v2883_v57 }
 0x6d9   :  { %4344 = vpow2.f32 %v2845_v58 }
 0x6dc   :  { %v1055_v10 = vpop.xlane.xlu0 %1054 }
 0x6dd   :  { %4346 = vrcp.f32 %v1055_v10 }
 0x6df   :  { %v6225_v56 = vpop.eup %4344 }
 0x6e0   :  { %7069 = vst [vmem:[#allocation44_spill] sm:$0xff] %v6225_v56  ;;  %v2929_v33 = vpack.c.bf16 %v6225_v56, %v6225_v56  ;;  %v2889_v34 = vsel %vm932_vm2, %v6225_v56, 0.0 }
 0x6e1   :  { %2890 = vadd.xlane.f32.xlu1 %v2889_v34 }
 0x6e2   :  { %v3085_v23 = vunpack.c.l.b16 %v2929_v33 }
 0x6e3   :  { %v6231_v7 = vpop.eup %4346 }
 0x6e4   :  { %7070 = vst [vmem:[#allocation112_spill] sm:$0xff] %v6231_v7  ;;  %v1341_v52 = vmul.f32 %v6231_v7, %v7071_v14  ;;  %v2801_v2 = vpop.xlane.xlu0 %2800  ;;  %v3087_v57 = vpack.c.b16 %v3086_v4, %v3085_v23  ;;  %v6249_v23 = vpop.permute.xlu2 %4082 }
 0x6e5   :  { %v2819_v58 = vsub.f32 %v6111_v25, %v2801_v2  ;;  %v4084_v30 = vunpack.i.l.bf16 %v6249_v23 }
 0x6e6   :  { %3979 = vmatmul.msk.bf16.vlgmr.msrb.gmra.mxu2 %vm932_vm2, %v3087_v57  ;;  %v6238_v10 = vsel %vm701_vm1, %v1341_v52, %v4074_v54  ;;  %v7073_v52 = vld [vmem:[#allocation82_spill] sm:$0xff]  ;;  %v7074_v57 = vld [vmem:[#allocation83_spill] sm:$0xff] }
 0x6e7   :  { %v2849_v28 = vmul.f32 1.442695, %v2819_v58 }
 0x6e9   :  { %4348 = vpow2.f32 %v2849_v28  ;;  %2875 = vadd.xlane.f32.xlu1 %v2874_v13 }
 0x6ea   :  { %4350 = vrcp.f32 %v6155_v42 }
 0x6ec   :  { %v1700_v5 = vpop.xlane.xlu0 %1699 }
 0x6ed   :  { %4352 = vrcp.f32 %v1700_v5  ;;  %v2953_v5 = vpop.f32.mrf.mxu0 }
 0x6ee   :  { %4354 = vrcp.f32 %v2300_v32 }
 0x6ef   :  { %v6243_v33 = vpop.eup %4348 }
 0x6f0   :  { %7072 = vst [vmem:[#allocation42_spill] sm:$0xff] %v6243_v33  ;;  %v2804_v34 = vpop.xlane.xlu1 %2803  ;;  %v2895_v25 = vsel %vm932_vm2, %v6243_v33, 0.0  ;;  %v6247_v4 = vpop.eup %4350  ;;  %v2931_v32 = vpack.c.bf16 %v6243_v33, %v6243_v33 }
 0x6f1   :  { %v2820_v54 = vsub.f32 %v6131_v27, %v2804_v34  ;;  %2896 = vadd.xlane.f32.xlu0 %v2895_v25  ;;  %v6256_v2 = vmul.f32 %v6247_v4, %v7073_v52 }
 0x6f2   :  { %v3110_v33 = vunpack.c.l.b16 %v2931_v32 }
 0x6f3   :  { %v6252_v14 = vpop.eup %4352  ;;  %v2851_v28 = vmul.f32 1.442695, %v2820_v54  ;;  %v6270_v54 = vpop.permute.xlu2 %4087 }
 0x6f4   :  { %v2297_v42 = vpop.xlane.xlu0 %2296  ;;  %v6260_v58 = vmul.f32 %v6252_v14, %v7074_v57  ;;  %v6264_v34 = vpop.eup %4354  ;;  %v4089_v56 = vunpack.i.l.bf16 %v6270_v54 }
 0x6f5   :  { %4356 = vpow2.f32 %v2851_v28  ;;  %7075 = vst [vmem:[#allocation82_spill] sm:$0xff] %v6264_v34 }
 0x6f6   :  { %4358 = vrcp.f32 %v2297_v42 }
 0x6f8   :  { %v1061_v27 = vpop.xlane.xlu1 %1060 }
 0x6f9   :  { %4360 = vrcp.f32 %v1061_v27  ;;  %v6280_v27 = vmul.f32 %v6264_v34, %v6010_v47  ;;  %v4090_v34 = vunpack.i.h.bf16 %v6270_v54 }
 0x6fa   :  { %4362 = vrcp.f32 %v2855_v45 }
 0x6fb   :  { %v6268_v25 = vpop.eup %4356 }
 0x6fc   :  { %7076 = vst [vmem:[#allocation83_spill] sm:$0xff] %v6268_v25  ;;  %v6272_v52 = vpop.eup %4358  ;;  %v2932_v28 = vpack.c.bf16 %v6268_v25, %v6268_v25  ;;  %v2858_v42 = vpop.xlane.xlu0 %2857  ;;  %v2898_v57 = vsel %vm932_vm2, %v6268_v25, 0.0  ;;  %v7078_v25 = vld [vmem:[#allocation45_spill] sm:$0xff] }
 0x6fd   :  { %v6284_v13 = vmul.f32 %v6272_v52, %v6008_v51  ;;  %4364 = vrcp.f32 %v2858_v42  ;;  %2899 = vadd.xlane.f32.xlu2 %v2898_v57 }
 0x6fe   :  { %v3111_v7 = vunpack.c.l.b16 %v2932_v28  ;;  %v2955_v28 = vpop.f32.mrf.mxu0 }
 0x6ff   :  { %v6286_v45 = vpop.eup %4360 }
 0x700   :  { %7077 = vst [vmem:[#allocation113_spill] sm:$0xff] %v6286_v45  ;;  %v1343_v18 = vmul.f32 %v6286_v45, %v7078_v25  ;;  %v3112_v47 = vpack.c.b16 %v3111_v7, %v3110_v33  ;;  %v6294_v36 = vpop.eup %4362  ;;  %v2864_v7 = vpop.xlane.xlu1 %2863  ;;  %v7079_v33 = vpack.i.bf16 %v5878_v29, %v5874_v20 }
 0x701   :  { %v3133_v43 = vmul.f32 %v6294_v36, %v2953_v5 }
 0x702   :  { %3980 = vmatmul.msk.bf16.vlgmr.msra.gmra.mxu3 %vm932_vm2, %v3112_v47  ;;  %v3625_v51 = vsel %vm701_vm1, %v1343_v18, %v4084_v30  ;;  %v2978_v47 = vpop.f32.mrf.mxu1 }
 0x703   :  { %v6298_v32 = vpop.eup %4364  ;;  %v6301_v57 = vsel %vm932_vm2, %v3625_v51, %v4089_v56 }
 0x704   :  { %v2861_v42 = vpop.xlane.xlu2 %2860  ;;  %v3134_v25 = vmul.f32 %v6298_v32, %v2955_v28 }
 0x705   :  { %4122 = vrot.lane.b32.xlu0 %v7079_v33, %s4638_s18  ;;  %4366 = vrcp.f32 %v2861_v42 }
 0x706   :  { %v4091_v18 = vpack.i.bf16 %v3134_v25, %v3133_v43  ;;  %4368 = vrcp.f32 %v2864_v7 }
 0x708   :  { %4092 = vrot.lane.b32.xlu1 %v4091_v18, %s4651_s24  ;;  %v2888_v7 = vpop.xlane.xlu1 %2887 }
 0x70a   :  { %v2980_v28 = vpop.f32.mrf.mxu1 }
 0x70b   :  { %v6310_v30 = vpop.eup %4366 }
 0x70c   :  { %7080 = vst [vmem:[#allocation45_spill] sm:$0xff] %v6310_v30  ;;  %v6312_v56 = vpop.eup %4368  ;;  %v3135_v5 = vmul.f32 %v6310_v30, %v2978_v47 }
 0x70d   :  { %v3136_v20 = vmul.f32 %v6312_v56, %v2980_v28 }
 0x70f   :  { %v4078_v51 = vpop.permute.xlu0 %4077  ;;  %v4096_v42 = vpack.i.bf16 %v3136_v20, %v3135_v5 }
 0x710   :  { %v4080_v45 = vunpack.i.h.bf16 %v4078_v51  ;;  %v4079_v0 = vunpack.i.l.bf16 %v4078_v51 }
 0x712   :  { %v6318_v29 = vsel %vm932_vm2, %v6216_v46, %v4080_v45  ;;  %v6322_v43 = vsel %vm932_vm2, %v6238_v10, %v4079_v0 }
 0x715   :  { %4097 = vrot.lane.b32.xlu2 %v4096_v42, %s4651_s24  ;;  %v2870_v33 = vpop.xlane.xlu1 %2869 }
 0x716   :  { %v2882_v25 = vpop.xlane.xlu2 %2881  ;;  %4370 = vrcp.f32 %v2870_v33  ;;  %v4085_v33 = vunpack.i.h.bf16 %v6249_v23 }
 0x71c   :  { %v6325_v51 = vpop.eup %4370 }
 0x71d   :  { %7081 = vst [vmem:[#allocation114_spill] sm:$0xff] %v6325_v51 }
 0x71e   :  { %v2867_v47 = vpop.xlane.xlu2 %2866 }
 0x71f   :  { %4372 = vrcp.f32 %v2867_v47  ;;  %v7084_v47 = vld [vmem:[#allocation47_spill] sm:$0xff] }
 0x725   :  { %v6327_v28 = vpop.eup %4372  ;;  %v3053_v20 = vpop.f32.mrf.mxu0 }
 0x726   :  { %7082 = vst [vmem:[#allocation115_spill] sm:$0xff] %v6327_v28 }
 0x72a   :  { %v3003_v18 = vpop.f32.mrf.mxu2 }
 0x72b   :  { %v3137_v45 = vmul.f32 %v6327_v28, %v3003_v18 }
 0x732   :  { %v3005_v46 = vpop.f32.mrf.mxu2 }
 0x733   :  { %v3138_v0 = vmul.f32 %v6325_v51, %v3005_v46 }
 0x735   :  { %v4111_v10 = vpack.i.bf16 %v3138_v0, %v3137_v45  ;;  %v3078_v45 = vpop.f32.mrf.mxu1  ;;  %v3055_v0 = vpop.f32.mrf.mxu0 }
 0x737   :  { %4112 = vrot.lane.b32.xlu1 %v4111_v10, %s4651_s24 }
 0x73a   :  { %v1064_v5 = vpop.xlane.xlu0 %1063 }
 0x73b   :  { %4374 = vrcp.f32 %v1064_v5 }
 0x73c   :  { %4376 = vrcp.f32 %v2882_v25 }
 0x741   :  { %v6332_v42 = vpop.eup %4374 }
 0x742   :  { %7083 = vst [vmem:[#allocation116_spill] sm:$0xff] %v6332_v42  ;;  %v1344_v30 = vmul.f32 %v6332_v42, %v7084_v47  ;;  %v2879_v3 = vpop.xlane.xlu0 %2878  ;;  %v6342_v10 = vpop.eup %4376 }
 0x743   :  { %4378 = vrcp.f32 %v2879_v3  ;;  %7085 = vst [vmem:[#allocation47_spill] sm:$0xff] %v6342_v10  ;;  %v3142_v23 = vmul.f32 %v6342_v10, %v3055_v0  ;;  %v2873_v0 = vpop.xlane.xlu2 %2872 }
 0x744   :  { %v3626_v18 = vsel %vm701_vm1, %v1344_v30, %v4085_v33  ;;  %4380 = vrcp.f32 %v2888_v7  ;;  %v3080_v30 = vpop.f32.mrf.mxu1 }
 0x745   :  { %v6340_v46 = vsel %vm932_vm2, %v3626_v18, %v4090_v34 }
 0x749   :  { %v6344_v5 = vpop.eup %4378 }
 0x74a   :  { %7086 = vst [vmem:[#allocation117_spill] sm:$0xff] %v6344_v5  ;;  %v3141_v25 = vmul.f32 %v6344_v5, %v3053_v20  ;;  %v2885_v47 = vpop.xlane.xlu0 %2884  ;;  %v6349_v3 = vpop.eup %4380  ;;  %v4003_v5 = vld [vmem:[#allocation13] sm:$0xff] }
 0x74b   :  { %4382 = vrcp.f32 %v2885_v47  ;;  %7087 = vst [vmem:[#allocation118_spill] sm:$0xff] %v6349_v3  ;;  %v3144_v33 = vmul.f32 %v6349_v3, %v3080_v30  ;;  %v3028_v20 = vpop.f32.mrf.mxu3 }
 0x74c   :  { %v4101_v54 = vpack.i.bf16 %v3142_v23, %v3141_v25  ;;  %4384 = vrcp.f32 %v2873_v0  ;;  %v4004_v23 = vld [vmem:[#allocation13 + $0x8] sm:$0xff]  ;;  %v7089_v25 = vld [vmem:[#allocation36_spill] sm:$0xff]  ;;  %v2894_v0 = vpop.xlane.xlu2 %2893 }
 0x74d   :  { %3770 = vmatpush.bf16.msrb.mxu0 %v4004_v23  ;;  %v7092_v23 = vld [vmem:[#allocation73_spill] sm:$0xff] }
 0x74e   :  { %4102 = vrot.lane.b32.xlu2 %v4101_v54, %s4651_s24  ;;  %v1068_v54 = vsel %vm932_vm2, %v7089_v25, 0.0 }
 0x751   :  { %v6351_v34 = vpop.eup %4382  ;;  %3771 = vmatpush.bf16.msrb.mxu0 %v4003_v5 }
 0x752   :  { %7088 = vst [vmem:[#allocation119_spill] sm:$0xff] %v6351_v34  ;;  %v3143_v18 = vmul.f32 %v6351_v34, %v3078_v45  ;;  %v6358_v51 = vpop.eup %4384 }
 0x753   :  { %7090 = vst [vmem:[#allocation120_spill] sm:$0xff] %v6358_v51  ;;  %v3030_v30 = vpop.f32.mrf.mxu3 }
 0x754   :  { %v2891_v42 = vpop.xlane.xlu1 %2890  ;;  %v4106_v7 = vpack.i.bf16 %v3144_v33, %v3143_v18  ;;  %v3139_v33 = vmul.f32 %v6358_v51, %v3028_v20 }
 0x756   :  { %4107 = vrot.lane.b32.xlu2 %v4106_v7, %s4651_s24 }
 0x75c   :  { %v2876_v47 = vpop.xlane.xlu1 %2875 }
 0x75d   :  { %4386 = vrcp.f32 %v2876_v47 }
 0x75e   :  { %4388 = vrcp.f32 %v2894_v0  ;;  %v4034_v0 = vunpack.i.l.bf16 %v5675_v38 }
 0x75f   :  { %4390 = vrcp.f32 %v2891_v42  ;;  %v4035_v42 = vunpack.i.h.bf16 %v5675_v38 }
 0x760   :  { %4392 = vrcp.f32 %v7092_v23  ;;  %v7098_v23 = vld [vmem:[#allocation40_spill] sm:$0xff] }
 0x761   :  { %1069 = vadd.xlane.f32.xlu1 %v1068_v54  ;;  %v7093_v54 = vld [vmem:[#allocation74_spill] sm:$0xff] }
 0x762   :  { %4394 = vrcp.f32 %v7093_v54 }
 0x763   :  { %v6360_v45 = vpop.eup %4386 }
 0x764   :  { %7091 = vst [vmem:[#allocation121_spill] sm:$0xff] %v6360_v45  ;;  %v3140_v18 = vmul.f32 %v6360_v45, %v3030_v30  ;;  %v6367_v25 = vpop.eup %4388  ;;  %v7099_v45 = vld [vmem:[#allocation39_spill] sm:$0xff] }
 0x765   :  { %7094 = vst [vmem:[#allocation73_spill] sm:$0xff] %v6367_v25  ;;  %v6369_v3 = vpop.eup %4390 }
 0x766   :  { %v4116_v7 = vpack.i.bf16 %v3140_v18, %v3139_v33  ;;  %7095 = vst [vmem:[#allocation74_spill] sm:$0xff] %v6369_v3  ;;  %v6373_v33 = vpop.eup %4392 }
 0x767   :  { %7096 = vst [vmem:[#allocation122_spill] sm:$0xff] %v6373_v33  ;;  %v1334_v54 = vmul.f32 %v6373_v33, %v7098_v23 }
 0x768   :  { %4117 = vrot.lane.b32.xlu2 %v4116_v7, %s4651_s24  ;;  %v6375_v7 = vpop.eup %4394 }
 0x769   :  { %v3103_v47 = vpop.f32.mrf.mxu2  ;;  %7097 = vst [vmem:[#allocation123_spill] sm:$0xff] %v6375_v7  ;;  %v1333_v10 = vmul.f32 %v6375_v7, %v7099_v45 }
 0x76a   :  { %v3145_v20 = vmul.f32 %v6369_v3, %v3103_v47  ;;  %v4050_v47 = vunpack.i.h.bf16 %v6049_v55  ;;  %v3616_v3 = vsel %vm701_vm1, %v1334_v54, %v4035_v42 }
 0x76b   :  { %v3615_v38 = vsel %vm701_vm1, %v1333_v10, %v4034_v0 }
 0x76c   :  { %v3632_v42 = vsel %vm932_vm2, %v3616_v3, %v4050_v47  ;;  %v7102_v3 = vld [vmem:[#allocation38_spill] sm:$0xff]  ;;  %v7103_v47 = vld [vmem:[#allocation37_spill] sm:$0xff] }
 0x770   :  { %v2900_v5 = vpop.xlane.xlu2 %2899 }
 0x771   :  { %v3105_v34 = vpop.f32.mrf.mxu2  ;;  %4396 = vrcp.f32 %v2900_v5 }
 0x772   :  { %v3146_v30 = vmul.f32 %v6367_v25, %v3105_v34  ;;  %v4049_v34 = vunpack.i.l.bf16 %v6049_v55 }
 0x774   :  { %v4131_v18 = vpack.i.bf16 %v3146_v30, %v3145_v20 }
 0x776   :  { %4132 = vrot.lane.b32.xlu0 %v4131_v18, %s4651_s24  ;;  %v7100_v18 = vpack.i.bf16 %v5948_v50, %v5945_v11 }
 0x778   :  { %v4098_v20 = vpop.permute.xlu2 %4097 }
 0x779   :  { %v4100_v30 = vunpack.i.h.bf16 %v4098_v20  ;;  %v4099_v25 = vunpack.i.l.bf16 %v4098_v20  ;;  %v3631_v20 = vsel %vm932_vm2, %v3615_v38, %v4049_v34 }
 0x77a   :  { %v4093_v28 = vpop.permute.xlu1 %4092  ;;  %4127 = vrot.lane.b32.xlu1 %v7100_v18, %s4650_s3 }
 0x77b   :  { %v3650_v45 = vsel %vm3647_vm3, %v6034_v61, %v4099_v25  ;;  %v3651_v55 = vsel %vm3647_vm3, %v6030_v31, %v4100_v30  ;;  %v4095_v23 = vunpack.i.h.bf16 %v4093_v28  ;;  %v4094_v33 = vunpack.i.l.bf16 %v4093_v28  ;;  %v7101_v28 = vld [vmem:[#allocation35_spill] sm:$0xff] }
 0x77c   :  { %v3666_v54 = vpack.c.bf16 %v3650_v45, %v3650_v45  ;;  %v3667_v10 = vpack.c.bf16 %v3651_v55, %v3651_v55  ;;  %v1065_v34 = vsel %vm932_vm2, %v7101_v28, 0.0  ;;  %v1074_v30 = vsel %vm932_vm2, %v7103_v47, 0.0 }
 0x77d   :  { %v3648_v0 = vsel %vm3647_vm3, %v3631_v20, %v4094_v33  ;;  %v3649_v7 = vsel %vm3647_vm3, %v3632_v42, %v4095_v23  ;;  %v1071_v33 = vsel %vm932_vm2, %v7102_v3, 0.0  ;;  %v7104_v55 = vpack.i.bf16 %v6260_v58, %v6256_v2  ;;  %v2897_v42 = vpop.xlane.xlu0 %2896 }
 0x77e   :  { %v3706_v50 = vunpack.c.l.b16 %v3666_v54  ;;  %v3707_v11 = vunpack.c.l.b16 %v3667_v10  ;;  %v3664_v18 = vpack.c.bf16 %v3648_v0, %v3648_v0  ;;  %v3665_v19 = vpack.c.bf16 %v3649_v7, %v3649_v7 }
 0x77f   :  { %4398 = vrcp.f32 %v2897_v42 }
 0x780   :  { %v3704_v61 = vunpack.c.l.b16 %v3664_v18  ;;  %v3705_v25 = vunpack.c.l.b16 %v3665_v19  ;;  %v3721_v51 = vpack.c.b16 %v3707_v11, %v3706_v50 }
 0x782   :  { %v3720_v31 = vpack.c.b16 %v3705_v25, %v3704_v61 }
 0x784   :  { %3989 = vmatmul.msk.bf16.vlgmr.msrb.gmra.mxu0 %vm231_vm0, %v3720_v31 }
 0x785   :  { %v3128_v7 = vpop.f32.mrf.mxu3 }
 0x78d   :  { %v3130_v31 = vpop.f32.mrf.mxu3 }
 0x791   :  { %1066 = vadd.xlane.f32.xlu2 %v1065_v34 }
 0x794   :  { %3990 = vmatmul.msk.bf16.gmra.mxu0 %vm231_vm0, %v3721_v51 }
 0x7a0   :  { %1072 = vadd.xlane.f32.xlu0 %v1071_v33  ;;  %v6426_v33 = vpop.eup %4396 }
 0x7a1   :  { %v6440_v42 = vpop.eup %4398 }
 0x7a4   :  { %1075 = vadd.xlane.f32.xlu1 %v1074_v30 }
 0x7a8   :  { %v4103_v19 = vpop.permute.xlu2 %4102 }
 0x7a9   :  { %v4105_v38 = vunpack.i.h.bf16 %v4103_v19  ;;  %v4104_v45 = vunpack.i.l.bf16 %v4103_v19  ;;  %4137 = vrot.lane.b32.xlu2 %v7104_v55, %s4638_s18  ;;  %v4113_v23 = vpop.permute.xlu1 %4112 }
 0x7aa   :  { %v4115_v20 = vunpack.i.h.bf16 %v4113_v23  ;;  %v4114_v51 = vunpack.i.l.bf16 %v4113_v23  ;;  %v3148_v23 = vmul.f32 %v6426_v33, %v3130_v31 }
 0x7ab   :  { %v3656_v54 = vsel %vm3647_vm3, %v6322_v43, %v4104_v45  ;;  %v3657_v10 = vsel %vm3647_vm3, %v6318_v29, %v4105_v38  ;;  %v7106_v38 = vld [vmem:[#allocation55_spill] sm:$0xff]  ;;  %v7107_v45 = vld [vmem:[#allocation76_spill] sm:$0xff] }
 0x7ac   :  { %v3672_v0 = vpack.c.bf16 %v3656_v54, %v3656_v54  ;;  %v3673_v50 = vpack.c.bf16 %v3657_v10, %v3657_v10  ;;  %v3652_v11 = vsel %vm3647_vm3, %v6191_v60, %v4114_v51  ;;  %v3653_v2 = vsel %vm3647_vm3, %v6187_v49, %v4115_v20 }
 0x7ad   :  { %v3668_v58 = vpack.c.bf16 %v3652_v11, %v3652_v11  ;;  %v3669_v18 = vpack.c.bf16 %v3653_v2, %v3653_v2  ;;  %v7105_v49 = vpack.i.bf16 %v6280_v27, %v6284_v13  ;;  %v1949_v55 = vmul.f32 %v7107_v45, %v7106_v38  ;;  %v7109_v2 = vld [vmem:[#allocation79_spill] sm:$0xff] }
 0x7ae   :  { %v6420_v61 = vunpack.c.l.b16 %v3672_v0  ;;  %v6422_v5 = vunpack.c.l.b16 %v3673_v50  ;;  %v3147_v13 = vmul.f32 %v6440_v42, %v3128_v7 }
 0x7af   :  { %v3708_v25 = vunpack.c.l.b16 %v3668_v58  ;;  %v3709_v43 = vunpack.c.l.b16 %v3669_v18  ;;  %v7111_v18 = vld [vmem:[#allocation77_spill] sm:$0xff] }
 0x7b0   :  { %v4108_v34 = vpop.permute.xlu2 %4107  ;;  %v3724_v29 = vpack.c.b16 %v6422_v5, %v6420_v61  ;;  %v4146_v50 = vpack.i.bf16 %v3148_v23, %v3147_v13  ;;  %v7112_v5 = vld [vmem:[#allocation57_spill] sm:$0xff]  ;;  %v1964_v13 = vmul.f32 %v6252_v14, %v7057_v39  ;;  %v7124_v14 = vld [vmem:[#allocation70_spill] sm:$0xff] }
 0x7b1   :  { %v4110_v60 = vunpack.i.h.bf16 %v4108_v34  ;;  %v4109_v30 = vunpack.i.l.bf16 %v4108_v34  ;;  %4142 = vrot.lane.b32.xlu2 %v7105_v49, %s4650_s3  ;;  %v3722_v19 = vpack.c.b16 %v3709_v43, %v3708_v25  ;;  %v1951_v25 = vmul.f32 %v5642_v17, %v7112_v5  ;;  %v7113_v43 = vld [vmem:[#allocation59_spill] sm:$0xff]  ;;  %v7123_v39 = vld [vmem:[#allocation65_spill] sm:$0xff] }
 0x7b2   :  { %v1957_v31 = vmul.f32 %v5815_v22, %v7113_v43 }
 0x7b3   :  { %v3659_v20 = vsel %vm3647_vm3, %v6340_v46, %v4110_v60  ;;  %v3658_v51 = vsel %vm3647_vm3, %v6301_v57, %v4109_v30  ;;  %3991 = vmatmul.msk.bf16.gmra.mxu0 %vm231_vm0, %v3722_v19  ;;  %v7108_v46 = vld [vmem:[#allocation62_spill] sm:$0xff]  ;;  %v7110_v57 = vld [vmem:[#allocation56_spill] sm:$0xff]  ;;  %v7114_v30 = vld [vmem:[#allocation63_spill] sm:$0xff] }
 0x7b4   :  { %v3675_v54 = vpack.c.bf16 %v3659_v20, %v3659_v20  ;;  %v3674_v10 = vpack.c.bf16 %v3658_v51, %v3658_v51  ;;  %3181 = vrot.lane.b32.xlu0 %v1949_v55, %s4650_s3  ;;  %v1954_v58 = vmul.f32 %v7109_v2, %v7108_v46  ;;  %v1950_v61 = vmul.f32 %v7111_v18, %v7110_v57  ;;  %v7115_v55 = vld [vmem:[#allocation58_spill] sm:$0xff]  ;;  %v7131_v18 = vld [vmem:[#allocation92_spill] sm:$0xff] }
 0x7b5   :  { %v1955_v49 = vmul.f32 %v5980_v37, %v7114_v30  ;;  %v1952_v22 = vmul.f32 %v5640_v12, %v7115_v55  ;;  %v1960_v37 = vmul.f32 %v6061_v53, %v5315_v9  ;;  %v1961_v9 = vmul.f32 %v5870_v62, %v5386_v40  ;;  %v7119_v40 = vld [vmem:[#allocation60_spill] sm:$0xff]  ;;  %v7128_v46 = vld [vmem:[#allocation102_spill] sm:$0xff]  ;;  %v7137_v30 = vld [vmem:[#allocation95_spill] sm:$0xff] }
 0x7b6   :  { %v3715_v27 = vunpack.c.l.b16 %v3675_v54  ;;  %v3714_v0 = vunpack.c.l.b16 %v3674_v10  ;;  %v7117_v54 = vld [vmem:[#allocation78_spill] sm:$0xff]  ;;  %v1963_v10 = vmul.f32 %v6247_v4, %v7039_v24  ;;  %v2550_v53 = vmul.f32 %v5891_v41, %v5686_v59  ;;  %v7121_v4 = vld [vmem:[#allocation84_spill] sm:$0xff]  ;;  %v7122_v59 = vld [vmem:[#allocation71_spill] sm:$0xff] }
 0x7b7   :  { %v1959_v62 = vmul.f32 %v6065_v63, %v7119_v40  ;;  %v2551_v41 = vmul.f32 %v7122_v59, %v7121_v4  ;;  %v6533_v55 = vld [vmem:[%s6829_s7] ss:$0 sm:$0xff]  ;;  %s4653_s7 = smov 48  }
 0x7b8   :  { %v3725_v11 = vpack.c.b16 %v3715_v27, %v3714_v0  ;;  %v7125_v27 = vld [vmem:[#allocation89_spill] sm:$0xff] }
 0x7b9   :  { %4147 = vrot.lane.b32.xlu2 %v4146_v50, %s4651_s24  ;;  %v7126_v0 = vld [vmem:[#allocation105_spill] sm:$0xff] }
 0x7ba   :  { %v2556_v63 = vmul.f32 %v7126_v0, %v7125_v27  ;;  %v7127_v50 = vld [vmem:[#allocation85_spill] sm:$0xff] }
 0x7bb   :  { %v2554_v2 = vmul.f32 %v7128_v46, %v7127_v50 }
 0x7bc   :  { %3191 = vrot.lane.b32.xlu0 %v1954_v58, %s4650_s3  ;;  %v7130_v58 = vld [vmem:[#allocation46_spill] sm:$0xff] }
 0x7bd   :  { %3183 = vrot.lane.b32.xlu1 %v1950_v61, %s4650_s3  ;;  %v7132_v61 = vld [vmem:[#allocation100_spill] sm:$0xff] }
 0x7be   :  { %v2559_v5 = vmul.f32 %v7132_v61, %v7131_v18 }
 0x7c1   :  { %3185 = vrot.lane.b32.xlu2 %v1951_v25, %s4650_s3  ;;  %v7133_v25 = vld [vmem:[#allocation90_spill] sm:$0xff] }
 0x7c2   :  { %v4118_v7 = vpop.permute.xlu2 %4117 }
 0x7c3   :  { %v4120_v34 = vunpack.i.h.bf16 %v4118_v7  ;;  %v4119_v60 = vunpack.i.l.bf16 %v4118_v7  ;;  %v7134_v7 = vld [vmem:[#allocation72_spill] sm:$0xff] }
 0x7c4   :  { %3197 = vrot.lane.b32.xlu0 %v1957_v31, %s4650_s3  ;;  %v2557_v43 = vmul.f32 %v7134_v7, %v7133_v25  ;;  %v7135_v31 = vld [vmem:[#allocation88_spill] sm:$0xff] }
 0x7c5   :  { %v3654_v19 = vsel %vm3647_vm3, %v6118_v16, %v4119_v60  ;;  %v3655_v38 = vsel %vm3647_vm3, %v6121_v8, %v4120_v34  ;;  %3193 = vrot.lane.b32.xlu1 %v1955_v49, %s4650_s3  ;;  %v1958_v16 = vmul.f32 %v5817_v35, %v5297_v26  ;;  %v7116_v8 = vld [vmem:[#allocation61_spill] sm:$0xff]  ;;  %v7118_v26 = vld [vmem:[#allocation64_spill] sm:$0xff]  ;;  %v7136_v34 = vld [vmem:[#allocation98_spill] sm:$0xff] }
 0x7c6   :  { %v3670_v17 = vpack.c.bf16 %v3654_v19, %v3654_v19  ;;  %v3671_v45 = vpack.c.bf16 %v3655_v38, %v3655_v38  ;;  %v1953_v12 = vmul.f32 %v7117_v54, %v7116_v8  ;;  %v1956_v35 = vmul.f32 %v5984_v15, %v7118_v26  ;;  %v7120_v15 = vld [vmem:[#allocation75_spill] sm:$0xff]  ;;  %v7138_v49 = vld [vmem:[#allocation104_spill] sm:$0xff]  ;;  %v7139_v38 = vld [vmem:[#allocation86_spill] sm:$0xff] }
 0x7c7   :  { %v2553_v24 = vmul.f32 %v7120_v15, %v5646_v48  ;;  %v7129_v48 = vld [vmem:[#allocation87_spill] sm:$0xff]  ;;  %v2562_v19 = vmul.f32 %v7138_v49, %v7137_v30  ;;  %v7144_v26 = vld [vmem:[#allocation50_spill] sm:$0xff]  ;;  %v7150_v7 = vld [vmem:[#allocation120_spill] sm:$0xff] }
 0x7c8   :  { %v3710_v23 = vunpack.c.l.b16 %v3670_v17  ;;  %v3711_v20 = vunpack.c.l.b16 %v3671_v45  ;;  %v2549_v57 = vmul.f32 %v7130_v58, %v7129_v48  ;;  %v7140_v17 = vld [vmem:[#allocation101_spill] sm:$0xff]  ;;  %v7145_v15 = vld [vmem:[#allocation91_spill] sm:$0xff]  ;;  %v7148_v58 = vld [vmem:[#allocation94_spill] sm:$0xff] }
 0x7c9   :  { %3187 = vrot.lane.b32.xlu2 %v1952_v22, %s4650_s3  ;;  %v2560_v45 = vmul.f32 %v7140_v17, %v7139_v38  ;;  %v4123_v22 = vpop.permute.xlu0 %4122 }
 0x7ca   :  { %v3723_v51 = vpack.c.b16 %v3711_v20, %v3710_v23  ;;  %v7141_v23 = vld [vmem:[#allocation93_spill] sm:$0xff]  ;;  %v7142_v20 = vld [vmem:[#allocation106_spill] sm:$0xff]  ;;  %v4125_v40 = vunpack.i.h.bf16 %v4123_v22  ;;  %v4124_v27 = vunpack.i.l.bf16 %v4123_v22 }
 0x7cc   :  { %3203 = vrot.lane.b32.xlu0 %v1960_v37, %s4650_s3  ;;  %3992 = vmatmul.msk.bf16.gmra.mxu0 %vm231_vm0, %v3723_v51  ;;  %v2555_v37 = vmul.f32 %v7142_v20, %v7141_v23 }
 0x7cd   :  { %3199 = vrot.lane.b32.xlu1 %v1958_v16, %s4650_s3 }
 0x7d1   :  { %3189 = vrot.lane.b32.xlu2 %v1953_v12, %s4650_s3  ;;  %v7143_v12 = vld [vmem:[#allocation81_spill] sm:$0xff] }
 0x7d4   :  { %3209 = vrot.lane.b32.xlu0 %v1963_v10, %s4650_s3  ;;  %v1070_v60 = vpop.xlane.xlu1 %1069  ;;  %v3149_v10 = vmul.f32 %v6294_v36, %v7143_v12  ;;  %v7146_v36 = vld [vmem:[#allocation99_spill] sm:$0xff] }
 0x7d5   :  { %3205 = vrot.lane.b32.xlu1 %v1961_v9, %s4650_s3  ;;  %4400 = vrcp.f32 %v1070_v60  ;;  %v2563_v9 = vmul.f32 %v6272_v52, %v5806_v44  ;;  %v7152_v60 = vld [vmem:[#allocation115_spill] sm:$0xff] }
 0x7d9   :  { %3195 = vrot.lane.b32.xlu2 %v1956_v35, %s4650_s3 }
 0x7db   :  { %v6537_v51 = vpop.eup %4400 }
 0x7dc   :  { %3247 = vrot.lane.b32.xlu0 %v2550_v53, %s4652_s25  ;;  %3993 = vmatmul.msk.bf16.gmra.mxu0 %vm231_vm0, %v3724_v29  ;;  %v1962_v29 = vmul.f32 %v7124_v14, %v7123_v39  ;;  %v1346_v35 = vmul.f32 %v6537_v51, %v7144_v26  ;;  %v3152_v39 = vmul.f32 %v6312_v56, %v6078_v6  ;;  %v7158_v26 = vld [vmem:[#allocation110_spill] sm:$0xff] }
 0x7dd   :  { %3211 = vrot.lane.b32.xlu1 %v1964_v13, %s4650_s3 }
 0x7de   :  { %v3628_v44 = vsel %vm701_vm1, %v1346_v35, %v4125_v40  ;;  %v7159_v35 = vld [vmem:[#allocation121_spill] sm:$0xff] }
 0x7e1   :  { %3201 = vrot.lane.b32.xlu2 %v1959_v62, %s4650_s3 }
 0x7e4   :  { %3253 = vrot.lane.b32.xlu0 %v2553_v24, %s4652_s25  ;;  %v2558_v24 = vmul.f32 %v7146_v36, %v7145_v15 }
 0x7e5   :  { %3249 = vrot.lane.b32.xlu1 %v2551_v41, %s4652_s25 }
 0x7e8   :  { %v4133_v62 = vpop.permute.xlu0 %4132 }
 0x7e9   :  { %3207 = vrot.lane.b32.xlu2 %v1962_v29, %s4650_s3  ;;  %v4135_v59 = vunpack.i.h.bf16 %v4133_v62  ;;  %v3150_v29 = vmul.f32 %v6298_v32, %v6069_v1  ;;  %v4134_v6 = vunpack.i.l.bf16 %v4133_v62  ;;  %v7149_v1 = vld [vmem:[#allocation103_spill] sm:$0xff] }
 0x7ea   :  { %v2561_v32 = vmul.f32 %v7149_v1, %v7148_v58  ;;  %v7165_v58 = vld [vmem:[#allocation25_spill] sm:$0xff]  ;;  %v7166_v1 = vld [vmem:[#allocation96_spill] sm:$0xff] }
 0x7ec   :  { %3259 = vrot.lane.b32.xlu0 %v2556_v63, %s4652_s25  ;;  %3994 = vmatmul.msk.bf16.gmra.mxu0 %vm231_vm0, %v3725_v11  ;;  %v2552_v11 = vmul.f32 %v7136_v34, %v7135_v31  ;;  %v4128_v8 = vpop.permute.xlu1 %4127  ;;  %v7147_v63 = vld [vmem:[#allocation49_spill] sm:$0xff] }
 0x7ed   :  { %3255 = vrot.lane.b32.xlu1 %v2554_v2, %s4652_s25  ;;  %v4130_v13 = vunpack.i.h.bf16 %v4128_v8  ;;  %v4129_v2 = vunpack.i.l.bf16 %v4128_v8  ;;  %v7156_v8 = vld [vmem:[#allocation47_spill] sm:$0xff] }
 0x7ef   :  { %v3644_v52 = vsel %vm932_vm2, %v3628_v44, %v4130_v13 }
 0x7f0   :  { %v3661_v0 = vsel %vm3647_vm3, %v3644_v52, %v4135_v59  ;;  %v7160_v52 = vld [vmem:[#allocation54_spill] sm:$0xff] }
 0x7f1   :  { %3245 = vrot.lane.b32.xlu2 %v2549_v57, %s4652_s25  ;;  %v3677_v48 = vpack.c.bf16 %v3661_v0, %v3661_v0 }
 0x7f3   :  { %v3717_v31 = vunpack.c.l.b16 %v3677_v48 }
 0x7f4   :  { %3265 = vrot.lane.b32.xlu0 %v2559_v5, %s4652_s25 }
 0x7f5   :  { %3261 = vrot.lane.b32.xlu1 %v2557_v43, %s4652_s25  ;;  %v3155_v43 = vmul.f32 %v7150_v7, %v6194_v21  ;;  %v7154_v21 = vld [vmem:[#allocation82_spill] sm:$0xff] }
 0x7f9   :  { %3251 = vrot.lane.b32.xlu2 %v2552_v11, %s4652_s25  ;;  %v7151_v11 = vld [vmem:[#allocation52_spill] sm:$0xff] }
 0x7fa   :  { %v3153_v30 = vmul.f32 %v7152_v60, %v7151_v11 }
 0x7fc   :  { %3271 = vrot.lane.b32.xlu0 %v2562_v19, %s4652_s25 }
 0x7fd   :  { %3267 = vrot.lane.b32.xlu1 %v2560_v45, %s4652_s25  ;;  %v7153_v45 = vld [vmem:[#allocation41_spill] sm:$0xff] }
 0x7fe   :  { %v2564_v22 = vmul.f32 %v7154_v21, %v7153_v45  ;;  %v7173_v21 = vld [vmem:[#allocation83_spill] sm:$0xff] }
 0x801   :  { %3257 = vrot.lane.b32.xlu2 %v2555_v37, %s4652_s25  ;;  %v3773_v16 = vpop.f32.mrf.mxu0 }
 0x802   :  { %v3774_v54 = vadd.f32 %v6533_v55, %v3773_v16  ;;  %v7155_v16 = vld [vmem:[#allocation108_spill] sm:$0xff] }
 0x804   :  { %3813 = vst.msk [vmem:[#allocation14] sm:$0xff] %vm231_vm0, %v3774_v54  ;;  %3309 = vrot.lane.b32.xlu0 %v3149_v10, %s4653_s7  ;;  %v1067_v53 = vpop.xlane.xlu2 %1066  ;;  %v3158_v54 = vmul.f32 %v7156_v8, %v7155_v16  ;;  %v7157_v10 = vld [vmem:[#allocation53_spill] sm:$0xff] }
 0x805   :  { %4402 = vrcp.f32 %v1067_v53  ;;  %3273 = vrot.lane.b32.xlu1 %v2563_v9, %s4652_s25  ;;  %v3156_v53 = vmul.f32 %v7159_v35, %v7158_v26  ;;  %v7176_v8 = vld [vmem:[#allocation109_spill] sm:$0xff]  ;;  %v7178_v26 = vld [vmem:[#allocation28_spill] sm:$0xff] }
 0x806   :  { %v7179_v35 = vld [vmem:[#allocation97_spill] sm:$0xff] }
 0x809   :  { %3263 = vrot.lane.b32.xlu2 %v2558_v24, %s4652_s25  ;;  %v3775_v4 = vpop.f32.mrf.mxu0 }
 0x80a   :  { %v3776_v41 = vadd.f32 %v6533_v55, %v3775_v4 }
 0x80b   :  { %v6558_v14 = vpop.eup %4402 }
 0x80c   :  { %v1345_v50 = vmul.f32 %v6558_v14, %v7147_v63  ;;  %3814 = vst.msk [vmem:[#allocation14 + $0x8] sm:$0xff] %vm231_vm0, %v3776_v41  ;;  %3315 = vrot.lane.b32.xlu0 %v3152_v39, %s4653_s7  ;;  %v4138_v46 = vpop.permute.xlu2 %4137  ;;  %v7161_v41 = vld [vmem:[#allocation68_spill] sm:$0xff]  ;;  %v7162_v39 = vld [vmem:[#allocation45_spill] sm:$0xff] }
 0x80d   :  { %3311 = vrot.lane.b32.xlu1 %v3150_v29, %s4653_s7  ;;  %v4139_v12 = vunpack.i.l.bf16 %v4138_v46  ;;  %v4140_v44 = vunpack.i.h.bf16 %v4138_v46  ;;  %v3151_v29 = vmul.f32 %v7162_v39, %v7161_v41 }
 0x80e   :  { %v3627_v56 = vsel %vm701_vm1, %v1345_v50, %v4124_v27 }
 0x80f   :  { %v3643_v57 = vsel %vm932_vm2, %v3627_v56, %v4129_v2  ;;  %v7164_v56 = vld [vmem:[#allocation74_spill] sm:$0xff] }
 0x810   :  { %v3660_v18 = vsel %vm3647_vm3, %v3643_v57, %v4134_v6  ;;  %v7163_v6 = vld [vmem:[#allocation44_spill] sm:$0xff]  ;;  %v7167_v57 = vld [vmem:[#allocation51_spill] sm:$0xff] }
 0x811   :  { %3269 = vrot.lane.b32.xlu2 %v2561_v32, %s4652_s25  ;;  %v3778_v61 = vpop.f32.mrf.mxu0  ;;  %v3676_v5 = vpack.c.bf16 %v3660_v18, %v3660_v18  ;;  %v3161_v46 = vmul.f32 %v7164_v56, %v7163_v6  ;;  %v1351_v32 = vmul.f32 %v7166_v1, %v7165_v58  ;;  %v7168_v18 = vld [vmem:[#allocation119_spill] sm:$0xff]  ;;  %v7187_v6 = vld [vmem:[#allocation112_spill] sm:$0xff] }
 0x812   :  { %v3779_v25 = vadd.f32 %v6533_v55, %v3778_v61  ;;  %v3159_v61 = vmul.f32 %v7168_v18, %v7167_v57  ;;  %v7189_v58 = vld [vmem:[#allocation43_spill] sm:$0xff]  ;;  %v7190_v18 = vld [vmem:[#allocation66_spill] sm:$0xff] }
 0x813   :  { %v1073_v34 = vpop.xlane.xlu0 %1072  ;;  %v3716_v49 = vunpack.c.l.b16 %v3676_v5 }
 0x814   :  { %3815 = vst.msk [vmem:[#allocation14 + $0x10] sm:$0xff] %vm231_vm0, %v3779_v25  ;;  %4404 = vrcp.f32 %v1073_v34  ;;  %3321 = vrot.lane.b32.xlu0 %v3155_v43, %s4653_s7  ;;  %v4143_v19 = vpop.permute.xlu2 %4142  ;;  %v7169_v43 = vld [vmem:[#allocation23_spill] sm:$0xff] }
 0x815   :  { %3317 = vrot.lane.b32.xlu1 %v3153_v30, %s4653_s7  ;;  %v3726_v38 = vpack.c.b16 %v3717_v31, %v3716_v49  ;;  %v4144_v13 = vunpack.i.l.bf16 %v4143_v19  ;;  %v4145_v27 = vunpack.i.h.bf16 %v4143_v19  ;;  %v7170_v31 = vld [vmem:[#allocation123_spill] sm:$0xff] }
 0x816   :  { %v1349_v34 = vmul.f32 %v7170_v31, %v7169_v43  ;;  %v7171_v19 = vld [vmem:[#allocation107_spill] sm:$0xff] }
 0x817   :  { %3995 = vmatmul.msk.bf16.gmra.mxu0 %vm231_vm0, %v3726_v38  ;;  %v1076_v17 = vpop.xlane.xlu1 %1075  ;;  %v7172_v38 = vld [vmem:[#allocation114_spill] sm:$0xff] }
 0x818   :  { %4406 = vrcp.f32 %v1076_v17  ;;  %v3154_v17 = vmul.f32 %v7172_v38, %v7171_v19  ;;  %v7194_v38 = vld [vmem:[#allocation34_spill] sm:$0xff] }
 0x819   :  { %3275 = vrot.lane.b32.xlu2 %v2564_v22, %s4652_s25  ;;  %v3780_v23 = vpop.f32.mrf.mxu0  ;;  %v3164_v22 = vmul.f32 %v6426_v33, %v7173_v21  ;;  %v7181_v33 = vld [vmem:[#allocation122_spill] sm:$0xff] }
 0x81a   :  { %v6586_v20 = vpop.eup %4404  ;;  %v3781_v37 = vadd.f32 %v6533_v55, %v3780_v23  ;;  %v7174_v23 = vld [vmem:[#allocation26_spill] sm:$0xff] }
 0x81b   :  { %v1347_v9 = vmul.f32 %v6586_v20, %v7157_v10 }
 0x81c   :  { %3816 = vst.msk [vmem:[#allocation14 + $0x18] sm:$0xff] %vm231_vm0, %v3781_v37  ;;  %3327 = vrot.lane.b32.xlu0 %v3158_v54, %s4653_s7  ;;  %v4148_v40 = vpop.permute.xlu2 %4147  ;;  %v7175_v37 = vld [vmem:[#allocation80_spill] sm:$0xff]  ;;  %v7177_v54 = vld [vmem:[#allocation73_spill] sm:$0xff] }
 0x81d   :  { %v3629_v62 = vsel %vm701_vm1, %v1347_v9, %v4139_v12  ;;  %v4149_v15 = vunpack.i.l.bf16 %v4148_v40  ;;  %3323 = vrot.lane.b32.xlu1 %v3156_v53, %s4653_s7  ;;  %v4150_v63 = vunpack.i.h.bf16 %v4148_v40  ;;  %v1352_v16 = vmul.f32 %v7175_v37, %v7174_v23  ;;  %v7180_v40 = vld [vmem:[#allocation24_spill] sm:$0xff]  ;;  %v7197_v23 = vld [vmem:[#allocation111_spill] sm:$0xff] }
 0x81e   :  { %v6599_v36 = vpop.eup %4406  ;;  %v3645_v24 = vsel %vm932_vm2, %v3629_v62, %v4144_v13  ;;  %v3162_v12 = vmul.f32 %v7177_v54, %v7176_v8  ;;  %v1354_v53 = vmul.f32 %v7179_v35, %v7178_v26  ;;  %v1350_v62 = vmul.f32 %v7181_v33, %v7180_v40  ;;  %v7198_v54 = vld [vmem:[#allocation42_spill] sm:$0xff]  ;;  %v7199_v26 = vld [vmem:[#allocation33_spill] sm:$0xff] }
 0x81f   :  { %v1348_v4 = vmul.f32 %v6599_v36, %v7160_v52  ;;  %v3662_v59 = vsel %vm3647_vm3, %v3645_v24, %v4149_v15  ;;  %v7183_v52 = vld [vmem:[#allocation117_spill] sm:$0xff]  ;;  %v1363_v33 = vmul.f32 %v6586_v20, %v7102_v3 }
 0x820   :  { %v3678_v2 = vpack.c.bf16 %v3662_v59, %v3662_v59  ;;  %v7200_v35 = vld [vmem:[#allocation113_spill] sm:$0xff] }
 0x821   :  { %v3630_v0 = vsel %vm701_vm1, %v1348_v4, %v4140_v44  ;;  %3313 = vrot.lane.b32.xlu2 %v3151_v29, %s4653_s7  ;;  %v7182_v44 = vld [vmem:[#allocation69_spill] sm:$0xff]  ;;  %v7184_v29 = vld [vmem:[#allocation27_spill] sm:$0xff] }
 0x822   :  { %v3646_v50 = vsel %vm932_vm2, %v3630_v0, %v4145_v27  ;;  %v3718_v60 = vunpack.c.l.b16 %v3678_v2  ;;  %v3157_v4 = vmul.f32 %v7183_v52, %v7182_v44  ;;  %v7185_v27 = vld [vmem:[#allocation48_spill] sm:$0xff]  ;;  %v7186_v2 = vld [vmem:[#allocation31_spill] sm:$0xff] }
 0x823   :  { %v3663_v48 = vsel %vm3647_vm3, %v3646_v50, %v4150_v63  ;;  %v1353_v0 = vmul.f32 %v7185_v27, %v7184_v29  ;;  %v1357_v56 = vmul.f32 %v7187_v6, %v7186_v2 }
 0x824   :  { %v3679_v5 = vpack.c.bf16 %v3663_v48, %v3663_v48  ;;  %3333 = vrot.lane.b32.xlu0 %v3161_v46, %s4653_s7  ;;  %v3186_v25 = vpop.permute.xlu2 %3185  ;;  %v7188_v48 = vld [vmem:[#allocation29_spill] sm:$0xff] }
 0x825   :  { %v6619_v7 = vsel %vm932_vm2, %v1351_v32, %v3186_v25  ;;  %3329 = vrot.lane.b32.xlu1 %v3159_v61, %s4653_s7  ;;  %v1355_v1 = vmul.f32 %v7189_v58, %v7188_v48  ;;  %v7191_v61 = vld [vmem:[#allocation118_spill] sm:$0xff] }
 0x826   :  { %v3719_v11 = vunpack.c.l.b16 %v3679_v5  ;;  %v3182_v30 = vpop.permute.xlu0 %3181  ;;  %v3160_v5 = vmul.f32 %v7191_v61, %v7190_v18 }
 0x827   :  { %v6625_v49 = vsel %vm932_vm2, %v1349_v34, %v3182_v30  ;;  %v7192_v34 = vld [vmem:[#allocation30_spill] sm:$0xff] }
 0x828   :  { %v3727_v45 = vpack.c.b16 %v3719_v11, %v3718_v60  ;;  %v7193_v11 = vld [vmem:[#allocation67_spill] sm:$0xff] }
 0x829   :  { %3319 = vrot.lane.b32.xlu2 %v3154_v17, %s4653_s7  ;;  %v1356_v60 = vmul.f32 %v7193_v11, %v7192_v34  ;;  %v7195_v17 = vld [vmem:[#allocation116_spill] sm:$0xff] }
 0x82a   :  { %3996 = vmatmul.msk.bf16.gmra.mxu0 %vm231_vm0, %v3727_v45  ;;  %v1360_v45 = vmul.f32 %v7195_v17, %v7194_v38 }
 0x82c   :  { %3339 = vrot.lane.b32.xlu0 %v3164_v22, %s4653_s7  ;;  %v3188_v10 = vpop.permute.xlu2 %3187  ;;  %v7196_v22 = vld [vmem:[#allocation32_spill] sm:$0xff] }
 0x82d   :  { %v6639_v9 = vsel %vm932_vm2, %v1352_v16, %v3188_v10  ;;  %3335 = vrot.lane.b32.xlu1 %v3162_v12, %s4653_s7  ;;  %v1358_v37 = vmul.f32 %v7197_v23, %v7196_v22  ;;  %v3163_v12 = vmul.f32 %v6440_v42, %v7198_v54 }
 0x82e   :  { %v3192_v13 = vpop.permute.xlu0 %3191 }
 0x82f   :  { %v6647_v15 = vsel %vm932_vm2, %v1354_v53, %v3192_v13  ;;  %v3184_v24 = vpop.permute.xlu1 %3183  ;;  %v1359_v53 = vmul.f32 %v7200_v35, %v7199_v26 }
 0x830   :  { %v6652_v59 = vsel %vm932_vm2, %v1350_v62, %v3184_v24  ;;  %v3783_v41 = vpop.f32.mrf.mxu0  ;;  %v1361_v24 = vmul.f32 %v6558_v14, %v7101_v28  ;;  %v1364_v14 = vmul.f32 %v6599_v36, %v7103_v47 }
 0x831   :  { %3325 = vrot.lane.b32.xlu2 %v3157_v4, %s4653_s7  ;;  %v3784_v39 = vadd.f32 %v6533_v55, %v3783_v41 }
 0x833   :  { %3817 = vst.msk [vmem:[#allocation14 + $0x20] sm:$0xff] %vm231_vm0, %v3784_v39  ;;  %v7201_v39 = vld [vmem:[#allocation36_spill] sm:$0xff] }
 0x834   :  { %v3190_v63 = vpop.permute.xlu2 %3189  ;;  %v1362_v29 = vmul.f32 %v6537_v51, %v7201_v39 }
 0x835   :  { %v6660_v50 = vsel %vm932_vm2, %v1353_v0, %v3190_v63 }
 0x836   :  { %v3198_v46 = vpop.permute.xlu0 %3197 }
 0x837   :  { %v6667_v32 = vsel %vm932_vm2, %v1357_v56, %v3198_v46  ;;  %v3194_v57 = vpop.permute.xlu1 %3193 }
 0x838   :  { %v6672_v25 = vsel %vm932_vm2, %v1355_v1, %v3194_v57  ;;  %v3785_v43 = vpop.f32.mrf.mxu0 }
 0x839   :  { %3331 = vrot.lane.b32.xlu2 %v3160_v5, %s4653_s7  ;;  %v3786_v31 = vadd.f32 %v6533_v55, %v3785_v43 }
 0x83b   :  { %3818 = vst.msk [vmem:[#allocation14 + $0x28] sm:$0xff] %vm231_vm0, %v3786_v31 }
 0x83c   :  { %v3196_v30 = vpop.permute.xlu2 %3195 }
 0x83d   :  { %v6680_v19 = vsel %vm932_vm2, %v1356_v60, %v3196_v30 }
 0x83e   :  { %v3204_v21 = vpop.permute.xlu0 %3203 }
 0x83f   :  { %v6687_v16 = vsel %vm932_vm2, %v1360_v45, %v3204_v21  ;;  %v3200_v8 = vpop.permute.xlu1 %3199 }
 0x840   :  { %v6692_v10 = vsel %vm932_vm2, %v1358_v37, %v3200_v8 }
 0x841   :  { %3337 = vrot.lane.b32.xlu2 %v3163_v12, %s4653_s7 }
 0x844   :  { %v3202_v13 = vpop.permute.xlu2 %3201 }
 0x845   :  { %v6698_v40 = vsel %vm932_vm2, %v1359_v53, %v3202_v13 }
 0x846   :  { %v3210_v62 = vpop.permute.xlu0 %3209 }
 0x847   :  { %v6705_v42 = vsel %vm932_vm2, %v1363_v33, %v3210_v62  ;;  %v3206_v44 = vpop.permute.xlu1 %3205 }
 0x848   :  { %v6708_v52 = vsel %vm932_vm2, %v1361_v24, %v3206_v44 }
 0x849   :  { %v3788_v4 = vpop.f32.mrf.mxu0 }
 0x84a   :  { %v3789_v41 = vadd.f32 %v6533_v55, %v3788_v4 }
 0x84c   :  { %3819 = vst.msk [vmem:[#allocation14 + $0x30] sm:$0xff] %vm231_vm0, %v3789_v41  ;;  %v3208_v3 = vpop.permute.xlu2 %3207 }
 0x84d   :  { %v6715_v20 = vsel %vm932_vm2, %v1362_v29, %v3208_v3 }
 0x84e   :  { %v3248_v28 = vpop.permute.xlu0 %3247 }
 0x84f   :  { %v3212_v27 = vpop.permute.xlu1 %3211  ;;  %v3374_v12 = vsel %vm231_vm0, %v6652_v59, %v3248_v28 }
 0x850   :  { %v6720_v0 = vsel %vm932_vm2, %v1364_v14, %v3212_v27 }
 0x851   :  { %v3790_v63 = vpop.f32.mrf.mxu0 }
 0x852   :  { %v3791_v2 = vadd.f32 %v6533_v55, %v3790_v63 }
 0x854   :  { %3820 = vst.msk [vmem:[#allocation14 + $0x38] sm:$0xff] %vm231_vm0, %v3791_v2  ;;  %v3246_v51 = vpop.permute.xlu2 %3245 }
 0x855   :  { %v3373_v45 = vsel %vm231_vm0, %v6625_v49, %v3246_v51 }
 0x856   :  { %v3254_v6 = vpop.permute.xlu0 %3253 }
 0x857   :  { %v3250_v56 = vpop.permute.xlu1 %3249  ;;  %v3377_v62 = vsel %vm231_vm0, %v6660_v50, %v3254_v6 }
 0x858   :  { %v3375_v53 = vsel %vm231_vm0, %v6619_v7, %v3250_v56 }
 0x859   :  { %v3793_v46 = vpop.f32.mrf.mxu0 }
 0x85a   :  { %v3794_v48 = vadd.f32 %v6533_v55, %v3793_v46 }
 0x85c   :  { %3821 = vst.msk [vmem:[#allocation14 + $0x40] sm:$0xff] %vm231_vm0, %v3794_v48  ;;  %v3252_v58 = vpop.permute.xlu2 %3251 }
 0x85d   :  { %v3376_v8 = vsel %vm231_vm0, %v6639_v9, %v3252_v58 }
 0x85e   :  { %v3260_v1 = vpop.permute.xlu0 %3259 }
 0x85f   :  { %v3256_v47 = vpop.permute.xlu1 %3255  ;;  %v3380_v29 = vsel %vm231_vm0, %v6680_v19, %v3260_v1 }
 0x860   :  { %v3378_v7 = vsel %vm231_vm0, %v6647_v15, %v3256_v47 }
 0x861   :  { %v3795_v36 = vpop.f32.mrf.mxu0 }
 0x862   :  { %v3796_v57 = vadd.f32 %v6533_v55, %v3795_v36 }
 0x864   :  { %3822 = vst.msk [vmem:[#allocation14 + $0x48] sm:$0xff] %vm231_vm0, %v3796_v57  ;;  %v3258_v18 = vpop.permute.xlu2 %3257 }
 0x865   :  { %v3379_v9 = vsel %vm231_vm0, %v6672_v25, %v3258_v18 }
 0x866   :  { %v3266_v61 = vpop.permute.xlu0 %3265 }
 0x867   :  { %v3262_v5 = vpop.permute.xlu1 %3261  ;;  %v3383_v6 = vsel %vm231_vm0, %v6698_v40, %v3266_v61 }
 0x868   :  { %v3381_v15 = vsel %vm231_vm0, %v6667_v32, %v3262_v5 }
 0x869   :  { %v3798_v43 = vpop.f32.mrf.mxu0 }
 0x86a   :  { %v3799_v31 = vadd.f32 %v6533_v55, %v3798_v43 }
 0x86c   :  { %3823 = vst.msk [vmem:[#allocation14 + $0x50] sm:$0xff] %vm231_vm0, %v3799_v31  ;;  %v3264_v34 = vpop.permute.xlu2 %3263 }
 0x86d   :  { %v3382_v39 = vsel %vm231_vm0, %v6692_v10, %v3264_v34 }
 0x86e   :  { %v6730_v11 = vpop.permute.xlu0 %3271 }
 0x86f   :  { %v3268_v60 = vpop.permute.xlu1 %3267  ;;  %v3386_v57 = vsel %vm231_vm0, %v6715_v20, %v6730_v11 }
 0x871   :  { %v3800_v30 = vpop.f32.mrf.mxu0 }
 0x872   :  { %v3801_v38 = vadd.f32 %v6533_v55, %v3800_v30 }
 0x874   :  { %3824 = vst.msk [vmem:[#allocation14 + $0x58] sm:$0xff] %vm231_vm0, %v3801_v38  ;;  %v3270_v17 = vpop.permute.xlu2 %3269 }
 0x875   :  { %v3385_v19 = vsel %vm231_vm0, %v6708_v52, %v3270_v17  ;;  %v3384_v52 = vsel %vm231_vm0, %v6687_v16, %v3268_v60 }
 0x876   :  { %v3310_v21 = vpop.permute.xlu0 %3309 }
 0x877   :  { %v3390_v22 = vsel %vm3389_vm4, %v3373_v45, %v3310_v21  ;;  %v6737_v23 = vpop.permute.xlu1 %3273 }
 0x878   :  { %3407 = vst.msk [vmem:[#allocation15] sm:$0xff] %vm3406_vm5, %v3390_v22  ;;  %v3387_v20 = vsel %vm231_vm0, %v6705_v42, %v6737_v23 }
 0x87c   :  { %v3276_v37 = vpop.permute.xlu2 %3275 }
 0x87d   :  { %v3388_v47 = vsel %vm231_vm0, %v6720_v0, %v3276_v37 }
 0x87e   :  { %v3316_v54 = vpop.permute.xlu0 %3315 }
 0x87f   :  { %v3393_v26 = vsel %vm3389_vm4, %v3376_v8, %v3316_v54  ;;  %v3312_v35 = vpop.permute.xlu1 %3311 }
 0x880   :  { %3410 = vst.msk [vmem:[#allocation15 + $0x18] sm:$0xff] %vm3406_vm5, %v3393_v26  ;;  %v3391_v49 = vsel %vm3389_vm4, %v3374_v12, %v3312_v35 }
 0x881   :  { %3408 = vst.msk [vmem:[#allocation15 + $0x8] sm:$0xff] %vm3406_vm5, %v3391_v49 }
 0x884   :  { %v3314_v13 = vpop.permute.xlu2 %3313 }
 0x885   :  { %v3392_v33 = vsel %vm3389_vm4, %v3375_v53, %v3314_v13 }
 0x886   :  { %3409 = vst.msk [vmem:[#allocation15 + $0x10] sm:$0xff] %vm3406_vm5, %v3392_v33  ;;  %v3322_v59 = vpop.permute.xlu0 %3321 }
 0x887   :  { %v3396_v24 = vsel %vm3389_vm4, %v3379_v9, %v3322_v59  ;;  %v3318_v44 = vpop.permute.xlu1 %3317 }
 0x888   :  { %3413 = vst.msk [vmem:[#allocation15 + $0x30] sm:$0xff] %vm3406_vm5, %v3396_v24  ;;  %v3394_v4 = vsel %vm3389_vm4, %v3377_v62, %v3318_v44 }
 0x889   :  { %3411 = vst.msk [vmem:[#allocation15 + $0x20] sm:$0xff] %vm3406_vm5, %v3394_v4 }
 0x88c   :  { %v3320_v41 = vpop.permute.xlu2 %3319 }
 0x88d   :  { %v3395_v25 = vsel %vm3389_vm4, %v3378_v7, %v3320_v41 }
 0x88e   :  { %3412 = vst.msk [vmem:[#allocation15 + $0x28] sm:$0xff] %vm3406_vm5, %v3395_v25  ;;  %v3328_v50 = vpop.permute.xlu0 %3327 }
 0x88f   :  { %v3399_v3 = vsel %vm3389_vm4, %v3382_v39, %v3328_v50  ;;  %v3324_v28 = vpop.permute.xlu1 %3323 }
 0x890   :  { %3416 = vst.msk [vmem:[#allocation15 + $0x48] sm:$0xff] %vm3406_vm5, %v3399_v3  ;;  %v3397_v14 = vsel %vm3389_vm4, %v3380_v29, %v3324_v28 }
 0x891   :  { %3414 = vst.msk [vmem:[#allocation15 + $0x38] sm:$0xff] %vm3406_vm5, %v3397_v14 }
 0x894   :  { %v3326_v27 = vpop.permute.xlu2 %3325  ;;  %v3803_v10 = vpop.f32.mrf.mxu0 }
 0x895   :  { %v3398_v63 = vsel %vm3389_vm4, %v3381_v15, %v3326_v27  ;;  %v3804_v2 = vadd.f32 %v6533_v55, %v3803_v10 }
 0x896   :  { %3415 = vst.msk [vmem:[#allocation15 + $0x40] sm:$0xff] %vm3406_vm5, %v3398_v63  ;;  %v3334_v51 = vpop.permute.xlu0 %3333 }
 0x897   :  { %3825 = vst.msk [vmem:[#allocation14 + $0x60] sm:$0xff] %vm231_vm0, %v3804_v2  ;;  %v3402_v56 = vsel %vm3389_vm4, %v3385_v19, %v3334_v51  ;;  %v3330_v32 = vpop.permute.xlu1 %3329 }
 0x898   :  { %3419 = vst.msk [vmem:[#allocation15 + $0x60] sm:$0xff] %vm3406_vm5, %v3402_v56  ;;  %v3400_v46 = vsel %vm3389_vm4, %v3383_v6, %v3330_v32 }
 0x899   :  { %3417 = vst.msk [vmem:[#allocation15 + $0x50] sm:$0xff] %vm3406_vm5, %v3400_v46 }
 0x89c   :  { %v3332_v48 = vpop.permute.xlu2 %3331  ;;  %v3805_v58 = vpop.f32.mrf.mxu0 }
 0x89d   :  { %v3401_v1 = vsel %vm3389_vm4, %v3384_v52, %v3332_v48  ;;  %v3806_v40 = vadd.f32 %v6533_v55, %v3805_v58 }
 0x89e   :  { %3418 = vst.msk [vmem:[#allocation15 + $0x58] sm:$0xff] %vm3406_vm5, %v3401_v1  ;;  %v3340_v36 = vpop.permute.xlu0 %3339 }
 0x89f   :  { %3826 = vst.msk [vmem:[#allocation14 + $0x68] sm:$0xff] %vm231_vm0, %v3806_v40  ;;  %v3405_v16 = vsel %vm3389_vm4, %v3388_v47, %v3340_v36  ;;  %v3336_v18 = vpop.permute.xlu1 %3335 }
 0x8a0   :  { %3422 = vst.msk [vmem:[#allocation15 + $0x78] sm:$0xff] %vm3406_vm5, %v3405_v16  ;;  %v3403_v61 = vsel %vm3389_vm4, %v3386_v57, %v3336_v18 }
 0x8a1   :  { %3420 = vst.msk [vmem:[#allocation15 + $0x68] sm:$0xff] %vm3406_vm5, %v3403_v61 }
 0x8a4   :  { %v3338_v0 = vpop.permute.xlu2 %3337 }
 0x8a5   :  { %v3404_v5 = vsel %vm3389_vm4, %v3387_v20, %v3338_v0 }
 0x8a6   :  { %3421 = vst.msk [vmem:[#allocation15 + $0x70] sm:$0xff] %vm3406_vm5, %v3404_v5 }
 0x8a7   :  { %v3808_v43 = vpop.f32.mrf.mxu0  ;;  %3854 = dma.vmem_to_hbm [thread:$0]  %s3847_s29, 2048, %s3849_s11, [#allocation16], %s4637_s17, %s4637_s17, %s4638_s18  }
 0x8a8   :  { %v3809_v31 = vadd.f32 %v6533_v55, %v3808_v43 }
 0x8aa   :  { %3827 = vst.msk [vmem:[#allocation14 + $0x70] sm:$0xff] %vm231_vm0, %v3809_v31 }
 0x8af   :  { %v3810_v42 = vpop.f32.mrf.mxu0 }
 0x8b0   :  { %v3811_v34 = vadd.f32 %v6533_v55, %v3810_v42 }
 0x8b2   :  { %3828 = vst.msk [vmem:[#allocation14 + $0x78] sm:$0xff] %vm231_vm0, %v3811_v34 }
 0x8b3   :  { %3841 = dma.vmem_to_hbm [thread:$0]  %s3834_s12, 2048, %s3836_s0, [#allocation4], %s4637_s17, %s4637_s17, %s4638_s18  }
 0x8b4   :  { %4632 = dma.done.wait [#allocation4], 2048  }
 0x8b5   :  { %4633 = vsyncadd [#allocation4], 4294965248 }
 0x8b6   :  { %4634 = dma.done.wait [#allocation16], 2048  }
 0x8b7   :  { %4635 = vsyncadd [#allocation16], 4294965248 }
 0x8b8   :  { %3863 = vsyncpa [#allocation3], 1 }
 0x8b9   :  { %3864 = vsyncpa [#allocation6], 1 }
 0x8ba   :  { %3865 = vsyncpa [#allocation9], 1 }
 0x8bb   :  { %3866 = vsyncpa [#allocation12], 1 }
 0x8bc   :  { %3867 = vsyncpa [#allocation4], 1 }
 0x8bd   :  { %3868 = vsyncpa [#allocation16], 1 }

</bundles_post_ra>
